<compile_context>
chip_gen: v6e
topology: v6e:2x2x1
jax: 0.10.0
libtpu: 0.0.40
codegen_flags: <defaults>
</compile_context>

<pallas_src>
import jax
import jax.numpy as jnp
from jax.experimental import pallas as pl
from jax.experimental.pallas import tpu as pltpu


def _round_up(x, m):
    return ((x + m - 1) // m) * m


def _vmem_limit_bytes():
    # Raise the scoped-VMEM limit (defaults 16/32 MiB) but stay well inside
    # physical capacity (64 MiB on v7x, 128 MiB on v5e/v6e).
    try:
        cap = pltpu.get_tpu_info().vmem_capacity_bytes
    except Exception:
        cap = 64 << 20
    return int(min(cap * 3 // 4, 96 << 20))


def _default_tile_n():
    # 256-wide output-channel strips fill the 2x256x256 MXU on v6e/v7x; v5e's
    # MXU is 4x128x128 (128 is enough there and on older chips).
    try:
        kind = jax.devices()[0].device_kind.lower()
    except Exception:
        kind = ""
    return 256 if ("v6" in kind or "v7" in kind) else 128


def _conv_stats_kernel(*refs):
    """Direct (kh x kw, stride 1) conv for `bh` output rows x one Cout strip,
    plus per-block partial BN sums.

    refs = (x_row_0 .. x_row_{bh+kh-2},  # (1,1,Wp,Cin) bf16 padded input rows
            w_ref,                        # (kh,kw,Cin,tn) bf16 weight strip
            y_ref,                        # (1,bh,Wout,tn) bf16 conv output
            psum_ref, pssq_ref,           # (1,1,tn) f32 partial sum / sum-sq
            xs_ref)                       # (bh+kh-1,Wp,Cin) bf16 VMEM staging
    """
    *x_refs, w_ref, y_ref, psum_ref, pssq_ref, xs_ref = refs
    kh, kw, cin = w_ref.shape[0], w_ref.shape[1], w_ref.shape[2]
    bh, wout, tn = y_ref.shape[1], y_ref.shape[2], y_ref.shape[3]

    # Stage the bh+kh-1 halo'd input rows contiguously so every tap is a single
    # (bh*Wout, Cin) static slice -> one MXU matmul per tap (contraction = Cin).
    for r in range(len(x_refs)):
        xs_ref[r] = x_refs[r][0, 0]

    acc = jnp.zeros((bh * wout, tn), jnp.float32)
    for dy in range(kh):
        for dx in range(kw):
            sub = xs_ref[dy:dy + bh, dx:dx + wout, :].reshape(bh * wout, cin)
            acc = acc + jnp.dot(sub, w_ref[dy, dx],
                                preferred_element_type=jnp.float32)

    y_ref[0] = acc.reshape(bh, wout, tn).astype(y_ref.dtype)
    # Partial BN stats from the f32 accumulator, written to distinct output
    # blocks so every grid axis stays "parallel" (megacore-safe).
    psum_ref[0] = jnp.sum(acc, axis=0, keepdims=True)
    pssq_ref[0] = jnp.sum(acc * acc, axis=0, keepdims=True)


def _bn_relu_nchw_kernel(y_ref, scale_ref, bias_ref, o_ref):
    """Folded-BN per-channel affine + ReLU on a bf16 y tile; the tile is stored
    transposed so the kernel emits NCHW directly (no trailing XLA transpose)."""
    y = y_ref[0].astype(jnp.float32)                        # (thw, tc)
    y = jnp.maximum(y * scale_ref[...] + bias_ref[...], 0.0)
    o_ref[0] = jnp.transpose(y).astype(o_ref.dtype)         # (tc, thw)


def conv_bn_relu(x_nchw, weight, gamma, beta, *, stride=1, padding=1, eps=1e-5,
                 tile_n=None, block_h=8, out_dtype=jnp.bfloat16):
    """Conv2d(no bias) -> BatchNorm2d (training-mode batch stats) -> ReLU.
    NCHW in, NCHW out.  out_dtype=jnp.float32 is available for bit-parity."""
    if stride != 1:
        # TODO(synk): stride > 1 needs strided in-kernel W slices; the module
        # default (and this spec instance) uses stride=1.
        raise NotImplementedError("Pallas conv_bn_relu supports stride=1 only")

    N, Cin, H, W = x_nchw.shape
    Cout, _, kh, kw = weight.shape
    Hout = H + 2 * padding - kh + 1
    Wout = W + 2 * padding - kw + 1
    Wp = W + 2 * padding

    if tile_n is None:
        tile_n = _default_tile_n()

    # Lane-dense output-channel strips: tn is a multiple of 128 dividing Cp.
    Cp = _round_up(Cout, 128)
    if tile_n >= Cp:
        tn = Cp
    elif Cp % tile_n == 0:
        tn = tile_n
    else:
        tn = 128
    n_cb = Cp // tn

    bh = max(1, min(block_h, Hout))
    vmem_limit = _vmem_limit_bytes()

    # VMEM guard (v7x: 64 MiB physical / ~48 MiB scoped): shrink the row block
    # first, then fall back to a 128-wide channel strip.
    def _p1_vmem(b, t):
        rows = b + kh - 1
        return (2 * (rows * Wp * Cin * 2 + kh * kw * Cin * t * 2
                     + b * Wout * t * 2 + 2 * t * 4)
                + rows * Wp * Cin * 2
                + b * Wout * t * 4
                + 2 * b * Wout * Cin * 2)

    budget = int(0.7 * vmem_limit)
    while _p1_vmem(bh, tn) > budget and bh > 1:
        bh = max(1, bh // 2)
    if _p1_vmem(bh, tn) > budget and tn > 128:
        tn = 128
        n_cb = Cp // tn

    Houtp = _round_up(Hout, bh)
    n_hb = Houtp // bh
    n_rows = bh + kh - 1

    # ---- glue: NCHW -> NHWC (bf16) + spatial zero pad.  Extra bottom rows
    # cover the padded-H output blocks: they convolve zeros, contribute nothing
    # to the BN sums, and are sliced away at the end. ----
    x = jnp.transpose(x_nchw, (0, 2, 3, 1)).astype(jnp.bfloat16)
    xp = jnp.pad(x, ((0, 0),
                     (padding, padding + (Houtp - Hout)),
                     (padding, padding),
                     (0, 0)))

    # PyTorch weight (Cout, Cin, kh, kw) -> (kh, kw, Cin, Cp), zero-padded.
    w_mat = jnp.transpose(weight, (2, 3, 1, 0)).astype(jnp.bfloat16)
    if Cp != Cout:
        w_mat = jnp.pad(w_mat, ((0, 0), (0, 0), (0, 0), (0, Cp - Cout)))

    # The bh+kh-1 overlapping halo rows are expressed as that many single-row
    # blocks of the *same* padded array (plain Blocked specs; no materialized
    # im2col, no manual halo-DMA boilerplate).
    x_specs = [
        pl.BlockSpec((1, 1, Wp, Cin),
                     lambda cb, n, hb, r=r, b=bh: (n, hb * b + r, 0, 0))
        for r in range(n_rows)
    ]
    # cb is the outermost grid axis and the only index the weight block depends
    # on, so the weight strip is fetched once per strip, not per row tile.
    w_spec = pl.BlockSpec((kh, kw, Cin, tn), lambda cb, n, hb: (0, 0, 0, cb))

    # ---- pass 1: direct conv + per-block partial BN statistics ----
    y, psum, pssq = pl.pallas_call(
        _conv_stats_kernel,
        out_shape=(
            jax.ShapeDtypeStruct((N, Houtp, Wout, Cp), jnp.bfloat16),
            jax.ShapeDtypeStruct((N * n_hb, 1, Cp), jnp.float32),
            jax.ShapeDtypeStruct((N * n_hb, 1, Cp), jnp.float32),
        ),
        grid_spec=pltpu.PrefetchScalarGridSpec(
            num_scalar_prefetch=0,
            grid=(n_cb, N, n_hb),
            in_specs=x_specs + [w_spec],
            out_specs=(
                pl.BlockSpec((1, bh, Wout, tn),
                             lambda cb, n, hb: (n, hb, 0, cb)),
                pl.BlockSpec((1, 1, tn),
                             lambda cb, n, hb, g=n_hb: (n * g + hb, 0, cb)),
                pl.BlockSpec((1, 1, tn),
                             lambda cb, n, hb, g=n_hb: (n * g + hb, 0, cb)),
            ),
            scratch_shapes=[pltpu.VMEM((n_rows, Wp, Cin), jnp.bfloat16)],
        ),
        compiler_params=pltpu.CompilerParams(
            dimension_semantics=("parallel", "parallel", "parallel"),
            vmem_limit_bytes=vmem_limit,
        ),
    )(*([xp] * n_rows), w_mat)

    # ---- glue: fold training-mode BatchNorm (biased batch var) into scale/bias.
    # NOTE: E[y^2]-E[y]^2 in f32 (clamped >= 0); switch to a shifted / Welford
    # accumulation if channel means ever dwarf their std. ----
    Mvalid = N * Hout * Wout
    ysum = jnp.sum(psum[:, 0, :Cout], axis=0)
    yssq = jnp.sum(pssq[:, 0, :Cout], axis=0)
    mean = ysum / Mvalid
    var = jnp.maximum(yssq / Mvalid - mean * mean, 0.0)
    scale = gamma.astype(jnp.float32) * jax.lax.rsqrt(var + eps)
    bias = beta.astype(jnp.float32) - mean * scale
    scale_p = jnp.zeros((1, Cp), jnp.float32).at[0, :Cout].set(scale)
    bias_p = jnp.zeros((1, Cp), jnp.float32).at[0, :Cout].set(bias)

    # ---- pass 2: BN affine + ReLU, bf16 y stream, NCHW written directly ----
    HWvalid = Hout * Wout
    HWtot = Houtp * Wout
    HWp = _round_up(HWtot, 128)
    y2 = y.reshape(N, HWtot, Cp)
    if HWp != HWtot:
        # TODO(synk): only hit when Hout*Wout % 128 != 0; costs one pad copy.
        y2 = jnp.pad(y2, ((0, 0), (0, HWp - HWtot), (0, 0)))

    thw = 128
    for k in range(min(HWp, 2048) // 128, 0, -1):
        if HWp % (128 * k) == 0:
            thw = 128 * k
            break
    n_hw2 = HWp // thw
    tc2 = tn
    n_c2 = Cp // tc2

    out_flat = pl.pallas_call(
        _bn_relu_nchw_kernel,
        out_shape=jax.ShapeDtypeStruct((N, Cp, HWp), out_dtype),
        grid_spec=pltpu.PrefetchScalarGridSpec(
            num_scalar_prefetch=0,
            grid=(N, n_c2, n_hw2),
            in_specs=[
                pl.BlockSpec((1, thw, tc2), lambda n, c, h: (n, h, c)),
                pl.BlockSpec((1, tc2), lambda n, c, h: (0, c)),
                pl.BlockSpec((1, tc2), lambda n, c, h: (0, c)),
            ],
            out_specs=pl.BlockSpec((1, tc2, thw), lambda n, c, h: (n, c, h)),
        ),
        compiler_params=pltpu.CompilerParams(
            dimension_semantics=("parallel", "parallel", "parallel"),
            vmem_limit_bytes=vmem_limit,
        ),
    )(y2, scale_p, bias_p)

    # Pad-strip slice; a no-op when Cout and Hout*Wout are already 128-aligned.
    out = out_flat[:, :Cout, :HWvalid].reshape(N, Cout, Hout, Wout)
    return out


def _reference(x_nchw, weight, gamma, beta, *, stride=1, padding=1, eps=1e-5):
    y = jax.lax.conv_general_dilated(
        x_nchw.astype(jnp.float32), weight.astype(jnp.float32),
        window_strides=(stride, stride),
        padding=((padding, padding), (padding, padding)),
        dimension_numbers=("NCHW", "OIHW", "NCHW"),
        precision=jax.lax.Precision.HIGHEST)
    mean = jnp.mean(y, axis=(0, 2, 3), keepdims=True)
    var = jnp.mean((y - mean) ** 2, axis=(0, 2, 3), keepdims=True)
    yn = (y - mean) / jnp.sqrt(var + eps)
    yn = yn * gamma.reshape(1, -1, 1, 1) + beta.reshape(1, -1, 1, 1)
    return jnp.maximum(yn, 0.0)


if __name__ == "__main__":
    N, Cin, Cout, H, W, ks = 2, 4, 8, 16, 16, 3

    key = jax.random.PRNGKey(0)
    kx, kw_, kg, kb = jax.random.split(key, 4)

    x = jax.random.normal(kx, (N, Cin, H, W), dtype=jnp.float32)
    # kaiming_normal_(a=1): std = sqrt(2 / ((1 + a^2) * fan_in)) = sqrt(1/fan_in)
    fan_in = Cin * ks * ks
    weight = jax.random.normal(kw_, (Cout, Cin, ks, ks), dtype=jnp.float32) * (1.0 / fan_in) ** 0.5
    gamma = 1.0 + 0.1 * jax.random.normal(kg, (Cout,), dtype=jnp.float32)
    beta = 0.1 * jax.random.normal(kb, (Cout,), dtype=jnp.float32)

    fn = jax.jit(lambda a, b, c, d: conv_bn_relu(a, b, c, d, stride=1, padding=1))
    out = jax.block_until_ready(fn(x, weight, gamma, beta))

    ref = _reference(x, weight, gamma, beta, stride=1, padding=1)
    assert out.shape == ref.shape == (N, Cout, H, W)
    out_f32 = out.astype(jnp.float32)
    # bf16 GEMM inputs / bf16 intermediate+output vs a pure-f32 reference ->
    # loosened tolerance; real bugs (wrong taps, wrong stats) blow way past it.
    err = float(jnp.max(jnp.abs(out_f32 - ref)))
    assert jnp.allclose(out_f32, ref, atol=5e-2, rtol=5e-2), err

    print("KERNEL_OK")
</pallas_src>

<mosaic_0001>
module attributes {stable_mosaic.version = 11 : i64} {
  func.func @_conv_stats_kernel(%arg0: i32, %arg1: i32, %arg2: i32, %arg3: memref<1x1x18x4xbf16, #tpu.memory_space<vmem>>, %arg4: memref<1x1x18x4xbf16, #tpu.memory_space<vmem>>, %arg5: memref<1x1x18x4xbf16, #tpu.memory_space<vmem>>, %arg6: memref<1x1x18x4xbf16, #tpu.memory_space<vmem>>, %arg7: memref<1x1x18x4xbf16, #tpu.memory_space<vmem>>, %arg8: memref<1x1x18x4xbf16, #tpu.memory_space<vmem>>, %arg9: memref<1x1x18x4xbf16, #tpu.memory_space<vmem>>, %arg10: memref<1x1x18x4xbf16, #tpu.memory_space<vmem>>, %arg11: memref<1x1x18x4xbf16, #tpu.memory_space<vmem>>, %arg12: memref<1x1x18x4xbf16, #tpu.memory_space<vmem>>, %arg13: memref<3x3x4x128xbf16, #tpu.memory_space<vmem>>, %arg14: memref<1x8x16x128xbf16, #tpu.memory_space<vmem>>, %arg15: memref<1x1x128xf32, #tpu.memory_space<vmem>>, %arg16: memref<1x1x128xf32, #tpu.memory_space<vmem>>, %arg17: memref<10x18x4xbf16, #tpu.memory_space<vmem>>) attributes {dimension_semantics = [#tpu.dimension_semantics<parallel>, #tpu.dimension_semantics<parallel>, #tpu.dimension_semantics<parallel>], iteration_bounds = array<i64: 1, 2, 2>, scalar_prefetch = 0 : i64, scratch_operands = 1 : i64, tpu.core_type = #tpu.core_type<tc>, window_params = [{transform_indices = @transform_0, window_bounds = array<i64: 1, 1, 18, 4>}, {transform_indices = @transform_1, window_bounds = array<i64: 1, 1, 18, 4>}, {transform_indices = @transform_2, window_bounds = array<i64: 1, 1, 18, 4>}, {transform_indices = @transform_3, window_bounds = array<i64: 1, 1, 18, 4>}, {transform_indices = @transform_4, window_bounds = array<i64: 1, 1, 18, 4>}, {transform_indices = @transform_5, window_bounds = array<i64: 1, 1, 18, 4>}, {transform_indices = @transform_6, window_bounds = array<i64: 1, 1, 18, 4>}, {transform_indices = @transform_7, window_bounds = array<i64: 1, 1, 18, 4>}, {transform_indices = @transform_8, window_bounds = array<i64: 1, 1, 18, 4>}, {transform_indices = @transform_9, window_bounds = array<i64: 1, 1, 18, 4>}, {transform_indices = @transform_10, window_bounds = array<i64: 3, 3, 4, 128>}, {transform_indices = @transform_11, window_bounds = array<i64: 1, 8, 16, 128>}, {transform_indices = @transform_12, window_bounds = array<i64: 1, 1, 128>}, {transform_indices = @transform_13, window_bounds = array<i64: 1, 1, 128>}]} {
    %c0 = arith.constant 0 : index
    %c0_0 = arith.constant 0 : index
    %c0_1 = arith.constant 0 : index
    %c0_2 = arith.constant 0 : index
    %0 = vector.load %arg3[%c0, %c0_0, %c0_1, %c0_2] : memref<1x1x18x4xbf16, #tpu.memory_space<vmem>>, vector<1x1x18x4xbf16>
    %1 = vector.shape_cast %0 : vector<1x1x18x4xbf16> to vector<18x4xbf16>
    %c0_3 = arith.constant 0 : index
    %c0_4 = arith.constant 0 : index
    %c0_5 = arith.constant 0 : index
    %2 = vector.load %arg17[%c0_3, %c0_4, %c0_5] : memref<10x18x4xbf16, #tpu.memory_space<vmem>>, vector<1x18x4xbf16>
    %3 = vector.shape_cast %2 : vector<1x18x4xbf16> to vector<18x4xbf16>
    %4 = vector.shape_cast %1 : vector<18x4xbf16> to vector<1x18x4xbf16>
    tpu.vector_store %arg17[%c0_3, %c0_4, %c0_5], %4 {strides = array<i32>} : memref<10x18x4xbf16, #tpu.memory_space<vmem>>, vector<1x18x4xbf16>,
    %c0_6 = arith.constant 0 : index
    %c0_7 = arith.constant 0 : index
    %c0_8 = arith.constant 0 : index
    %c0_9 = arith.constant 0 : index
    %5 = vector.load %arg4[%c0_6, %c0_7, %c0_8, %c0_9] : memref<1x1x18x4xbf16, #tpu.memory_space<vmem>>, vector<1x1x18x4xbf16>
    %6 = vector.shape_cast %5 : vector<1x1x18x4xbf16> to vector<18x4xbf16>
    %c1 = arith.constant 1 : index
    %c0_10 = arith.constant 0 : index
    %c0_11 = arith.constant 0 : index
    %7 = vector.load %arg17[%c1, %c0_10, %c0_11] : memref<10x18x4xbf16, #tpu.memory_space<vmem>>, vector<1x18x4xbf16>
    %8 = vector.shape_cast %7 : vector<1x18x4xbf16> to vector<18x4xbf16>
    %9 = vector.shape_cast %6 : vector<18x4xbf16> to vector<1x18x4xbf16>
    tpu.vector_store %arg17[%c1, %c0_10, %c0_11], %9 {strides = array<i32>} : memref<10x18x4xbf16, #tpu.memory_space<vmem>>, vector<1x18x4xbf16>,
    %c0_12 = arith.constant 0 : index
    %c0_13 = arith.constant 0 : index
    %c0_14 = arith.constant 0 : index
    %c0_15 = arith.constant 0 : index
    %10 = vector.load %arg5[%c0_12, %c0_13, %c0_14, %c0_15] : memref<1x1x18x4xbf16, #tpu.memory_space<vmem>>, vector<1x1x18x4xbf16>
    %11 = vector.shape_cast %10 : vector<1x1x18x4xbf16> to vector<18x4xbf16>
    %c2 = arith.constant 2 : index
    %c0_16 = arith.constant 0 : index
    %c0_17 = arith.constant 0 : index
    %12 = vector.load %arg17[%c2, %c0_16, %c0_17] : memref<10x18x4xbf16, #tpu.memory_space<vmem>>, vector<1x18x4xbf16>
    %13 = vector.shape_cast %12 : vector<1x18x4xbf16> to vector<18x4xbf16>
    %14 = vector.shape_cast %11 : vector<18x4xbf16> to vector<1x18x4xbf16>
    tpu.vector_store %arg17[%c2, %c0_16, %c0_17], %14 {strides = array<i32>} : memref<10x18x4xbf16, #tpu.memory_space<vmem>>, vector<1x18x4xbf16>,
    %c0_18 = arith.constant 0 : index
    %c0_19 = arith.constant 0 : index
    %c0_20 = arith.constant 0 : index
    %c0_21 = arith.constant 0 : index
    %15 = vector.load %arg6[%c0_18, %c0_19, %c0_20, %c0_21] : memref<1x1x18x4xbf16, #tpu.memory_space<vmem>>, vector<1x1x18x4xbf16>
    %16 = vector.shape_cast %15 : vector<1x1x18x4xbf16> to vector<18x4xbf16>
    %c3 = arith.constant 3 : index
    %c0_22 = arith.constant 0 : index
    %c0_23 = arith.constant 0 : index
    %17 = vector.load %arg17[%c3, %c0_22, %c0_23] : memref<10x18x4xbf16, #tpu.memory_space<vmem>>, vector<1x18x4xbf16>
    %18 = vector.shape_cast %17 : vector<1x18x4xbf16> to vector<18x4xbf16>
    %19 = vector.shape_cast %16 : vector<18x4xbf16> to vector<1x18x4xbf16>
    tpu.vector_store %arg17[%c3, %c0_22, %c0_23], %19 {strides = array<i32>} : memref<10x18x4xbf16, #tpu.memory_space<vmem>>, vector<1x18x4xbf16>,
    %c0_24 = arith.constant 0 : index
    %c0_25 = arith.constant 0 : index
    %c0_26 = arith.constant 0 : index
    %c0_27 = arith.constant 0 : index
    %20 = vector.load %arg7[%c0_24, %c0_25, %c0_26, %c0_27] : memref<1x1x18x4xbf16, #tpu.memory_space<vmem>>, vector<1x1x18x4xbf16>
    %21 = vector.shape_cast %20 : vector<1x1x18x4xbf16> to vector<18x4xbf16>
    %c4 = arith.constant 4 : index
    %c0_28 = arith.constant 0 : index
    %c0_29 = arith.constant 0 : index
    %22 = vector.load %arg17[%c4, %c0_28, %c0_29] : memref<10x18x4xbf16, #tpu.memory_space<vmem>>, vector<1x18x4xbf16>
    %23 = vector.shape_cast %22 : vector<1x18x4xbf16> to vector<18x4xbf16>
    %24 = vector.shape_cast %21 : vector<18x4xbf16> to vector<1x18x4xbf16>
    tpu.vector_store %arg17[%c4, %c0_28, %c0_29], %24 {strides = array<i32>} : memref<10x18x4xbf16, #tpu.memory_space<vmem>>, vector<1x18x4xbf16>,
    %c0_30 = arith.constant 0 : index
    %c0_31 = arith.constant 0 : index
    %c0_32 = arith.constant 0 : index
    %c0_33 = arith.constant 0 : index
    %25 = vector.load %arg8[%c0_30, %c0_31, %c0_32, %c0_33] : memref<1x1x18x4xbf16, #tpu.memory_space<vmem>>, vector<1x1x18x4xbf16>
    %26 = vector.shape_cast %25 : vector<1x1x18x4xbf16> to vector<18x4xbf16>
    %c5 = arith.constant 5 : index
    %c0_34 = arith.constant 0 : index
    %c0_35 = arith.constant 0 : index
    %27 = vector.load %arg17[%c5, %c0_34, %c0_35] : memref<10x18x4xbf16, #tpu.memory_space<vmem>>, vector<1x18x4xbf16>
    %28 = vector.shape_cast %27 : vector<1x18x4xbf16> to vector<18x4xbf16>
    %29 = vector.shape_cast %26 : vector<18x4xbf16> to vector<1x18x4xbf16>
    tpu.vector_store %arg17[%c5, %c0_34, %c0_35], %29 {strides = array<i32>} : memref<10x18x4xbf16, #tpu.memory_space<vmem>>, vector<1x18x4xbf16>,
    %c0_36 = arith.constant 0 : index
    %c0_37 = arith.constant 0 : index
    %c0_38 = arith.constant 0 : index
    %c0_39 = arith.constant 0 : index
    %30 = vector.load %arg9[%c0_36, %c0_37, %c0_38, %c0_39] : memref<1x1x18x4xbf16, #tpu.memory_space<vmem>>, vector<1x1x18x4xbf16>
    %31 = vector.shape_cast %30 : vector<1x1x18x4xbf16> to vector<18x4xbf16>
    %c6 = arith.constant 6 : index
    %c0_40 = arith.constant 0 : index
    %c0_41 = arith.constant 0 : index
    %32 = vector.load %arg17[%c6, %c0_40, %c0_41] : memref<10x18x4xbf16, #tpu.memory_space<vmem>>, vector<1x18x4xbf16>
    %33 = vector.shape_cast %32 : vector<1x18x4xbf16> to vector<18x4xbf16>
    %34 = vector.shape_cast %31 : vector<18x4xbf16> to vector<1x18x4xbf16>
    tpu.vector_store %arg17[%c6, %c0_40, %c0_41], %34 {strides = array<i32>} : memref<10x18x4xbf16, #tpu.memory_space<vmem>>, vector<1x18x4xbf16>,
    %c0_42 = arith.constant 0 : index
    %c0_43 = arith.constant 0 : index
    %c0_44 = arith.constant 0 : index
    %c0_45 = arith.constant 0 : index
    %35 = vector.load %arg10[%c0_42, %c0_43, %c0_44, %c0_45] : memref<1x1x18x4xbf16, #tpu.memory_space<vmem>>, vector<1x1x18x4xbf16>
    %36 = vector.shape_cast %35 : vector<1x1x18x4xbf16> to vector<18x4xbf16>
    %c7 = arith.constant 7 : index
    %c0_46 = arith.constant 0 : index
    %c0_47 = arith.constant 0 : index
    %37 = vector.load %arg17[%c7, %c0_46, %c0_47] : memref<10x18x4xbf16, #tpu.memory_space<vmem>>, vector<1x18x4xbf16>
    %38 = vector.shape_cast %37 : vector<1x18x4xbf16> to vector<18x4xbf16>
    %39 = vector.shape_cast %36 : vector<18x4xbf16> to vector<1x18x4xbf16>
    tpu.vector_store %arg17[%c7, %c0_46, %c0_47], %39 {strides = array<i32>} : memref<10x18x4xbf16, #tpu.memory_space<vmem>>, vector<1x18x4xbf16>,
    %c0_48 = arith.constant 0 : index
    %c0_49 = arith.constant 0 : index
    %c0_50 = arith.constant 0 : index
    %c0_51 = arith.constant 0 : index
    %40 = vector.load %arg11[%c0_48, %c0_49, %c0_50, %c0_51] : memref<1x1x18x4xbf16, #tpu.memory_space<vmem>>, vector<1x1x18x4xbf16>
    %41 = vector.shape_cast %40 : vector<1x1x18x4xbf16> to vector<18x4xbf16>
    %c8 = arith.constant 8 : index
    %c0_52 = arith.constant 0 : index
    %c0_53 = arith.constant 0 : index
    %42 = vector.load %arg17[%c8, %c0_52, %c0_53] : memref<10x18x4xbf16, #tpu.memory_space<vmem>>, vector<1x18x4xbf16>
    %43 = vector.shape_cast %42 : vector<1x18x4xbf16> to vector<18x4xbf16>
    %44 = vector.shape_cast %41 : vector<18x4xbf16> to vector<1x18x4xbf16>
    tpu.vector_store %arg17[%c8, %c0_52, %c0_53], %44 {strides = array<i32>} : memref<10x18x4xbf16, #tpu.memory_space<vmem>>, vector<1x18x4xbf16>,
    %c0_54 = arith.constant 0 : index
    %c0_55 = arith.constant 0 : index
    %c0_56 = arith.constant 0 : index
    %c0_57 = arith.constant 0 : index
    %45 = vector.load %arg12[%c0_54, %c0_55, %c0_56, %c0_57] : memref<1x1x18x4xbf16, #tpu.memory_space<vmem>>, vector<1x1x18x4xbf16>
    %46 = vector.shape_cast %45 : vector<1x1x18x4xbf16> to vector<18x4xbf16>
    %c9 = arith.constant 9 : index
    %c0_58 = arith.constant 0 : index
    %c0_59 = arith.constant 0 : index
    %47 = vector.load %arg17[%c9, %c0_58, %c0_59] : memref<10x18x4xbf16, #tpu.memory_space<vmem>>, vector<1x18x4xbf16>
    %48 = vector.shape_cast %47 : vector<1x18x4xbf16> to vector<18x4xbf16>
    %49 = vector.shape_cast %46 : vector<18x4xbf16> to vector<1x18x4xbf16>
    tpu.vector_store %arg17[%c9, %c0_58, %c0_59], %49 {strides = array<i32>} : memref<10x18x4xbf16, #tpu.memory_space<vmem>>, vector<1x18x4xbf16>,
    %cst = arith.constant 0.000000e+00 : f32
    %50 = vector.broadcast %cst : f32 to vector<128x128xf32>
    %c0_60 = arith.constant 0 : index
    %c0_61 = arith.constant 0 : index
    %c0_62 = arith.constant 0 : index
    %51 = vector.load %arg17[%c0_60, %c0_61, %c0_62] : memref<10x18x4xbf16, #tpu.memory_space<vmem>>, vector<8x16x4xbf16>
    %52 = vector.shape_cast %51 : vector<8x16x4xbf16> to vector<128x4xbf16>
    %c0_63 = arith.constant 0 : index
    %c0_64 = arith.constant 0 : index
    %c0_65 = arith.constant 0 : index
    %c0_66 = arith.constant 0 : index
    %53 = vector.load %arg13[%c0_63, %c0_64, %c0_65, %c0_66] : memref<3x3x4x128xbf16, #tpu.memory_space<vmem>>, vector<1x1x4x128xbf16>
    %54 = vector.shape_cast %53 : vector<1x1x4x128xbf16> to vector<4x128xbf16>
    %cst_67 = arith.constant dense<0.000000e+00> : vector<128x128xf32>
    %55 = tpu.matmul %52, %54, %cst_67 {dimension_numbers = #tpu.dot_dimension_numbers<[1], [0], [0], [1], [0, 0, 1, 1], [], []>} : vector<128x4xbf16>, vector<4x128xbf16>, vector<128x128xf32> -> vector<128x128xf32>
    %56 = arith.addf %50, %55 : vector<128x128xf32>
    %c0_68 = arith.constant 0 : index
    %c1_69 = arith.constant 1 : index
    %c0_70 = arith.constant 0 : index
    %57 = vector.load %arg17[%c0_68, %c1_69, %c0_70] : memref<10x18x4xbf16, #tpu.memory_space<vmem>>, vector<8x16x4xbf16>
    %58 = vector.shape_cast %57 : vector<8x16x4xbf16> to vector<128x4xbf16>
    %c0_71 = arith.constant 0 : index
    %c1_72 = arith.constant 1 : index
    %c0_73 = arith.constant 0 : index
    %c0_74 = arith.constant 0 : index
    %59 = vector.load %arg13[%c0_71, %c1_72, %c0_73, %c0_74] : memref<3x3x4x128xbf16, #tpu.memory_space<vmem>>, vector<1x1x4x128xbf16>
    %60 = vector.shape_cast %59 : vector<1x1x4x128xbf16> to vector<4x128xbf16>
    %cst_75 = arith.constant dense<0.000000e+00> : vector<128x128xf32>
    %61 = tpu.matmul %58, %60, %cst_75 {dimension_numbers = #tpu.dot_dimension_numbers<[1], [0], [0], [1], [0, 0, 1, 1], [], []>} : vector<128x4xbf16>, vector<4x128xbf16>, vector<128x128xf32> -> vector<128x128xf32>
    %62 = arith.addf %56, %61 : vector<128x128xf32>
    %c0_76 = arith.constant 0 : index
    %c2_77 = arith.constant 2 : index
    %c0_78 = arith.constant 0 : index
    %63 = vector.load %arg17[%c0_76, %c2_77, %c0_78] : memref<10x18x4xbf16, #tpu.memory_space<vmem>>, vector<8x16x4xbf16>
    %64 = vector.shape_cast %63 : vector<8x16x4xbf16> to vector<128x4xbf16>
    %c0_79 = arith.constant 0 : index
    %c2_80 = arith.constant 2 : index
    %c0_81 = arith.constant 0 : index
    %c0_82 = arith.constant 0 : index
    %65 = vector.load %arg13[%c0_79, %c2_80, %c0_81, %c0_82] : memref<3x3x4x128xbf16, #tpu.memory_space<vmem>>, vector<1x1x4x128xbf16>
    %66 = vector.shape_cast %65 : vector<1x1x4x128xbf16> to vector<4x128xbf16>
    %cst_83 = arith.constant dense<0.000000e+00> : vector<128x128xf32>
    %67 = tpu.matmul %64, %66, %cst_83 {dimension_numbers = #tpu.dot_dimension_numbers<[1], [0], [0], [1], [0, 0, 1, 1], [], []>} : vector<128x4xbf16>, vector<4x128xbf16>, vector<128x128xf32> -> vector<128x128xf32>
    %68 = arith.addf %62, %67 : vector<128x128xf32>
    %c1_84 = arith.constant 1 : index
    %c0_85 = arith.constant 0 : index
    %c0_86 = arith.constant 0 : index
    %69 = vector.load %arg17[%c1_84, %c0_85, %c0_86] : memref<10x18x4xbf16, #tpu.memory_space<vmem>>, vector<8x16x4xbf16>
    %70 = vector.shape_cast %69 : vector<8x16x4xbf16> to vector<128x4xbf16>
    %c1_87 = arith.constant 1 : index
    %c0_88 = arith.constant 0 : index
    %c0_89 = arith.constant 0 : index
    %c0_90 = arith.constant 0 : index
    %71 = vector.load %arg13[%c1_87, %c0_88, %c0_89, %c0_90] : memref<3x3x4x128xbf16, #tpu.memory_space<vmem>>, vector<1x1x4x128xbf16>
    %72 = vector.shape_cast %71 : vector<1x1x4x128xbf16> to vector<4x128xbf16>
    %cst_91 = arith.constant dense<0.000000e+00> : vector<128x128xf32>
    %73 = tpu.matmul %70, %72, %cst_91 {dimension_numbers = #tpu.dot_dimension_numbers<[1], [0], [0], [1], [0, 0, 1, 1], [], []>} : vector<128x4xbf16>, vector<4x128xbf16>, vector<128x128xf32> -> vector<128x128xf32>
    %74 = arith.addf %68, %73 : vector<128x128xf32>
    %c1_92 = arith.constant 1 : index
    %c1_93 = arith.constant 1 : index
    %c0_94 = arith.constant 0 : index
    %75 = vector.load %arg17[%c1_92, %c1_93, %c0_94] : memref<10x18x4xbf16, #tpu.memory_space<vmem>>, vector<8x16x4xbf16>
    %76 = vector.shape_cast %75 : vector<8x16x4xbf16> to vector<128x4xbf16>
    %c1_95 = arith.constant 1 : index
    %c1_96 = arith.constant 1 : index
    %c0_97 = arith.constant 0 : index
    %c0_98 = arith.constant 0 : index
    %77 = vector.load %arg13[%c1_95, %c1_96, %c0_97, %c0_98] : memref<3x3x4x128xbf16, #tpu.memory_space<vmem>>, vector<1x1x4x128xbf16>
    %78 = vector.shape_cast %77 : vector<1x1x4x128xbf16> to vector<4x128xbf16>
    %cst_99 = arith.constant dense<0.000000e+00> : vector<128x128xf32>
    %79 = tpu.matmul %76, %78, %cst_99 {dimension_numbers = #tpu.dot_dimension_numbers<[1], [0], [0], [1], [0, 0, 1, 1], [], []>} : vector<128x4xbf16>, vector<4x128xbf16>, vector<128x128xf32> -> vector<128x128xf32>
    %80 = arith.addf %74, %79 : vector<128x128xf32>
    %c1_100 = arith.constant 1 : index
    %c2_101 = arith.constant 2 : index
    %c0_102 = arith.constant 0 : index
    %81 = vector.load %arg17[%c1_100, %c2_101, %c0_102] : memref<10x18x4xbf16, #tpu.memory_space<vmem>>, vector<8x16x4xbf16>
    %82 = vector.shape_cast %81 : vector<8x16x4xbf16> to vector<128x4xbf16>
    %c1_103 = arith.constant 1 : index
    %c2_104 = arith.constant 2 : index
    %c0_105 = arith.constant 0 : index
    %c0_106 = arith.constant 0 : index
    %83 = vector.load %arg13[%c1_103, %c2_104, %c0_105, %c0_106] : memref<3x3x4x128xbf16, #tpu.memory_space<vmem>>, vector<1x1x4x128xbf16>
    %84 = vector.shape_cast %83 : vector<1x1x4x128xbf16> to vector<4x128xbf16>
    %cst_107 = arith.constant dense<0.000000e+00> : vector<128x128xf32>
    %85 = tpu.matmul %82, %84, %cst_107 {dimension_numbers = #tpu.dot_dimension_numbers<[1], [0], [0], [1], [0, 0, 1, 1], [], []>} : vector<128x4xbf16>, vector<4x128xbf16>, vector<128x128xf32> -> vector<128x128xf32>
    %86 = arith.addf %80, %85 : vector<128x128xf32>
    %c2_108 = arith.constant 2 : index
    %c0_109 = arith.constant 0 : index
    %c0_110 = arith.constant 0 : index
    %87 = vector.load %arg17[%c2_108, %c0_109, %c0_110] : memref<10x18x4xbf16, #tpu.memory_space<vmem>>, vector<8x16x4xbf16>
    %88 = vector.shape_cast %87 : vector<8x16x4xbf16> to vector<128x4xbf16>
    %c2_111 = arith.constant 2 : index
    %c0_112 = arith.constant 0 : index
    %c0_113 = arith.constant 0 : index
    %c0_114 = arith.constant 0 : index
    %89 = vector.load %arg13[%c2_111, %c0_112, %c0_113, %c0_114] : memref<3x3x4x128xbf16, #tpu.memory_space<vmem>>, vector<1x1x4x128xbf16>
    %90 = vector.shape_cast %89 : vector<1x1x4x128xbf16> to vector<4x128xbf16>
    %cst_115 = arith.constant dense<0.000000e+00> : vector<128x128xf32>
    %91 = tpu.matmul %88, %90, %cst_115 {dimension_numbers = #tpu.dot_dimension_numbers<[1], [0], [0], [1], [0, 0, 1, 1], [], []>} : vector<128x4xbf16>, vector<4x128xbf16>, vector<128x128xf32> -> vector<128x128xf32>
    %92 = arith.addf %86, %91 : vector<128x128xf32>
    %c2_116 = arith.constant 2 : index
    %c1_117 = arith.constant 1 : index
    %c0_118 = arith.constant 0 : index
    %93 = vector.load %arg17[%c2_116, %c1_117, %c0_118] : memref<10x18x4xbf16, #tpu.memory_space<vmem>>, vector<8x16x4xbf16>
    %94 = vector.shape_cast %93 : vector<8x16x4xbf16> to vector<128x4xbf16>
    %c2_119 = arith.constant 2 : index
    %c1_120 = arith.constant 1 : index
    %c0_121 = arith.constant 0 : index
    %c0_122 = arith.constant 0 : index
    %95 = vector.load %arg13[%c2_119, %c1_120, %c0_121, %c0_122] : memref<3x3x4x128xbf16, #tpu.memory_space<vmem>>, vector<1x1x4x128xbf16>
    %96 = vector.shape_cast %95 : vector<1x1x4x128xbf16> to vector<4x128xbf16>
    %cst_123 = arith.constant dense<0.000000e+00> : vector<128x128xf32>
    %97 = tpu.matmul %94, %96, %cst_123 {dimension_numbers = #tpu.dot_dimension_numbers<[1], [0], [0], [1], [0, 0, 1, 1], [], []>} : vector<128x4xbf16>, vector<4x128xbf16>, vector<128x128xf32> -> vector<128x128xf32>
    %98 = arith.addf %92, %97 : vector<128x128xf32>
    %c2_124 = arith.constant 2 : index
    %c2_125 = arith.constant 2 : index
    %c0_126 = arith.constant 0 : index
    %99 = vector.load %arg17[%c2_124, %c2_125, %c0_126] : memref<10x18x4xbf16, #tpu.memory_space<vmem>>, vector<8x16x4xbf16>
    %100 = vector.shape_cast %99 : vector<8x16x4xbf16> to vector<128x4xbf16>
    %c2_127 = arith.constant 2 : index
    %c2_128 = arith.constant 2 : index
    %c0_129 = arith.constant 0 : index
    %c0_130 = arith.constant 0 : index
    %101 = vector.load %arg13[%c2_127, %c2_128, %c0_129, %c0_130] : memref<3x3x4x128xbf16, #tpu.memory_space<vmem>>, vector<1x1x4x128xbf16>
    %102 = vector.shape_cast %101 : vector<1x1x4x128xbf16> to vector<4x128xbf16>
    %cst_131 = arith.constant dense<0.000000e+00> : vector<128x128xf32>
    %103 = tpu.matmul %100, %102, %cst_131 {dimension_numbers = #tpu.dot_dimension_numbers<[1], [0], [0], [1], [0, 0, 1, 1], [], []>} : vector<128x4xbf16>, vector<4x128xbf16>, vector<128x128xf32> -> vector<128x128xf32>
    %104 = arith.addf %98, %103 : vector<128x128xf32>
    %105 = vector.shape_cast %104 : vector<128x128xf32> to vector<8x16x128xf32>
    %106 = arith.truncf %105 : vector<8x16x128xf32> to vector<8x16x128xbf16>
    %c0_132 = arith.constant 0 : index
    %c0_133 = arith.constant 0 : index
    %c0_134 = arith.constant 0 : index
    %c0_135 = arith.constant 0 : index
    %107 = vector.load %arg14[%c0_132, %c0_133, %c0_134, %c0_135] : memref<1x8x16x128xbf16, #tpu.memory_space<vmem>>, vector<1x8x16x128xbf16>
    %108 = vector.shape_cast %107 : vector<1x8x16x128xbf16> to vector<8x16x128xbf16>
    %109 = vector.shape_cast %106 : vector<8x16x128xbf16> to vector<1x8x16x128xbf16>
    tpu.vector_store %arg14[%c0_132, %c0_133, %c0_134, %c0_135], %109 {strides = array<i32>} : memref<1x8x16x128xbf16, #tpu.memory_space<vmem>>, vector<1x8x16x128xbf16>,
    %cst_136 = arith.constant dense<0.000000e+00> : vector<128xf32>
    %110 = vector.multi_reduction <add>, %104, %cst_136 [0] : vector<128x128xf32> to vector<128xf32>
    %111 = vector.shape_cast %110 : vector<128xf32> to vector<1x128xf32>
    %c0_137 = arith.constant 0 : index
    %c0_138 = arith.constant 0 : index
    %c0_139 = arith.constant 0 : index
    %112 = vector.load %arg15[%c0_137, %c0_138, %c0_139] : memref<1x1x128xf32, #tpu.memory_space<vmem>>, vector<1x1x128xf32>
    %113 = vector.shape_cast %112 : vector<1x1x128xf32> to vector<1x128xf32>
    %114 = vector.shape_cast %111 : vector<1x128xf32> to vector<1x1x128xf32>
    tpu.vector_store %arg15[%c0_137, %c0_138, %c0_139], %114 {strides = array<i32>} : memref<1x1x128xf32, #tpu.memory_space<vmem>>, vector<1x1x128xf32>,
    %115 = arith.mulf %104, %104 : vector<128x128xf32>
    %cst_140 = arith.constant dense<0.000000e+00> : vector<128xf32>
    %116 = vector.multi_reduction <add>, %115, %cst_140 [0] : vector<128x128xf32> to vector<128xf32>
    %117 = vector.shape_cast %116 : vector<128xf32> to vector<1x128xf32>
    %c0_141 = arith.constant 0 : index
    %c0_142 = arith.constant 0 : index
    %c0_143 = arith.constant 0 : index
    %118 = vector.load %arg16[%c0_141, %c0_142, %c0_143] : memref<1x1x128xf32, #tpu.memory_space<vmem>>, vector<1x1x128xf32>
    %119 = vector.shape_cast %118 : vector<1x1x128xf32> to vector<1x128xf32>
    %120 = vector.shape_cast %117 : vector<1x128xf32> to vector<1x1x128xf32>
    tpu.vector_store %arg16[%c0_141, %c0_142, %c0_143], %120 {strides = array<i32>} : memref<1x1x128xf32, #tpu.memory_space<vmem>>, vector<1x1x128xf32>,
    return
  }
  func.func @transform_0(%arg0: i32, %arg1: i32, %arg2: i32) -> (i32, i32, i32, i32) {
    %c8_i32 = arith.constant 8 : i32
    %0 = arith.muli %arg2, %c8_i32 : i32
    %c0_i32 = arith.constant 0 : i32
    %1 = arith.addi %0, %c0_i32 : i32
    %c0_i32_0 = arith.constant 0 : i32
    %c0_i32_1 = arith.constant 0 : i32
    %c0_i32_2 = arith.constant 0 : i32
    return %arg1, %1, %c0_i32_0, %c0_i32_1 : i32, i32, i32, i32
  }
  func.func @transform_1(%arg0: i32, %arg1: i32, %arg2: i32) -> (i32, i32, i32, i32) {
    %c8_i32 = arith.constant 8 : i32
    %0 = arith.muli %arg2, %c8_i32 : i32
    %c1_i32 = arith.constant 1 : i32
    %1 = arith.addi %0, %c1_i32 : i32
    %c0_i32 = arith.constant 0 : i32
    %c0_i32_0 = arith.constant 0 : i32
    %c0_i32_1 = arith.constant 0 : i32
    return %arg1, %1, %c0_i32, %c0_i32_0 : i32, i32, i32, i32
  }
  func.func @transform_2(%arg0: i32, %arg1: i32, %arg2: i32) -> (i32, i32, i32, i32) {
    %c8_i32 = arith.constant 8 : i32
    %0 = arith.muli %arg2, %c8_i32 : i32
    %c2_i32 = arith.constant 2 : i32
    %1 = arith.addi %0, %c2_i32 : i32
    %c0_i32 = arith.constant 0 : i32
    %c0_i32_0 = arith.constant 0 : i32
    %c0_i32_1 = arith.constant 0 : i32
    return %arg1, %1, %c0_i32, %c0_i32_0 : i32, i32, i32, i32
  }
  func.func @transform_3(%arg0: i32, %arg1: i32, %arg2: i32) -> (i32, i32, i32, i32) {
    %c8_i32 = arith.constant 8 : i32
    %0 = arith.muli %arg2, %c8_i32 : i32
    %c3_i32 = arith.constant 3 : i32
    %1 = arith.addi %0, %c3_i32 : i32
    %c0_i32 = arith.constant 0 : i32
    %c0_i32_0 = arith.constant 0 : i32
    %c0_i32_1 = arith.constant 0 : i32
    return %arg1, %1, %c0_i32, %c0_i32_0 : i32, i32, i32, i32
  }
  func.func @transform_4(%arg0: i32, %arg1: i32, %arg2: i32) -> (i32, i32, i32, i32) {
    %c8_i32 = arith.constant 8 : i32
    %0 = arith.muli %arg2, %c8_i32 : i32
    %c4_i32 = arith.constant 4 : i32
    %1 = arith.addi %0, %c4_i32 : i32
    %c0_i32 = arith.constant 0 : i32
    %c0_i32_0 = arith.constant 0 : i32
    %c0_i32_1 = arith.constant 0 : i32
    return %arg1, %1, %c0_i32, %c0_i32_0 : i32, i32, i32, i32
  }
  func.func @transform_5(%arg0: i32, %arg1: i32, %arg2: i32) -> (i32, i32, i32, i32) {
    %c8_i32 = arith.constant 8 : i32
    %0 = arith.muli %arg2, %c8_i32 : i32
    %c5_i32 = arith.constant 5 : i32
    %1 = arith.addi %0, %c5_i32 : i32
    %c0_i32 = arith.constant 0 : i32
    %c0_i32_0 = arith.constant 0 : i32
    %c0_i32_1 = arith.constant 0 : i32
    return %arg1, %1, %c0_i32, %c0_i32_0 : i32, i32, i32, i32
  }
  func.func @transform_6(%arg0: i32, %arg1: i32, %arg2: i32) -> (i32, i32, i32, i32) {
    %c8_i32 = arith.constant 8 : i32
    %0 = arith.muli %arg2, %c8_i32 : i32
    %c6_i32 = arith.constant 6 : i32
    %1 = arith.addi %0, %c6_i32 : i32
    %c0_i32 = arith.constant 0 : i32
    %c0_i32_0 = arith.constant 0 : i32
    %c0_i32_1 = arith.constant 0 : i32
    return %arg1, %1, %c0_i32, %c0_i32_0 : i32, i32, i32, i32
  }
  func.func @transform_7(%arg0: i32, %arg1: i32, %arg2: i32) -> (i32, i32, i32, i32) {
    %c8_i32 = arith.constant 8 : i32
    %0 = arith.muli %arg2, %c8_i32 : i32
    %c7_i32 = arith.constant 7 : i32
    %1 = arith.addi %0, %c7_i32 : i32
    %c0_i32 = arith.constant 0 : i32
    %c0_i32_0 = arith.constant 0 : i32
    %c0_i32_1 = arith.constant 0 : i32
    return %arg1, %1, %c0_i32, %c0_i32_0 : i32, i32, i32, i32
  }
  func.func @transform_8(%arg0: i32, %arg1: i32, %arg2: i32) -> (i32, i32, i32, i32) {
    %c8_i32 = arith.constant 8 : i32
    %0 = arith.muli %arg2, %c8_i32 : i32
    %c8_i32_0 = arith.constant 8 : i32
    %1 = arith.addi %0, %c8_i32_0 : i32
    %c0_i32 = arith.constant 0 : i32
    %c0_i32_1 = arith.constant 0 : i32
    %c0_i32_2 = arith.constant 0 : i32
    return %arg1, %1, %c0_i32, %c0_i32_1 : i32, i32, i32, i32
  }
  func.func @transform_9(%arg0: i32, %arg1: i32, %arg2: i32) -> (i32, i32, i32, i32) {
    %c8_i32 = arith.constant 8 : i32
    %0 = arith.muli %arg2, %c8_i32 : i32
    %c9_i32 = arith.constant 9 : i32
    %1 = arith.addi %0, %c9_i32 : i32
    %c0_i32 = arith.constant 0 : i32
    %c0_i32_0 = arith.constant 0 : i32
    %c0_i32_1 = arith.constant 0 : i32
    return %arg1, %1, %c0_i32, %c0_i32_0 : i32, i32, i32, i32
  }
  func.func @transform_10(%arg0: i32, %arg1: i32, %arg2: i32) -> (i32, i32, i32, i32) {
    %c0_i32 = arith.constant 0 : i32
    %c0_i32_0 = arith.constant 0 : i32
    %c0_i32_1 = arith.constant 0 : i32
    %c0_i32_2 = arith.constant 0 : i32
    return %c0_i32, %c0_i32_0, %c0_i32_1, %arg0 : i32, i32, i32, i32
  }
  func.func @transform_11(%arg0: i32, %arg1: i32, %arg2: i32) -> (i32, i32, i32, i32) {
    %c0_i32 = arith.constant 0 : i32
    %c0_i32_0 = arith.constant 0 : i32
    return %arg1, %arg2, %c0_i32, %arg0 : i32, i32, i32, i32
  }
  func.func @transform_12(%arg0: i32, %arg1: i32, %arg2: i32) -> (i32, i32, i32) {
    %c2_i32 = arith.constant 2 : i32
    %0 = arith.muli %arg1, %c2_i32 : i32
    %1 = arith.addi %0, %arg2 : i32
    %c0_i32 = arith.constant 0 : i32
    %c0_i32_0 = arith.constant 0 : i32
    return %1, %c0_i32, %arg0 : i32, i32, i32
  }
  func.func @transform_13(%arg0: i32, %arg1: i32, %arg2: i32) -> (i32, i32, i32) {
    %c2_i32 = arith.constant 2 : i32
    %0 = arith.muli %arg1, %c2_i32 : i32
    %1 = arith.addi %0, %arg2 : i32
    %c0_i32 = arith.constant 0 : i32
    %c0_i32_0 = arith.constant 0 : i32
    return %1, %c0_i32, %arg0 : i32, i32, i32
  }
}

module attributes {stable_mosaic.version = 11 : i64} {
  func.func @_bn_relu_nchw_kernel(%arg0: i32, %arg1: i32, %arg2: i32, %arg3: memref<1x256x128xbf16, #tpu.memory_space<vmem>>, %arg4: memref<1x128xf32, #tpu.memory_space<vmem>>, %arg5: memref<1x128xf32, #tpu.memory_space<vmem>>, %arg6: memref<1x128x256xbf16, #tpu.memory_space<vmem>>) attributes {dimension_semantics = [#tpu.dimension_semantics<parallel>, #tpu.dimension_semantics<parallel>, #tpu.dimension_semantics<parallel>], iteration_bounds = array<i64: 2, 1, 1>, scalar_prefetch = 0 : i64, scratch_operands = 0 : i64, tpu.core_type = #tpu.core_type<tc>, window_params = [{transform_indices = @transform_0, window_bounds = array<i64: 1, 256, 128>}, {transform_indices = @transform_1, window_bounds = array<i64: 1, 128>}, {transform_indices = @transform_2, window_bounds = array<i64: 1, 128>}, {transform_indices = @transform_3, window_bounds = array<i64: 1, 128, 256>}]} {
    %c0 = arith.constant 0 : index
    %c0_0 = arith.constant 0 : index
    %c0_1 = arith.constant 0 : index
    %0 = vector.load %arg3[%c0, %c0_0, %c0_1] : memref<1x256x128xbf16, #tpu.memory_space<vmem>>, vector<1x256x128xbf16>
    %1 = vector.shape_cast %0 : vector<1x256x128xbf16> to vector<256x128xbf16>
    %2 = arith.extf %1 : vector<256x128xbf16> to vector<256x128xf32>
    %c0_2 = arith.constant 0 : index
    %c0_3 = arith.constant 0 : index
    %3 = vector.load %arg4[%c0_2, %c0_3] : memref<1x128xf32, #tpu.memory_space<vmem>>, vector<1x128xf32>
    %4 = vector.broadcast %3 : vector<1x128xf32> to vector<256x128xf32>
    %5 = arith.mulf %2, %4 : vector<256x128xf32>
    %c0_4 = arith.constant 0 : index
    %c0_5 = arith.constant 0 : index
    %6 = vector.load %arg5[%c0_4, %c0_5] : memref<1x128xf32, #tpu.memory_space<vmem>>, vector<1x128xf32>
    %7 = vector.broadcast %6 : vector<1x128xf32> to vector<256x128xf32>
    %8 = arith.addf %5, %7 : vector<256x128xf32>
    %cst = arith.constant 0.000000e+00 : f32
    %9 = vector.broadcast %cst : f32 to vector<256x128xf32>
    %10 = arith.maximumf %8, %9 : vector<256x128xf32>
    %11 = tpu.transpose %10, [1, 0] : vector<256x128xf32> -> vector<128x256xf32>
    %12 = arith.truncf %11 : vector<128x256xf32> to vector<128x256xbf16>
    %c0_6 = arith.constant 0 : index
    %c0_7 = arith.constant 0 : index
    %c0_8 = arith.constant 0 : index
    %13 = vector.load %arg6[%c0_6, %c0_7, %c0_8] : memref<1x128x256xbf16, #tpu.memory_space<vmem>>, vector<1x128x256xbf16>
    %14 = vector.shape_cast %13 : vector<1x128x256xbf16> to vector<128x256xbf16>
    %15 = vector.shape_cast %12 : vector<128x256xbf16> to vector<1x128x256xbf16>
    tpu.vector_store %arg6[%c0_6, %c0_7, %c0_8], %15 {strides = array<i32>} : memref<1x128x256xbf16, #tpu.memory_space<vmem>>, vector<1x128x256xbf16>,
    return
  }
  func.func @transform_0(%arg0: i32, %arg1: i32, %arg2: i32) -> (i32, i32, i32) {
    %c0_i32 = arith.constant 0 : i32
    return %arg0, %arg2, %arg1 : i32, i32, i32
  }
  func.func @transform_1(%arg0: i32, %arg1: i32, %arg2: i32) -> (i32, i32) {
    %c0_i32 = arith.constant 0 : i32
    %c0_i32_0 = arith.constant 0 : i32
    return %c0_i32, %arg1 : i32, i32
  }
  func.func @transform_2(%arg0: i32, %arg1: i32, %arg2: i32) -> (i32, i32) {
    %c0_i32 = arith.constant 0 : i32
    %c0_i32_0 = arith.constant 0 : i32
    return %c0_i32, %arg1 : i32, i32
  }
  func.func @transform_3(%arg0: i32, %arg1: i32, %arg2: i32) -> (i32, i32, i32) {
    %c0_i32 = arith.constant 0 : i32
    return %arg0, %arg1, %arg2 : i32, i32, i32
  }
}

</mosaic_0001>

<bundles_post_ra>
// kernel: _lambda_.3
= control target key start
LH: loop header
LB: loop body
LE: loop exit
PB: predicated region body
PF: predicated region fallthrough
CT: control target
= control target key end

     0   :  { %s1063_s12 = smov 0   ;;  %s1065_s13 = smov 0   ;;  %s1213_s0 = inlined_call_operand.vmem [shape: bf16[2,256,128], index: 0, kind: input, shape index: {}]   ;;  %s1214_s1 = inlined_call_operand.vmem [shape: f32[1,128], index: 1, kind: input, shape index: {}]   ;;  %s1215_s2 = inlined_call_operand.vmem [shape: f32[1,128], index: 2, kind: input, shape index: {}]   ;;  %s1216_s3 = inlined_call_operand.vmem [shape: bf16[2,128,256], index: 3, kind: output, shape index: {}]  }
   0x1   :  { %s1067_s14 = smov 0  }
   0x2 LB: > { %s32_s15 = sadd.s32 1, %s1037_s13  ;;  %p761_p0 = scmp.ge.s32.totalorder %s1041_s14, 1  ;;  %s1041_s14 = sphi %s1067_s14, %s13_s14   ;;  %s1037_s13 = sphi %s1065_s13, %s1218_s13   ;;  %s1033_s12 = sphi %s1063_s12, %s1217_s12  }
   0x3   : > { %p34_p1 = scmp.ge.s32.totalorder %s32_s15, 2  ;;  %p188_p2 = scmp.lt.s32.totalorder %s1041_s14, 3 }
   0x5   : > { %s1220_s15 = smov (%p34_p1, %s32_s15), 0  ;;  %p189_p3 = pnand %p761_p0, %p188_p2 }
   0x6   : > { %p235_p4 = scmp.lt.s32.totalorder (!%p189_p3), %s1033_s12, 1 }
   0x7   : > { %192 = sbr.rel (%p189_p3) target bundleno = 217 (0xd9), region = 32 }
   0xc   : > { %s1222_s12 = smov (!%p235_p4, %s1033_s12), 1  ;;  %v1094_v0 = vld [vmem:[%s1214_s1] ss:$0 sm:$0xff] }
   0xd   : > { %s786_s16 = sshll.u32 %s1222_s12, 7  ;;  %v1103_v9 = vld [vmem:[%s1215_s2] ss:$0 sm:$0xff] }
   0xe   : > { %s1089_s19 = scalar_lea.vmem %s1213_s0, %s786_s16  ;;  %s1186_s26 = scalar_lea.vmem %s1216_s3, %s786_s16 }
   0xf   : > { %v805_v1 = vld [vmem:[%s1089_s19] sm:$0xff]   ;;  %v868_v3 = vld [vmem:[%s1089_s19 + $0x8] sm:$0xff]   ;;  %v869_v28 = vld [vmem:[%s1089_s19 + $0x10] sm:$0xff]  }
  0x10   : > { %v875_v2 = vld [vmem:[%s1089_s19 + $0x40] sm:$0xff]   ;;  %v806_v4 = vunpack.c.l.bf16 %v805_v1  ;;  %v807_v6 = vunpack.c.h.bf16 %v805_v1  ;;  %v876_v8 = vld [vmem:[%s1089_s19 + $0x48] sm:$0xff]   ;;  %v810_v10 = vunpack.c.l.bf16 %v868_v3  ;;  %v811_v12 = vunpack.c.h.bf16 %v868_v3  ;;  %v877_v29 = vld [vmem:[%s1089_s19 + $0x50] sm:$0xff]  }
  0x11   : > { %v838_v5 = vunpack.c.l.bf16 %v875_v2  ;;  %v839_v7 = vunpack.c.h.bf16 %v875_v2  ;;  %v842_v11 = vunpack.c.l.bf16 %v876_v8  ;;  %v843_v13 = vunpack.c.h.bf16 %v876_v8  ;;  %v870_v46 = vld [vmem:[%s1089_s19 + $0x18] sm:$0xff]   ;;  %v871_v3 = vld [vmem:[%s1089_s19 + $0x20] sm:$0xff]  }
  0x12   : > { %v340_v14 = vmul.f32 %v806_v4, %v1094_v0  ;;  %v341_v16 = vmul.f32 %v807_v6, %v1094_v0  ;;  %v342_v18 = vmul.f32 %v810_v10, %v1094_v0  ;;  %v343_v20 = vmul.f32 %v811_v12, %v1094_v0  ;;  %v878_v47 = vld [vmem:[%s1089_s19 + $0x58] sm:$0xff]   ;;  %v879_v4 = vld [vmem:[%s1089_s19 + $0x60] sm:$0xff]  }
  0x13   : > { %v356_v15 = vmul.f32 %v838_v5, %v1094_v0  ;;  %v357_v17 = vmul.f32 %v839_v7, %v1094_v0  ;;  %v358_v19 = vmul.f32 %v842_v11, %v1094_v0  ;;  %v359_v27 = vmul.f32 %v843_v13, %v1094_v0 }
  0x14   : > { %v379_v21 = vadd.f32 %v1103_v9, %v340_v14  ;;  %v380_v23 = vadd.f32 %v1103_v9, %v341_v16  ;;  %v381_v25 = vadd.f32 %v1103_v9, %v342_v18  ;;  %v382_v35 = vadd.f32 %v1103_v9, %v343_v20 }
  0x15   : > { %v395_v22 = vadd.f32 %v1103_v9, %v356_v15  ;;  %v396_v24 = vadd.f32 %v1103_v9, %v357_v17  ;;  %v397_v26 = vadd.f32 %v1103_v9, %v358_v19  ;;  %v814_v36 = vunpack.c.l.bf16 %v869_v28 }
  0x16   : > { %v411_v30 = vmax.f32 %v379_v21, 0.0  ;;  %v412_v32 = vmax.f32 %v380_v23, 0.0  ;;  %v846_v37 = vunpack.c.l.bf16 %v877_v29  ;;  %v413_v38 = vmax.f32 %v381_v25, 0.0  ;;  %v880_v25 = vld [vmem:[%s1089_s19 + $0x68] sm:$0xff]  }
  0x17   : > { %v427_v31 = vmax.f32 %v395_v22, 0.0  ;;  %v428_v33 = vmax.f32 %v396_v24, 0.0  ;;  %v398_v39 = vadd.f32 %v1103_v9, %v359_v27  ;;  %v815_v40 = vunpack.c.h.bf16 %v869_v28  ;;  %v872_v24 = vld [vmem:[%s1089_s19 + $0x28] sm:$0xff]  }
  0x18   : > { %v847_v41 = vunpack.c.h.bf16 %v877_v29  ;;  %v429_v43 = vmax.f32 %v397_v26, 0.0  ;;  %v344_v44 = vmul.f32 %v814_v36, %v1094_v0  ;;  %v360_v45 = vmul.f32 %v846_v37, %v1094_v0 }
  0x19   : > { %v907_v34 = vpack.i.bf16 %v427_v31, %v411_v30  ;;  %v909_v42 = vpack.i.bf16 %v428_v33, %v412_v32  ;;  %v414_v48 = vmax.f32 %v382_v35, 0.0  ;;  %v345_v49 = vmul.f32 %v815_v40, %v1094_v0 }
  0x1a   : > { %v361_v50 = vmul.f32 %v847_v41, %v1094_v0  ;;  %v818_v51 = vunpack.c.l.bf16 %v870_v46  ;;  %v850_v52 = vunpack.c.l.bf16 %v878_v47  ;;  %v911_v53 = vpack.i.bf16 %v429_v43, %v413_v38 }
  0x1b   : > { %908 = vxpose.xlu0.b32.start [1/16] %v907_v34, 128  ;;  %v430_v54 = vmax.f32 %v398_v39, 0.0  ;;  %v383_v55 = vadd.f32 %v1103_v9, %v344_v44  ;;  %v399_v56 = vadd.f32 %v1103_v9, %v360_v45  ;;  %v819_v57 = vunpack.c.h.bf16 %v870_v46  ;;  %v873_v44 = vld [vmem:[%s1089_s19 + $0x30] sm:$0xff]  }
  0x1c   : > { %v851_v58 = vunpack.c.h.bf16 %v878_v47  ;;  %v384_v59 = vadd.f32 %v1103_v9, %v345_v49  ;;  %v400_v60 = vadd.f32 %v1103_v9, %v361_v50  ;;  %v346_v61 = vmul.f32 %v818_v51, %v1094_v0  ;;  %v881_v45 = vld [vmem:[%s1089_s19 + $0x70] sm:$0xff]  }
  0x1d   : > { %v362_v62 = vmul.f32 %v850_v52, %v1094_v0  ;;  %v913_v63 = vpack.i.bf16 %v430_v54, %v414_v48  ;;  %v415_v1 = vmax.f32 %v383_v55, 0.0  ;;  %v431_v2 = vmax.f32 %v399_v56, 0.0 }
  0x1e   : > { %v347_v5 = vmul.f32 %v819_v57, %v1094_v0  ;;  %v363_v6 = vmul.f32 %v851_v58, %v1094_v0  ;;  %v416_v7 = vmax.f32 %v384_v59, 0.0  ;;  %v432_v8 = vmax.f32 %v400_v60, 0.0 }
  0x1f   : > { %910 = vxpose.xlu0.b32.cont [2/16] %v909_v42, 128  ;;  %v385_v10 = vadd.f32 %v1103_v9, %v346_v61  ;;  %v401_v11 = vadd.f32 %v1103_v9, %v362_v62  ;;  %v915_v12 = vpack.i.bf16 %v431_v2, %v415_v1  ;;  %v822_v13 = vunpack.c.l.bf16 %v871_v3  ;;  %v874_v1 = vld [vmem:[%s1089_s19 + $0x38] sm:$0xff]  }
  0x20   : > { %v854_v14 = vunpack.c.l.bf16 %v879_v4  ;;  %v386_v15 = vadd.f32 %v1103_v9, %v347_v5  ;;  %v917_v16 = vpack.i.bf16 %v432_v8, %v416_v7  ;;  %v402_v19 = vadd.f32 %v1103_v9, %v363_v6  ;;  %v882_v2 = vld [vmem:[%s1089_s19 + $0x78] sm:$0xff]  }
  0x21   : > { %v417_v17 = vmax.f32 %v385_v10, 0.0  ;;  %v433_v18 = vmax.f32 %v401_v11, 0.0  ;;  %v348_v20 = vmul.f32 %v822_v13, %v1094_v0  ;;  %v823_v22 = vunpack.c.h.bf16 %v871_v3 }
  0x22   : > { %v364_v21 = vmul.f32 %v854_v14, %v1094_v0  ;;  %v855_v23 = vunpack.c.h.bf16 %v879_v4  ;;  %v418_v26 = vmax.f32 %v386_v15, 0.0  ;;  %v434_v28 = vmax.f32 %v402_v19, 0.0 }
  0x23   : > { %912 = vxpose.xlu0.b32.cont [3/16] %v911_v53, 128  ;;  %v919_v27 = vpack.i.bf16 %v433_v18, %v417_v17  ;;  %v826_v29 = vunpack.c.l.bf16 %v872_v24  ;;  %v858_v30 = vunpack.c.l.bf16 %v880_v25  ;;  %v387_v31 = vadd.f32 %v1103_v9, %v348_v20 }
  0x24   : > { %v403_v32 = vadd.f32 %v1103_v9, %v364_v21  ;;  %v349_v33 = vmul.f32 %v823_v22, %v1094_v0  ;;  %v365_v34 = vmul.f32 %v855_v23, %v1094_v0  ;;  %v827_v35 = vunpack.c.h.bf16 %v872_v24 }
  0x25   : > { %v859_v36 = vunpack.c.h.bf16 %v880_v25  ;;  %v921_v37 = vpack.i.bf16 %v434_v28, %v418_v26  ;;  %v350_v38 = vmul.f32 %v826_v29, %v1094_v0  ;;  %v366_v39 = vmul.f32 %v858_v30, %v1094_v0 }
  0x26   : > { %v419_v40 = vmax.f32 %v387_v31, 0.0  ;;  %v435_v41 = vmax.f32 %v403_v32, 0.0  ;;  %v388_v42 = vadd.f32 %v1103_v9, %v349_v33  ;;  %v404_v43 = vadd.f32 %v1103_v9, %v365_v34 }
  0x27   : > { %914 = vxpose.xlu0.b32.cont [4/16] %v913_v63, 128  ;;  %v351_v46 = vmul.f32 %v827_v35, %v1094_v0  ;;  %v367_v47 = vmul.f32 %v859_v36, %v1094_v0  ;;  %v389_v48 = vadd.f32 %v1103_v9, %v350_v38  ;;  %v405_v49 = vadd.f32 %v1103_v9, %v366_v39 }
  0x28   : > { %v830_v50 = vunpack.c.l.bf16 %v873_v44  ;;  %v923_v51 = vpack.i.bf16 %v435_v41, %v419_v40  ;;  %v420_v52 = vmax.f32 %v388_v42, 0.0  ;;  %v436_v53 = vmax.f32 %v404_v43, 0.0 }
  0x29   : > { %v862_v54 = vunpack.c.l.bf16 %v881_v45  ;;  %v390_v55 = vadd.f32 %v1103_v9, %v351_v46  ;;  %v406_v56 = vadd.f32 %v1103_v9, %v367_v47  ;;  %v421_v57 = vmax.f32 %v389_v48, 0.0 }
  0x2a   : > { %v437_v58 = vmax.f32 %v405_v49, 0.0  ;;  %v352_v59 = vmul.f32 %v830_v50, %v1094_v0  ;;  %v925_v60 = vpack.i.bf16 %v436_v53, %v420_v52  ;;  %v831_v62 = vunpack.c.h.bf16 %v873_v44 }
  0x2b   : > { %916 = vxpose.xlu0.b32.cont [5/16] %v915_v12, 128  ;;  %v368_v61 = vmul.f32 %v862_v54, %v1094_v0  ;;  %v863_v63 = vunpack.c.h.bf16 %v881_v45  ;;  %v422_v3 = vmax.f32 %v390_v55, 0.0  ;;  %v438_v4 = vmax.f32 %v406_v56, 0.0 }
  0x2c   : > { %v391_v5 = vadd.f32 %v1103_v9, %v352_v59  ;;  %v834_v6 = vunpack.c.l.bf16 %v874_v1  ;;  %v866_v7 = vunpack.c.l.bf16 %v882_v2  ;;  %v927_v8 = vpack.i.bf16 %v437_v58, %v421_v57 }
  0x2d   : > { %v407_v10 = vadd.f32 %v1103_v9, %v368_v61  ;;  %v353_v11 = vmul.f32 %v831_v62, %v1094_v0  ;;  %v369_v12 = vmul.f32 %v863_v63, %v1094_v0  ;;  %v929_v13 = vpack.i.bf16 %v438_v4, %v422_v3 }
  0x2e   : > { %v423_v14 = vmax.f32 %v391_v5, 0.0  ;;  %v354_v15 = vmul.f32 %v834_v6, %v1094_v0  ;;  %v835_v17 = vunpack.c.h.bf16 %v874_v1  ;;  %v867_v21 = vunpack.c.h.bf16 %v882_v2 }
  0x2f   : > { %918 = vxpose.xlu0.b32.cont [6/16] %v917_v16, 128  ;;  %v370_v16 = vmul.f32 %v866_v7, %v1094_v0  ;;  %v439_v18 = vmax.f32 %v407_v10, 0.0  ;;  %v392_v19 = vadd.f32 %v1103_v9, %v353_v11  ;;  %v408_v20 = vadd.f32 %v1103_v9, %v369_v12 }
  0x30   : > { %v393_v22 = vadd.f32 %v1103_v9, %v354_v15  ;;  %v355_v24 = vmul.f32 %v835_v17, %v1094_v0  ;;  %v371_v28 = vmul.f32 %v867_v21, %v1094_v0 }
  0x31   : > { %v409_v23 = vadd.f32 %v1103_v9, %v370_v16  ;;  %v931_v25 = vpack.i.bf16 %v439_v18, %v423_v14  ;;  %v424_v26 = vmax.f32 %v392_v19, 0.0 }
  0x32   : > { %v394_v29 = vadd.f32 %v1103_v9, %v355_v24  ;;  %v425_v31 = vmax.f32 %v393_v22, 0.0  ;;  %v410_v33 = vadd.f32 %v1103_v9, %v371_v28 }
  0x33   : > { %920 = vxpose.xlu0.b32.cont [7/16] %v919_v27, 128  ;;  %v440_v27 = vmax.f32 %v408_v20, 0.0  ;;  %v441_v32 = vmax.f32 %v409_v23, 0.0 }
  0x34   : > { %v426_v35 = vmax.f32 %v394_v29, 0.0  ;;  %v442_v36 = vmax.f32 %v410_v33, 0.0 }
  0x35   : > { %v933_v30 = vpack.i.bf16 %v440_v27, %v424_v26  ;;  %v935_v34 = vpack.i.bf16 %v441_v32, %v425_v31 }
  0x37   : > { %922 = vxpose.xlu0.b32.cont [8/16] %v921_v37, 128  ;;  %v937_v37 = vpack.i.bf16 %v442_v36, %v426_v35 }
  0x3b   : > { %924 = vxpose.xlu0.b32.cont [9/16] %v923_v51, 128 }
  0x3f   : > { %926 = vxpose.xlu0.b32.cont [10/16] %v925_v60, 128 }
  0x43   : > { %928 = vxpose.xlu0.b32.cont [11/16] %v927_v8, 128 }
  0x47   : > { %930 = vxpose.xlu0.b32.cont [12/16] %v929_v13, 128 }
  0x4b   : > { %932 = vxpose.xlu0.b32.cont [13/16] %v931_v25, 128 }
  0x4f   : > { %934 = vxpose.xlu0.b32.cont [14/16] %v933_v30, 128 }
  0x53   : > { %936 = vxpose.xlu0.b32.cont [15/16] %v935_v34, 128 }
  0x57   : > { %938 = vxpose.xlu0.b32.end [16/16] %v937_v37, 128 }
  0x97   : > { %v939_v38 = vpop.trf.xlu0 }
  0x98   : > { %v943_v39 = vunpack.i.h.bf16 %v939_v38  ;;  %v940_v40 = vunpack.i.l.bf16 %v939_v38 }
  0x9a   : > { %v788_v0 = vpack.c.bf16 %v943_v39, %v940_v40 }
  0x9b   : > { %v944_v9 = vpop.trf.xlu0 }
  0x9c   : > { %603 = vst [vmem:[%s1186_s26] sm:$0xff] %v788_v0  ;;  %v948_v41 = vunpack.i.h.bf16 %v944_v9  ;;  %v945_v42 = vunpack.i.l.bf16 %v944_v9 }
  0x9e   : > { %v789_v43 = vpack.c.bf16 %v948_v41, %v945_v42 }
  0x9f   : > { %v949_v44 = vpop.trf.xlu0 }
  0xa0   : > { %604 = vst [vmem:[%s1186_s26 + $0x8] sm:$0xff] %v789_v43  ;;  %v953_v45 = vunpack.i.h.bf16 %v949_v44  ;;  %v950_v46 = vunpack.i.l.bf16 %v949_v44 }
  0xa2   : > { %v790_v47 = vpack.c.bf16 %v953_v45, %v950_v46 }
  0xa3   : > { %v954_v48 = vpop.trf.xlu0 }
  0xa4   : > { %605 = vst [vmem:[%s1186_s26 + $0x10] sm:$0xff] %v790_v47  ;;  %v958_v49 = vunpack.i.h.bf16 %v954_v48  ;;  %v955_v50 = vunpack.i.l.bf16 %v954_v48 }
  0xa6   : > { %v791_v51 = vpack.c.bf16 %v958_v49, %v955_v50 }
  0xa7   : > { %v959_v52 = vpop.trf.xlu0 }
  0xa8   : > { %606 = vst [vmem:[%s1186_s26 + $0x18] sm:$0xff] %v791_v51  ;;  %v963_v53 = vunpack.i.h.bf16 %v959_v52  ;;  %v960_v54 = vunpack.i.l.bf16 %v959_v52 }
  0xaa   : > { %v792_v55 = vpack.c.bf16 %v963_v53, %v960_v54 }
  0xab   : > { %v964_v56 = vpop.trf.xlu0 }
  0xac   : > { %607 = vst [vmem:[%s1186_s26 + $0x20] sm:$0xff] %v792_v55  ;;  %v968_v57 = vunpack.i.h.bf16 %v964_v56  ;;  %v965_v58 = vunpack.i.l.bf16 %v964_v56 }
  0xae   : > { %v793_v59 = vpack.c.bf16 %v968_v57, %v965_v58 }
  0xaf   : > { %v969_v60 = vpop.trf.xlu0 }
  0xb0   : > { %608 = vst [vmem:[%s1186_s26 + $0x28] sm:$0xff] %v793_v59  ;;  %v973_v61 = vunpack.i.h.bf16 %v969_v60  ;;  %v970_v62 = vunpack.i.l.bf16 %v969_v60 }
  0xb2   : > { %v794_v63 = vpack.c.bf16 %v973_v61, %v970_v62 }
  0xb3   : > { %v974_v1 = vpop.trf.xlu0 }
  0xb4   : > { %609 = vst [vmem:[%s1186_s26 + $0x30] sm:$0xff] %v794_v63  ;;  %v978_v2 = vunpack.i.h.bf16 %v974_v1  ;;  %v975_v3 = vunpack.i.l.bf16 %v974_v1 }
  0xb6   : > { %v795_v4 = vpack.c.bf16 %v978_v2, %v975_v3 }
  0xb7   : > { %v979_v5 = vpop.trf.xlu0 }
  0xb8   : > { %610 = vst [vmem:[%s1186_s26 + $0x38] sm:$0xff] %v795_v4  ;;  %v983_v6 = vunpack.i.h.bf16 %v979_v5  ;;  %v980_v7 = vunpack.i.l.bf16 %v979_v5 }
  0xba   : > { %v796_v8 = vpack.c.bf16 %v983_v6, %v980_v7 }
  0xbb   : > { %v984_v10 = vpop.trf.xlu0 }
  0xbc   : > { %611 = vst [vmem:[%s1186_s26 + $0x40] sm:$0xff] %v796_v8  ;;  %v988_v11 = vunpack.i.h.bf16 %v984_v10  ;;  %v985_v12 = vunpack.i.l.bf16 %v984_v10 }
  0xbe   : > { %v797_v13 = vpack.c.bf16 %v988_v11, %v985_v12 }
  0xbf   : > { %v989_v14 = vpop.trf.xlu0 }
  0xc0   : > { %612 = vst [vmem:[%s1186_s26 + $0x48] sm:$0xff] %v797_v13  ;;  %v993_v15 = vunpack.i.h.bf16 %v989_v14  ;;  %v990_v16 = vunpack.i.l.bf16 %v989_v14 }
  0xc2   : > { %v798_v17 = vpack.c.bf16 %v993_v15, %v990_v16 }
  0xc3   : > { %v994_v18 = vpop.trf.xlu0 }
  0xc4   : > { %613 = vst [vmem:[%s1186_s26 + $0x50] sm:$0xff] %v798_v17  ;;  %v998_v19 = vunpack.i.h.bf16 %v994_v18  ;;  %v995_v20 = vunpack.i.l.bf16 %v994_v18 }
  0xc6   : > { %v799_v21 = vpack.c.bf16 %v998_v19, %v995_v20 }
  0xc7   : > { %v999_v22 = vpop.trf.xlu0 }
  0xc8   : > { %614 = vst [vmem:[%s1186_s26 + $0x58] sm:$0xff] %v799_v21  ;;  %v1003_v23 = vunpack.i.h.bf16 %v999_v22  ;;  %v1000_v24 = vunpack.i.l.bf16 %v999_v22 }
  0xca   : > { %v800_v25 = vpack.c.bf16 %v1003_v23, %v1000_v24 }
  0xcb   : > { %v1004_v26 = vpop.trf.xlu0 }
  0xcc   : > { %615 = vst [vmem:[%s1186_s26 + $0x60] sm:$0xff] %v800_v25  ;;  %v1008_v27 = vunpack.i.h.bf16 %v1004_v26  ;;  %v1005_v28 = vunpack.i.l.bf16 %v1004_v26 }
  0xce   : > { %v801_v29 = vpack.c.bf16 %v1008_v27, %v1005_v28 }
  0xcf   : > { %v1009_v30 = vpop.trf.xlu0 }
  0xd0   : > { %616 = vst [vmem:[%s1186_s26 + $0x68] sm:$0xff] %v801_v29  ;;  %v1013_v31 = vunpack.i.h.bf16 %v1009_v30  ;;  %v1010_v32 = vunpack.i.l.bf16 %v1009_v30 }
  0xd2   : > { %v802_v33 = vpack.c.bf16 %v1013_v31, %v1010_v32 }
  0xd3   : > { %v1014_v34 = vpop.trf.xlu0 }
  0xd4   : > { %617 = vst [vmem:[%s1186_s26 + $0x70] sm:$0xff] %v802_v33  ;;  %v1018_v35 = vunpack.i.h.bf16 %v1014_v34  ;;  %v1015_v36 = vunpack.i.l.bf16 %v1014_v34 }
  0xd6   : > { %v803_v37 = vpack.c.bf16 %v1018_v35, %v1015_v36 }
  0xd8   : > { %618 = vst [vmem:[%s1186_s26 + $0x78] sm:$0xff] %v803_v37 }
  0xd9 PF: > { %s13_s14 = sadd.s32 1, %s1041_s14   ;;  %s1217_s12 = smov %s1037_s13 }
  0xda   : > { %p10_p5 = scmp.ge.s32.totalorder %s13_s14, 4   ;;  %s1218_s13 = smov %s1220_s15 }
  0xdc   :  { %12 = sbr.rel (!%p10_p5) target bundleno = 2 (0x2), region = 68 }

// kernel: _lambda_.2
= control target key start
LH: loop header
LB: loop body
LE: loop exit
PB: predicated region body
PF: predicated region fallthrough
CT: control target
= control target key end

     0   :  { %s4813_s25 = smov 0   ;;  %s4815_s26 = smov 0   ;;  %s6135_s0 = inlined_call_operand.vmem [shape: bf16[2,18,18,4], index: 0, kind: input, shape index: {}, may-alias: {0,1,2,3,4,5,6,7,8,9}]   ;;  %s6136_s1 = inlined_call_operand.vmem [shape: bf16[2,18,18,4], index: 1, kind: input, shape index: {}, may-alias: {0,1,2,3,4,5,6,7,8,9}]   ;;  %s6137_s2 = inlined_call_operand.vmem [shape: bf16[2,18,18,4], index: 2, kind: input, shape index: {}, may-alias: {0,1,2,3,4,5,6,7,8,9}]   ;;  %s6138_s3 = inlined_call_operand.vmem [shape: bf16[2,18,18,4], index: 3, kind: input, shape index: {}, may-alias: {0,1,2,3,4,5,6,7,8,9}]   ;;  %s6139_s4 = inlined_call_operand.vmem [shape: bf16[2,18,18,4], index: 4, kind: input, shape index: {}, may-alias: {0,1,2,3,4,5,6,7,8,9}]   ;;  %s6140_s5 = inlined_call_operand.vmem [shape: bf16[2,18,18,4], index: 5, kind: input, shape index: {}, may-alias: {0,1,2,3,4,5,6,7,8,9}]   ;;  %s6141_s6 = inlined_call_operand.vmem [shape: bf16[2,18,18,4], index: 6, kind: input, shape index: {}, may-alias: {0,1,2,3,4,5,6,7,8,9}]   ;;  %s6142_s7 = inlined_call_operand.vmem [shape: bf16[2,18,18,4], index: 7, kind: input, shape index: {}, may-alias: {0,1,2,3,4,5,6,7,8,9}]   ;;  %s6143_s8 = inlined_call_operand.vmem [shape: bf16[2,18,18,4], index: 8, kind: input, shape index: {}, may-alias: {0,1,2,3,4,5,6,7,8,9}]   ;;  %s6144_s9 = inlined_call_operand.vmem [shape: bf16[2,18,18,4], index: 9, kind: input, shape index: {}, may-alias: {0,1,2,3,4,5,6,7,8,9}]   ;;  %s6145_s10 = inlined_call_operand.vmem [shape: bf16[3,3,4,128], index: 10, kind: input, shape index: {}]   ;;  %s6146_s11 = inlined_call_operand.vmem [shape: bf16[2,16,16,128], index: 11, kind: output, shape index: {0}]   ;;  %s6147_s12 = inlined_call_operand.vmem [shape: f32[4,1,128], index: 12, kind: output, shape index: {1}]   ;;  %s6148_s13 = inlined_call_operand.vmem [shape: f32[4,1,128], index: 13, kind: output, shape index: {2}]  }
   0x1   :  { %6154 = sst [smem:[#allocation33_spill]] %s6135_s0  ;;  %s4817_s27 = smov 0  }
   0x2   :  { %s4819_s28 = smov 0   ;;  %s4821_s29 = smov 0  }
   0x3 LB: > { %6155 = sst [smem:[#allocation3_spill]] %s4733_s27  ;;  %s36_s30 = sadd.s32 1, %s4733_s27  ;;  %s4741_s29 = sphi %s4821_s29, %s24_s29   ;;  %s4737_s28 = sphi %s4819_s28, %s6229_s28   ;;  %s4733_s27 = sphi %s4817_s27, %s6228_s27   ;;  %s4729_s26 = sphi %s4815_s26, %s6227_s26   ;;  %s4725_s25 = sphi %s4813_s25, %s6226_s25  }
   0x4   : > { %6156 = sst [smem:[#allocation4_spill]] %s4737_s28  ;;  %s39_s14 = sadd.s32 1, %s4737_s28 }
   0x5   : > { %6157 = sst [smem:[#allocation5_spill]] %s4741_s29  ;;  %p37_p0 = scmp.ge.s32.totalorder %s36_s30, 2 }
   0x6   : > { %p4096_p1 = scmp.ge.s32.totalorder %s4741_s29, 1  ;;  %p662_p2 = scmp.lt.s32.totalorder %s4741_s29, 5 }
   0x7   : > { %s6231_s30 = smov (%p37_p0, %s36_s30), 0  ;;  %s6233_s14 = smov (!%p37_p0, %s39_s14), %s4737_s28 }
   0x8   : > { %6158 = sst [smem:[#allocation6_spill]] %s6231_s30  ;;  %p663_p3 = pnand %p4096_p1, %p662_p2 }
   0x9   : > { %p41_p4 = scmp.ge.s32.totalorder %s6233_s14, 2 }
   0xa   : > { %666 = sbr.rel (%p663_p3) target bundleno = 444 (0x1bc), region = 64 }
   0xb   : > { %s6235_s14 = smov (%p41_p4, %s6233_s14), 0 }
   0xc   : > { %6159 = sst [smem:[#allocation7_spill]] %s6235_s14 }
   0xf   : > { %v4123_v0 = vld [vmem:[%s6145_s10 + $0x2] sm:$0x3]  ;;  %vm1347_vm0 = vcmask 1041408   ;;  %s4851_s17 = sshll.u32 %s4725_s25, 3  ;;  %p839_p5 = scmp.lt.s32.totalorder %s4729_s26, 1  ;;  %vm1008_vm1 = vcmask 27648  }
  0x10   : > { %4625 = vmatprep.subr.msk.bf16.mxu0 %vm1347_vm0, %v4123_v0  ;;  %4626 = vmatprep.subr.msk.bf16.mxu1 %vm1347_vm0, %v4123_v0  ;;  %v1349_v1 = vsel %vm1347_vm0, %v4123_v0, 0  ;;  %p841_p6 = scmp.lt.s32.totalorder %s4851_s17, 17  ;;  %v4864_v2 = vld [vmem:[%s6145_s10] sm:$0x3]  ;;  %v4872_v3 = vld [vmem:[%s6145_s10 + $0x4] sm:$0x3] }
  0x11   : > { %4462 = vmatpush3.bf16.msra.mxu0 %v1349_v1  ;;  %4624 = vmatpush3.bf16.msra.mxu1 %v1349_v1  ;;  %s4859_s18 = scalar_select %p839_p5, %s4729_s26, 1  ;;  %vm1011_vm2 = vcmask 24576   ;;  %vm1101_vm3 = vsmask.f32 3328  ;;  %vm1102_vm4 = vsmask.f32 7440 }
  0x12   : > { %s842_s21 = scalar_select %p841_p6, %s4851_s17, 17  ;;  %4627 = vmatprep.subr.msk.bf16.mxu1 %vm1347_vm0, %v4864_v2  ;;  %4628 = vmatprep.subr.msk.bf16.mxu0 %vm1347_vm0, %v4872_v3  ;;  %vm4945_vm5 = vmor %vm1101_vm3, %vm1102_vm4  ;;  %vm1322_vm6 = vcmask 31744   ;;  %vm1636_vm7 = vcmask 1042432   ;;  %v4960_v34 = vsel %vm1347_vm0, %v4864_v2, 0  ;;  %vm1637_vm8 = vcmask 1046532  }
  0x13   : > { %s4875_s24 = smul.u32 54, %s4859_s18  ;;  %s850_s15 = sadd.s32 1, %s4851_s17  ;;  %v4986_v44 = vsel %vm1347_vm0, %v4872_v3, 0  ;;  %v5018_v1 = vld [vmem:[%s6145_s10 + $0x6] sm:$0x3]  ;;  %vm5039_vm9 = vmor %vm1636_vm7, %vm1637_vm8 }
  0x14   : > { %s4635_s16 = smul.u32 3, %s842_s21  ;;  %p4880_p7 = scmp.lt.s32.totalorder %s850_s15, 17  ;;  %v4198_v2 = vld [vmem:[%s6145_s10 + $0x8] sm:$0x3] }
  0x15   : > { %s889_s20 = sadd.s32 4, %s4851_s17  ;;  %s6153_s30 = sadd.s32 5, %s4851_s17 }
  0x16   : > { %s845_s14 = sadd.s32 %s4875_s24, %s4635_s16  ;;  %p892_p8 = scmp.lt.s32.totalorder %s889_s20, 17 }
  0x17   : > { %s4098_s28 = sshll.u32 %s845_s14, 2  ;;  %s6161_s0 = sld [smem:[#allocation33_spill]] }
  0x18   : > { %s6152_s21 = sadd.s32 2, %s4851_s17  ;;  %s6237_s15 = smov (!%p4880_p7, %s850_s15), 17 }
  0x19   : > { %s6239_s20 = smov (!%p892_p8, %s889_s20), 17  ;;  %s4637_s14 = smul.u32 3, %s6237_s15 }
  0x1a   : > { %s4640_s16 = smul.u32 3, %s6239_s20  ;;  %p4898_p9 = scmp.lt.s32.totalorder %s6153_s30, 17 }
  0x1b   : > { %p4905_p10 = scmp.lt.s32.totalorder %s6152_s21, 17  ;;  %s6165_s29 = sadd.s32 2, %s4851_s17 }
  0x1c   : > { %s876_s21 = sadd.s32 3, %s4851_s17  ;;  %p973_p2 = scmp.lt.s32.totalorder %s4851_s17, 15 }
  0x1d   : > { %s847_s27 = scalar_lea.vmem %s6161_s0, %s4098_s28  ;;  %s857_s28 = sadd.s32 %s4637_s14, %s4875_s24 }
  0x1e   : > { %v1005_v4 = vld [vmem:[%s847_s27] sm:$0xf]  ;;  %v1006_v5 = vld [vmem:[%s847_s27 + $0x4] sm:$0xf]  ;;  %v1007_v6 = vld [vmem:[%s847_s27 + $0x8] sm:$0x1]  ;;  %s896_s0 = sadd.s32 %s4640_s16, %s4875_s24 }
  0x1f   : > { %1009 = vst.msk [vmem:[#allocation2] sm:$0xf] %vm1008_vm1, %v1005_v4  ;;  %1010 = vst.msk [vmem:[#allocation2 + $0x4] sm:$0xf] %vm1008_vm1, %v1006_v5  ;;  %s4100_s23 = sshll.u32 %s857_s28, 2  ;;  %s4106_s20 = sshll.u32 %s896_s0, 2 }
  0x20   : > { %1012 = vst.msk [vmem:[#allocation2 + $0x8] sm:$0x1] %vm1011_vm2, %v1007_v6  ;;  %s859_s15 = scalar_lea.vmem %s6136_s1, %s4100_s23  ;;  %s898_s30 = scalar_lea.vmem %s6139_s4, %s4106_s20 }
  0x21   : > { %v1013_v14 = vld [vmem:[%s859_s15] sm:$0xf]  ;;  %v1014_v16 = vld [vmem:[%s859_s15 + $0x4] sm:$0xf]  ;;  %v1015_v17 = vld [vmem:[%s859_s15 + $0x8] sm:$0x1] }
  0x22   : > { %1017 = vst.msk [vmem:[#allocation2 + $0xc] sm:$0xf] %vm1008_vm1, %v1013_v14  ;;  %1018 = vst.msk [vmem:[#allocation2 + $0x10] sm:$0xf] %vm1008_vm1, %v1014_v16  ;;  %v1034_v22 = vld [vmem:[%s898_s30] sm:$0xf] }
  0x23   : > { %1019 = vst.msk [vmem:[#allocation2 + $0x14] sm:$0x1] %vm1011_vm2, %v1015_v17  ;;  %v1035_v23 = vld [vmem:[%s898_s30 + $0x4] sm:$0xf]  ;;  %v1036_v24 = vld [vmem:[%s898_s30 + $0x8] sm:$0x1] }
  0x24   : > { %1038 = vst.msk [vmem:[#allocation2 + $0x30] sm:$0xf] %vm1008_vm1, %v1034_v22  ;;  %s6164_s0 = sadd.s32 5, %s4851_s17  ;;  %1039 = vst.msk [vmem:[#allocation2 + $0x34] sm:$0xf] %vm1008_vm1, %v1035_v23  ;;  %s6243_s29 = smov (!%p4905_p10, %s6165_s29), 17 }
  0x25   : > { %s6241_s0 = smov (!%p4898_p9, %s6164_s0), 17  ;;  %1040 = vst.msk [vmem:[#allocation2 + $0x38] sm:$0x1] %vm1011_vm2, %v1036_v24  ;;  %s4638_s16 = smul.u32 3, %s6243_s29 }
  0x26   : > { %v4913_v7 = vld [vmem:[#allocation2] sm:$0xf]  ;;  %v4915_v8 = vld [vmem:[#allocation2 + $0x4] sm:$0xf]  ;;  %s4641_s30 = smul.u32 3, %s6241_s0  ;;  %p4964_p11 = scmp.lt.s32.totalorder %s876_s21, 17 }
  0x27   : > { %v4917_v9 = vld [vmem:[#allocation2 + $0x8] sm:$0x1]  ;;  %v1105_v10 = vshrl.u32 %v4913_v7, 16  ;;  %v1108_v11 = vshll.u32 %v4913_v7, 16  ;;  %v1114_v12 = vshll.u32 %v4915_v8, 16  ;;  %v1118_v13 = vshrl.u32 %v4915_v8, 16  ;;  %s870_s20 = sadd.s32 %s4638_s16, %s4875_s24 }
  0x28   : > { %v1124_v15 = vshll.u32 %v4917_v9, 16  ;;  %s909_s22 = sadd.s32 %s4641_s30, %s4875_s24  ;;  %s915_s14 = sadd.s32 6, %s4851_s17  ;;  %v4994_v49 = vld [vmem:[#allocation2] sm:$0xe]  ;;  %v1641_v54 = vrot.slane %v4915_v8, 5 }
  0x29   : > { %v1107_v18 = vrot.slane %v1105_v10, 4  ;;  %v1110_v19 = vrot.slane %v1108_v11, 5  ;;  %v1116_v20 = vrot.slane %v1114_v12, 5  ;;  %v1120_v21 = vrot.slane %v1118_v13, 4  ;;  %v4956_v33 = vld [vmem:[#allocation2 + $0xc] sm:$0xf] }
  0x2a   : > { %v1126_v27 = vrot.slane %v1124_v15, 5  ;;  %s4108_s28 = sshll.u32 %s909_s22, 2  ;;  %v4968_v36 = vld [vmem:[#allocation2 + $0x10] sm:$0xf]  ;;  %v4970_v37 = vld [vmem:[#allocation2 + $0x14] sm:$0x1] }
  0x2b   : > { %v1111_v25 = vor.u32 %v1110_v19, %v1107_v18  ;;  %v1121_v26 = vor.u32 %v1120_v21, %v1116_v20  ;;  %v1129_v38 = vshrl.u32 %v4956_v33, 16  ;;  %v1132_v39 = vshll.u32 %v4956_v33, 16  ;;  %v4977_v43 = vld [vmem:[#allocation2 + $0x30] sm:$0xf]  ;;  %s4982_s15 = scalar_lea.vmem %s6140_s5, %s4108_s28  ;;  %v4990_v47 = vld [vmem:[#allocation2 + $0x34] sm:$0xf] }
  0x2c   : > { %v1138_v40 = vshll.u32 %v4968_v36, 16  ;;  %v1142_v41 = vshrl.u32 %v4968_v36, 16  ;;  %v1148_v42 = vshll.u32 %v4970_v37, 16  ;;  %v1201_v48 = vshrl.u32 %v4977_v43, 16  ;;  %v4996_v52 = vld [vmem:[#allocation2 + $0x38] sm:$0x1] }
  0x2d   : > { %v1112_v29 = vrot.slane %v1111_v25, 4  ;;  %v1122_v30 = vrot.slane %v1121_v26, 4  ;;  %v1131_v45 = vrot.slane %v1129_v38, 4  ;;  %v1134_v46 = vrot.slane %v1132_v39, 5  ;;  %v1041_v59 = vld [vmem:[%s4982_s15] sm:$0xf] }
  0x2e   : > { %v1140_v50 = vrot.slane %v1138_v40, 5  ;;  %v1144_v51 = vrot.slane %v1142_v41, 4  ;;  %v1204_v53 = vshll.u32 %v4977_v43, 16  ;;  %v1203_v56 = vrot.slane %v1201_v48, 4  ;;  %s4102_s0 = sshll.u32 %s870_s20, 2  ;;  %p5011_p12 = scmp.lt.s32.totalorder %s915_s14, 17 }
  0x2f   : > { %v1117_v31 = vsel %vm4945_vm5, %v1112_v29, %v1116_v20  ;;  %v1127_v32 = vsel %vm4945_vm5, %v1122_v30, %v1126_v27  ;;  %v1135_v55 = vor.u32 %v1134_v46, %v1131_v45  ;;  %v1210_v57 = vshll.u32 %v4990_v47, 16  ;;  %v1042_v0 = vld [vmem:[%s4982_s15 + $0x4] sm:$0xf]  ;;  %1045 = vst.msk [vmem:[#allocation2 + $0x3c] sm:$0xf] %vm1008_vm1, %v1041_v59  ;;  %s872_s16 = scalar_lea.vmem %s6137_s2, %s4102_s0  ;;  %s6245_s21 = smov (!%p4964_p11, %s876_s21), 17 }
  0x30   : > { %v4124_v35 = vcombine.low %v1117_v31, %v1127_v32  ;;  %v1214_v58 = vshrl.u32 %v4990_v47, 16  ;;  %v1145_v60 = vor.u32 %v1144_v51, %v1140_v50  ;;  %v1150_v61 = vrot.slane %v1148_v42, 5  ;;  %v1043_v6 = vld [vmem:[%s4982_s15 + $0x8] sm:$0x1]  ;;  %1046 = vst.msk [vmem:[#allocation2 + $0x40] sm:$0xf] %vm1008_vm1, %v1042_v0 }
  0x31   : > { %v1206_v62 = vrot.slane %v1204_v53, 5  ;;  %v1220_v63 = vshll.u32 %v4996_v52, 16  ;;  %v1136_v3 = vrot.slane %v1135_v55, 4  ;;  %v1212_v4 = vrot.slane %v1210_v57, 5  ;;  %1047 = vst.msk [vmem:[#allocation2 + $0x44] sm:$0x1] %vm1011_vm2, %v1043_v6 }
  0x32   : > { %4463 = vmatprep.mubr.msk.bf16.mxu0 %vm1322_vm6, %v4124_v35  ;;  %v1216_v5 = vrot.slane %v1214_v58, 4  ;;  %v1146_v10 = vrot.slane %v1145_v60, 4  ;;  %v1020_v12 = vld [vmem:[%s872_s16] sm:$0xf]  ;;  %v1021_v13 = vld [vmem:[%s872_s16 + $0x4] sm:$0xf] }
  0x33   : > { %v1207_v11 = vor.u32 %v1206_v62, %v1203_v56  ;;  %v4156_v14 = vrot.slane %v4994_v49, 9  ;;  %v1141_v15 = vsel %vm4945_vm5, %v1136_v3, %v1140_v50  ;;  %v1648_v16 = vrot.slane %v4968_v36, 5  ;;  %v1022_v19 = vld [vmem:[%s872_s16 + $0x8] sm:$0x1]  ;;  %1024 = vst.msk [vmem:[#allocation2 + $0x18] sm:$0xf] %vm1008_vm1, %v1020_v12 }
  0x34   : > { %v1217_v17 = vor.u32 %v1216_v5, %v1212_v4  ;;  %v1222_v18 = vrot.slane %v1220_v63, 5  ;;  %1025 = vst.msk [vmem:[#allocation2 + $0x1c] sm:$0xf] %vm1008_vm1, %v1021_v13  ;;  %s4639_s27 = smul.u32 3, %s6245_s21  ;;  %s928_s15 = sadd.s32 7, %s4851_s17  ;;  %v1644_v21 = vrot.slane %v4917_v9, 5  ;;  %v1151_v22 = vsel %vm4945_vm5, %v1146_v10, %v1150_v61 }
  0x35   : > { %v1208_v23 = vrot.slane %v1207_v11, 4  ;;  %1026 = vst.msk [vmem:[#allocation2 + $0x20] sm:$0x1] %vm1011_vm2, %v1022_v19  ;;  %s6247_s14 = smov (!%p5011_p12, %s915_s14), 17  ;;  %v1643_v24 = vrot.slane %v1641_v54, 4  ;;  %v4125_v26 = vcombine.low %v1141_v15, %v1151_v22  ;;  %v5056_v9 = vsel %vm1347_vm0, %v5018_v1, 0 }
  0x36   : > { %v1613_v25 = vld [vmem:[#allocation2 + $0xc] sm:$0xe]  ;;  %v1218_v27 = vrot.slane %v1217_v17, 4  ;;  %s883_s21 = sadd.s32 %s4639_s27, %s4875_s24  ;;  %v5059_v29 = vsel %vm1347_vm0, %v4198_v2, 0  ;;  %v1651_v30 = vrot.slane %v4970_v37, 5  ;;  %v1672_v32 = vrot.slane %v4996_v52, 5 }
  0x37   : > { %v1213_v31 = vsel %vm4945_vm5, %v1208_v23, %v1212_v4  ;;  %s4104_s0 = sshll.u32 %s883_s21, 2  ;;  %s4642_s29 = smul.u32 3, %s6247_s14  ;;  %v5068_v35 = vsel %vm5039_vm9, %v4156_v14, %v1641_v54  ;;  %4464 = vmatmul.mubr.msk.bf16.vlgmr.msra.gmra.mxu0 %vm1322_vm6, %v4125_v26  ;;  %v5073_v39 = vld [vmem:[#allocation2 + $0x3c] sm:$0xf]  ;;  %v4157_v37 = vrot.slane %v1613_v25, 9  ;;  %v1650_v40 = vrot.slane %v1648_v16, 4 }
  0x38   : > { %v1223_v38 = vsel %vm4945_vm5, %v1218_v27, %v1222_v18  ;;  %s5078_s22 = scalar_lea.vmem %s6138_s3, %s4104_s0  ;;  %p5082_p13 = scmp.lt.s32.totalorder %s928_s15, 17  ;;  %v1669_v41 = vrot.slane %v4990_v47, 5  ;;  %v5089_v45 = vld [vmem:[#allocation2 + $0x40] sm:$0xf]  ;;  %v1225_v46 = vshrl.u32 %v5073_v39, 16  ;;  %v1228_v48 = vshll.u32 %v5073_v39, 16  ;;  %4498 = vmatpush3.bf16.msra.mxu0 %v4986_v44 }
  0x39   : > { %v4128_v42 = vcombine.low %v1213_v31, %v1223_v38  ;;  %v1027_v49 = vld [vmem:[%s5078_s22] sm:$0xf]  ;;  %s922_s28 = sadd.s32 %s4642_s29, %s4875_s24  ;;  %v5098_v50 = vsel %vm5039_vm9, %v1643_v24, %v1644_v21  ;;  %v5100_v51 = vld [vmem:[#allocation2 + $0x44] sm:$0x1]  ;;  %v1234_v53 = vshll.u32 %v5089_v45, 16  ;;  %v1238_v54 = vshrl.u32 %v5089_v45, 16  ;;  %4630 = vmatprep.subr.msk.bf16.mxu0 %vm1347_vm0, %v4198_v2 }
  0x3a   : > { %v1028_v55 = vld [vmem:[%s5078_s22 + $0x4] sm:$0xf]  ;;  %1031 = vst.msk [vmem:[#allocation2 + $0x24] sm:$0xf] %vm1008_vm1, %v1027_v49  ;;  %v1227_v44 = vrot.slane %v1225_v46, 4  ;;  %v1230_v56 = vrot.slane %v1228_v48, 5  ;;  %v4165_v0 = vcombine.low %v5068_v35, %v5098_v50  ;;  %v5127_v2 = vsel %vm5039_vm9, %v4157_v37, %v1648_v16 }
  0x3b   : > { %4471 = vmatprep.mubr.msk.bf16.mxu1 %vm1322_vm6, %v4128_v42  ;;  %v1244_v57 = vshll.u32 %v5100_v51, 16  ;;  %v5109_v58 = vld [vmem:[#allocation2 + $0x18] sm:$0xf]  ;;  %1032 = vst.msk [vmem:[#allocation2 + $0x28] sm:$0xf] %vm1008_vm1, %v1028_v55  ;;  %s4110_s23 = sshll.u32 %s922_s28, 2  ;;  %v5143_v21 = vsel %vm5039_vm9, %v1650_v40, %v1651_v30 }
  0x3c   : > { %v5112_v59 = vld [vmem:[#allocation2 + $0x30] sm:$0xe]  ;;  %v1236_v60 = vrot.slane %v1234_v53, 5  ;;  %v1240_v61 = vrot.slane %v1238_v54, 4  ;;  %v5114_v62 = vld [vmem:[#allocation2 + $0x1c] sm:$0xf]  ;;  %s924_s27 = scalar_lea.vmem %s6141_s6, %s4110_s23  ;;  %v1231_v3 = vor.u32 %v1230_v56, %v1227_v44 }
  0x3d   : > { %v5116_v63 = vld [vmem:[#allocation2 + $0x20] sm:$0x1]  ;;  %v1246_v4 = vrot.slane %v1244_v57, 5  ;;  %v1153_v5 = vshrl.u32 %v5109_v58, 16  ;;  %v1156_v6 = vshll.u32 %v5109_v58, 16  ;;  %s6249_s15 = smov (!%p5082_p13, %s928_s15), 17 }
  0x3e   : > { %v1029_v10 = vld [vmem:[%s5078_s22 + $0x8] sm:$0x1]  ;;  %v1241_v11 = vor.u32 %v1240_v61, %v1236_v60  ;;  %v1162_v12 = vshll.u32 %v5114_v62, 16  ;;  %v1166_v13 = vshrl.u32 %v5114_v62, 16  ;;  %v1172_v14 = vshll.u32 %v5116_v63, 16  ;;  %s4643_s21 = smul.u32 3, %s6249_s15 }
  0x3f   : > { %1033 = vst.msk [vmem:[#allocation2 + $0x2c] sm:$0x1] %vm1011_vm2, %v1029_v10  ;;  %v1048_v15 = vld [vmem:[%s924_s27] sm:$0xf]  ;;  %v1232_v16 = vrot.slane %v1231_v3, 4  ;;  %v1155_v17 = vrot.slane %v1153_v5, 4 }
  0x40   : > { %v1158_v18 = vrot.slane %v1156_v6, 5  ;;  %v1049_v19 = vld [vmem:[%s924_s27 + $0x4] sm:$0xf]  ;;  %1052 = vst.msk [vmem:[#allocation2 + $0x48] sm:$0xf] %vm1008_vm1, %v1048_v15  ;;  %v1242_v22 = vrot.slane %v1241_v11, 4  ;;  %s935_s15 = sadd.s32 %s4643_s21, %s4875_s24 }
  0x41   : > { %v1164_v23 = vrot.slane %v1162_v12, 5  ;;  %v1168_v24 = vrot.slane %v1166_v13, 4  ;;  %v1050_v25 = vld [vmem:[%s924_s27 + $0x8] sm:$0x1]  ;;  %1053 = vst.msk [vmem:[#allocation2 + $0x4c] sm:$0xf] %vm1008_vm1, %v1049_v19  ;;  %v1237_v27 = vsel %vm4945_vm5, %v1232_v16, %v1236_v60  ;;  %v4166_v13 = vcombine.low %v5127_v2, %v5143_v21 }
  0x42   : > { %v4160_v26 = vrot.slane %v5112_v59, 9  ;;  %v1159_v31 = vor.u32 %v1158_v18, %v1155_v17  ;;  %v1174_v38 = vrot.slane %v1172_v14, 5  ;;  %v5149_v37 = vld [vmem:[#allocation2 + $0x24] sm:$0xf]  ;;  %1054 = vst.msk [vmem:[#allocation2 + $0x50] sm:$0x1] %vm1011_vm2, %v1050_v25  ;;  %v1247_v40 = vsel %vm4945_vm5, %v1242_v22, %v1246_v4 }
  0x43   : > { %v5155_v30 = vrot.slane %v1669_v41, 4  ;;  %v1169_v42 = vor.u32 %v1168_v24, %v1164_v23  ;;  %v5159_v46 = vld [vmem:[#allocation2 + $0x28] sm:$0xf]  ;;  %v1177_v48 = vshrl.u32 %v5149_v37, 16  ;;  %v1180_v49 = vshll.u32 %v5149_v37, 16  ;;  %s4112_s0 = sshll.u32 %s935_s15, 2 }
  0x44   : > { %v4129_v53 = vcombine.low %v1237_v27, %v1247_v40  ;;  %v1160_v54 = vrot.slane %v1159_v31, 4  ;;  %v1186_v55 = vshll.u32 %v5159_v46, 16  ;;  %v1190_v44 = vshrl.u32 %v5159_v46, 16  ;;  %s937_s16 = scalar_lea.vmem %s6142_s7, %s4112_s0  ;;  %v1614_v56 = vld [vmem:[#allocation2 + $0x18] sm:$0xe]  ;;  %s941_s22 = sadd.s32 8, %s4851_s17 }
  0x45   : > { %v1170_v57 = vrot.slane %v1169_v42, 4  ;;  %v1179_v60 = vrot.slane %v1177_v48, 4  ;;  %v1182_v61 = vrot.slane %v1180_v49, 5  ;;  %v1055_v3 = vld [vmem:[%s937_s16] sm:$0xf]  ;;  %v1655_v4 = vrot.slane %v5114_v62, 5 }
  0x46   : > { %4472 = vmatmul.mubr.msk.bf16.vlgmr.msra.gmra.mxu1 %vm1322_vm6, %v4129_v53  ;;  %v1165_v5 = vsel %vm4945_vm5, %v1160_v54, %v1164_v23  ;;  %v5172_v6 = vld [vmem:[#allocation2 + $0x2c] sm:$0x1]  ;;  %v1188_v10 = vrot.slane %v1186_v55, 5  ;;  %v1192_v11 = vrot.slane %v1190_v44, 4  ;;  %v1056_v12 = vld [vmem:[%s937_s16 + $0x4] sm:$0xf] }
  0x47   : > { %1059 = vst.msk [vmem:[#allocation2 + $0x54] sm:$0xf] %vm1008_vm1, %v1055_v3  ;;  %v5177_v14 = vld [vmem:[#allocation2 + $0xc] sm:$0xf]  ;;  %4480 = vmatpush3.bf16.msra.mxu1 %v4960_v34  ;;  %v1175_v15 = vsel %vm4945_vm5, %v1170_v57, %v1174_v38  ;;  %v1183_v16 = vor.u32 %v1182_v61, %v1179_v60  ;;  %v1196_v17 = vshll.u32 %v5172_v6, 16  ;;  %v4158_v22 = vrot.slane %v1614_v56, 9 }
  0x48   : > { %v5183_v18 = vld [vmem:[#allocation2 + $0x48] sm:$0xf]  ;;  %1060 = vst.msk [vmem:[#allocation2 + $0x58] sm:$0xf] %vm1008_vm1, %v1056_v12  ;;  %v4126_v23 = vcombine.low %v1165_v5, %v1175_v15  ;;  %v1193_v24 = vor.u32 %v1192_v11, %v1188_v10  ;;  %v5186_v25 = vld [vmem:[#allocation2 + $0x4c] sm:$0xf]  ;;  %4629 = vmatprep.subr.msk.bf16.mxu1 %vm1347_vm0, %v5018_v1 }
  0x49   : > { %v1057_v19 = vld [vmem:[%s937_s16 + $0x8] sm:$0x1]  ;;  %v1249_v27 = vshrl.u32 %v5183_v18, 16  ;;  %v1252_v34 = vshll.u32 %v5183_v18, 16  ;;  %v1184_v31 = vrot.slane %v1183_v16, 4  ;;  %v1198_v38 = vrot.slane %v1196_v17, 5 }
  0x4a   : > { %1061 = vst.msk [vmem:[#allocation2 + $0x5c] sm:$0x1] %vm1011_vm2, %v1057_v19  ;;  %v5194_v40 = vld [vmem:[#allocation2 + $0x50] sm:$0x1]  ;;  %v1258_v42 = vshll.u32 %v5186_v25, 16  ;;  %v1262_v48 = vshrl.u32 %v5186_v25, 16  ;;  %4467 = vmatprep.mubr.msk.bf16.mxu0 %vm1322_vm6, %v4126_v23  ;;  %v5207_v3 = vsel %vm5039_vm9, %v4158_v22, %v1655_v4 }
  0x4b   : > { %v1194_v49 = vrot.slane %v1193_v24, 4  ;;  %v1251_v53 = vrot.slane %v1249_v27, 4  ;;  %v1254_v54 = vrot.slane %v1252_v34, 5  ;;  %v1268_v55 = vshll.u32 %v5194_v40, 16  ;;  %v1615_v11 = vld [vmem:[#allocation2 + $0x24] sm:$0xe] }
  0x4c   : > { %v1189_v1 = vsel %vm4945_vm5, %v1184_v31, %v1188_v10  ;;  %v1260_v44 = vrot.slane %v1258_v42, 5  ;;  %v1264_v56 = vrot.slane %v1262_v48, 4  ;;  %v2084_v57 = vshrl.u32 %v5177_v14, 16  ;;  %p5214_p0 = scmp.lt.s32.totalorder %s941_s22, 17  ;;  %s954_s21 = sadd.s32 9, %s4851_s17 }
  0x4d   : > { %v1199_v60 = vsel %vm4945_vm5, %v1194_v49, %v1198_v38  ;;  %v1255_v61 = vor.u32 %v1254_v54, %v1251_v53  ;;  %v1658_v5 = vrot.slane %v5116_v63, 5  ;;  %v1270_v16 = vrot.slane %v1268_v55, 5  ;;  %p5365_p1 = scmp.lt.s32.totalorder %s954_s21, 17  ;;  %s6255_s17 = smov (!%p973_p2, %s4851_s17), 15 }
  0x4e   : > { %v4127_v12 = vcombine.low %v1189_v1, %v1199_v60  ;;  %v1265_v15 = vor.u32 %v1264_v56, %v1260_v44  ;;  %v5210_v17 = vld [vmem:[#allocation2 + $0x54] sm:$0xf]  ;;  %v1657_v10 = vrot.slane %v1655_v4, 4  ;;  %v1662_v63 = vrot.slane %v5159_v46, 5  ;;  %v1617_v60 = vld [vmem:[#allocation2 + $0x3c] sm:$0xe] }
  0x4f   : > { %v1256_v19 = vrot.slane %v1255_v61, 4  ;;  %v5218_v23 = vld [vmem:[#allocation2 + $0x58] sm:$0xf]  ;;  %v1273_v22 = vshrl.u32 %v5210_v17, 16  ;;  %v1276_v24 = vshll.u32 %v5210_v17, 16  ;;  %v4159_v38 = vrot.slane %v1615_v11, 9 }
  0x50   : > { %4468 = vmatmul.mubr.msk.bf16.gmra.mxu0 %vm1322_vm6, %v4127_v12  ;;  %v1266_v27 = vrot.slane %v1265_v15, 4  ;;  %v1282_v4 = vshll.u32 %v5218_v23, 16  ;;  %v1286_v31 = vshrl.u32 %v5218_v23, 16  ;;  %v1659_v56 = vsel %vm5039_vm9, %v1657_v10, %v1658_v5  ;;  %s6251_s22 = smov (!%p5214_p0, %s941_s22), 17  ;;  %v1618_v10 = vld [vmem:[#allocation2 + $0x48] sm:$0xe] }
  0x51   : > { %v5224_v34 = vld [vmem:[#allocation2 + $0x5c] sm:$0x1]  ;;  %v1261_v42 = vsel %vm4945_vm5, %v1256_v19, %v1260_v44  ;;  %v1275_v48 = vrot.slane %v1273_v22, 4  ;;  %v1278_v49 = vrot.slane %v1276_v24, 5  ;;  %4499 = vmatprep.mubr.msk.bf16.mxu0 %vm1322_vm6, %v4165_v0  ;;  %v1664_v11 = vrot.slane %v1662_v63, 4  ;;  %s4644_s19 = smul.u32 3, %s6251_s22 }
  0x52   : > { %v1292_v53 = vshll.u32 %v5224_v34, 16  ;;  %v1271_v54 = vsel %vm4945_vm5, %v1266_v27, %v1270_v16  ;;  %v1284_v55 = vrot.slane %v1282_v4, 5  ;;  %v1288_v1 = vrot.slane %v1286_v31, 4  ;;  %v5279_v24 = vld [vmem:[%s6145_s10 + $0xc] sm:$0x3]  ;;  %s6253_s21 = smov (!%p5365_p1, %s954_s21), 17 }
  0x53   : > { %v4130_v61 = vcombine.low %v1261_v42, %v1271_v54  ;;  %v1279_v44 = vor.u32 %v1278_v49, %v1275_v48  ;;  %v1665_v12 = vrot.slane %v5172_v6, 5  ;;  %v5252_v0 = vsel %vm5039_vm9, %v4160_v26, %v1669_v41  ;;  %v1619_v4 = vld [vmem:[#allocation2 + $0x54] sm:$0xe]  ;;  %v2062_v31 = vld [vmem:[#allocation2 + $0x18] sm:$0xf]  ;;  %s5314_s20 = sadd.s32 %s4644_s19, %s4875_s24  ;;  %s4645_s14 = smul.u32 3, %s6253_s21 }
  0x54   : > { %v1289_v35 = vor.u32 %v1288_v1, %v1284_v55  ;;  %v1294_v50 = vrot.slane %v1292_v53, 5  ;;  %v2087_v5 = vshll.u32 %v5177_v14, 16  ;;  %v4167_v15 = vcombine.low %v5207_v3, %v1659_v56  ;;  %v5302_v53 = vld [vmem:[#allocation2 + $0x14] sm:$0x1]  ;;  %s4114_s27 = sshll.u32 %s5314_s20, 2  ;;  %s4118_s29 = sshll.u32 %s6255_s17, 1 }
  0x55   : > { %4475 = vmatprep.mubr.msk.bf16.mxu1 %vm1322_vm6, %v4130_v61  ;;  %v1280_v6 = vrot.slane %v1279_v44, 4  ;;  %v5262_v16 = vsel %vm5039_vm9, %v5155_v30, %v1672_v32  ;;  %v4161_v59 = vrot.slane %v1617_v60, 9  ;;  %v4140_v41 = vcombine.low %v4913_v7, %v4915_v8  ;;  %v5274_v30 = vld [vmem:[#allocation2 + $0x10] sm:$0xf]  ;;  %s950_s16 = scalar_lea.vmem %s6143_s8, %s4114_s27  ;;  %s5458_s28 = sadd.s32 %s4645_s14, %s4875_s24 }
  0x56   : > { %v1290_v19 = vrot.slane %v1289_v35, 4  ;;  %v1676_v26 = vrot.slane %v5089_v45, 5  ;;  %v1663_v3 = vsel %vm5039_vm9, %v4159_v38, %v1662_v63  ;;  %v1666_v52 = vsel %vm5039_vm9, %v1664_v11, %v1665_v12  ;;  %v5322_v35 = vld [vmem:[#allocation2 + $0x20] sm:$0x1]  ;;  %s4116_s24 = sshll.u32 %s5458_s28, 2  ;;  %s4119_s30 = sshll.u32 %s4859_s18, 5 }
  0x57   : > { %v1285_v22 = vsel %vm4945_vm5, %v1280_v6, %v1284_v55  ;;  %v1683_v32 = vrot.slane %v5186_v25, 5  ;;  %v4141_v8 = vcombine.low %v4956_v33, %v4968_v36  ;;  %v4142_v63 = vcombine.low %v5109_v58, %v5114_v62  ;;  %v2071_v36 = vld [vmem:[#allocation2 + $0x3c] sm:$0xf]  ;;  %v1064_v58 = vld [vmem:[%s950_s16 + $0x8] sm:$0x1]  ;;  %s963_s21 = scalar_lea.vmem %s6144_s9, %s4116_s24  ;;  %s6036_s17 = sadd.s32 %s4119_s30, %s4118_s29 }
  0x58   : > { %v1295_v7 = vsel %vm4945_vm5, %v1290_v19, %v1294_v50  ;;  %4500 = vmatmul.mubr.msk.bf16.vlgmr.msra.gmra.mxu0 %vm1322_vm6, %v4166_v13  ;;  %v4169_v27 = vcombine.low %v5252_v0, %v5262_v16  ;;  %v1679_v2 = vrot.slane %v5100_v51, 5  ;;  %v4162_v21 = vrot.slane %v1618_v10, 9  ;;  %v2065_v50 = vld [vmem:[#allocation2 + $0x24] sm:$0xf]  ;;  %v5325_v16 = vld [vmem:[#allocation2 + $0x28] sm:$0xf] }
  0x59   : > { %v4131_v38 = vcombine.low %v1285_v22, %v1295_v7  ;;  %4534 = vmatpush3.bf16.msra.mxu0 %v5059_v29  ;;  %4503 = vmatprep.mubr.msk.bf16.mxu0 %vm1322_vm6, %v4167_v15  ;;  %v1690_v13 = vrot.slane %v5218_v23, 5  ;;  %v4168_v42 = vcombine.low %v1663_v3, %v1666_v52  ;;  %v5300_v48 = vsel %vm5039_vm9, %v4161_v59, %v1676_v26  ;;  %v5306_v29 = vld [vmem:[#allocation2 + $0x1c] sm:$0xf]  ;;  %s4120_s18 = sshll.u32 %s6036_s17, 2  ;;  %s4121_s28 = sshll.u32 %s4729_s26, 1 }
  0x5a   : > { %v1678_v49 = vrot.slane %v1676_v26, 4  ;;  %v2086_v54 = vrot.slane %v2084_v57, 4  ;;  %4632 = vmatprep.subr.msk.bf16.mxu0 %vm1347_vm0, %v5279_v24  ;;  %v1685_v51 = vrot.slane %v1683_v32, 4  ;;  %v1686_v55 = vrot.slane %v5194_v40, 5  ;;  %1068 = vst.msk [vmem:[#allocation2 + $0x68] sm:$0x1] %vm1011_vm2, %v1064_v58  ;;  %s6063_s14 = scalar_lea.vmem %s6146_s11, %s4120_s18  ;;  %s985_s24 = sadd.s32 %s4725_s25, %s4121_s28 }
  0x5b   : > { %4476 = vmatmul.mubr.msk.bf16.gmra.mxu1 %vm1322_vm6, %v4131_v38  ;;  %v2089_v1 = vrot.slane %v2087_v5, 5  ;;  %v2093_v56 = vshll.u32 %v5274_v30, 16  ;;  %v4163_v14 = vrot.slane %v1619_v4, 9  ;;  %v2097_v57 = vshrl.u32 %v5274_v30, 16  ;;  %v5352_v4 = vld [vmem:[%s6145_s10 + $0xa] sm:$0x3] }
  0x5c   : > { %4481 = vmatprep.mubr.msk.bf16.mxu1 %vm1322_vm6, %v4140_v41  ;;  %v2108_v60 = vshrl.u32 %v2062_v31, 16  ;;  %v2111_v61 = vshll.u32 %v2062_v31, 16  ;;  %v1692_v44 = vrot.slane %v1690_v13, 4  ;;  %v1693_v11 = vrot.slane %v5224_v34, 5  ;;  %v2068_v38 = vld [vmem:[#allocation2 + $0x30] sm:$0xf] }
  0x5d   : > { %v5319_v12 = vrot.slane %v2093_v56, 5  ;;  %v2103_v40 = vshll.u32 %v5302_v53, 16  ;;  %v2090_v0 = vor.u32 %v2089_v1, %v2086_v54  ;;  %v2099_v5 = vrot.slane %v2097_v57, 4  ;;  %p986_p3 = scmp.lt.s32.totalorder %s985_s24, 3 }
  0x5e   : > { %v2110_v6 = vrot.slane %v2108_v60, 4  ;;  %v2117_v15 = vshll.u32 %v5306_v29, 16  ;;  %v1680_v59 = vsel %vm5039_vm9, %v1678_v49, %v1679_v2  ;;  %v1684_v34 = vsel %vm5039_vm9, %v4162_v21, %v1683_v32 }
  0x5f   : > { %v2113_v10 = vrot.slane %v2111_v61, 5  ;;  %v2121_v19 = vshrl.u32 %v5306_v29, 16  ;;  %v1687_v41 = vsel %vm5039_vm9, %v1685_v51, %v1686_v55  ;;  %v2100_v26 = vor.u32 %v2099_v5, %v5319_v12  ;;  %v5373_v51 = vld [vmem:[#allocation2 + $0x2c] sm:$0x1]  ;;  %s6257_s24 = smov (!%p986_p3, %s985_s24), 3 }
  0x60   : > { %4504 = vmatmul.mubr.msk.bf16.gmra.mxu0 %vm1322_vm6, %v4168_v42  ;;  %v2132_v22 = vshrl.u32 %v2065_v50, 16  ;;  %v2135_v3 = vshll.u32 %v2065_v50, 16  ;;  %v5341_v52 = vsel %vm5039_vm9, %v4163_v14, %v1690_v13  ;;  %v5345_v32 = vsel %vm5039_vm9, %v1692_v44, %v1693_v11  ;;  %v5361_v42 = vld [vmem:[#allocation2 + $0x34] sm:$0xf]  ;;  %v1063_v44 = vld [vmem:[%s950_s16 + $0x4] sm:$0xf]  ;;  %s991_s19 = scalar_lea.vmem %s6147_s12, %s6257_s24  ;;  %s1001_s27 = scalar_lea.vmem %s6148_s13, %s6257_s24 }
  0x61   : > { %4507 = vmatprep.mubr.msk.bf16.mxu0 %vm1322_vm6, %v4169_v27  ;;  %v5347_v7 = vrot.slane %v2103_v40, 5  ;;  %v2141_v31 = vshll.u32 %v5325_v16, 16  ;;  %v2091_v27 = vrot.slane %v2090_v0, 4  ;;  %v2114_v2 = vor.u32 %v2113_v10, %v2110_v6  ;;  %1067 = vst.msk [vmem:[#allocation2 + $0x64] sm:$0xf] %vm1008_vm1, %v1063_v44 }
  0x62   : > { %v5358_v21 = vrot.slane %v2117_v15, 5  ;;  %v2127_v13 = vshll.u32 %v5322_v35, 16  ;;  %v2101_v49 = vrot.slane %v2100_v26, 4  ;;  %v2123_v54 = vrot.slane %v2121_v19, 4  ;;  %v5424_v26 = vld [vmem:[#allocation2 + $0x44] sm:$0x1] }
  0x63   : > { %4482 = vmatmul.mubr.msk.bf16.vlgmr.msra.gmra.mxu1 %vm1322_vm6, %v4141_v8  ;;  %v2134_v55 = vrot.slane %v2132_v22, 4  ;;  %v2145_v1 = vshrl.u32 %v5325_v16, 16  ;;  %v4170_v56 = vcombine.low %v5300_v48, %v1680_v59  ;;  %v2137_v14 = vrot.slane %v2135_v3, 5  ;;  %v1062_v8 = vld [vmem:[%s950_s16] sm:$0xf] }
  0x64   : > { %4516 = vmatpush3.bf16.msra.mxu1 %v5056_v9  ;;  %4485 = vmatprep.mubr.msk.bf16.mxu1 %vm1322_vm6, %v4142_v63  ;;  %v5382_v33 = vrot.slane %v2141_v31, 5  ;;  %v4144_v57 = vcombine.low %v4977_v43, %v4990_v47  ;;  %v4171_v60 = vcombine.low %v1684_v34, %v1687_v41  ;;  %v2156_v61 = vshrl.u32 %v2068_v38, 16  ;;  %1066 = vst.msk [vmem:[#allocation2 + $0x60] sm:$0xf] %vm1008_vm1, %v1062_v8  ;;  %v5395_v47 = vld [vmem:[#allocation2 + $0x40] sm:$0xf] }
  0x65   : > { %4631 = vmatprep.subr.msk.bf16.mxu1 %vm1347_vm0, %v5352_v4  ;;  %v2147_v9 = vrot.slane %v2145_v1, 4  ;;  %v4143_v62 = vcombine.low %v5149_v37, %v5159_v46  ;;  %v4172_v63 = vcombine.low %v5341_v52, %v5345_v32  ;;  %v5393_v48 = vrot.slane %v2127_v13, 5  ;;  %v5420_v59 = vld [vmem:[#allocation2 + $0x38] sm:$0x1]  ;;  %v2074_v52 = vld [vmem:[#allocation2 + $0x48] sm:$0xf] }
  0x66   : > { %v2159_v43 = vshll.u32 %v2068_v38, 16  ;;  %v5399_v11 = vrot.slane %v2114_v2, 4  ;;  %v2124_v40 = vor.u32 %v2123_v54, %v5358_v21  ;;  %v2165_v37 = vshll.u32 %v5361_v42, 16 }
  0x67   : > { %v2169_v46 = vshrl.u32 %v5361_v42, 16  ;;  %v2096_v50 = vsel %vm4945_vm5, %v2091_v27, %v5319_v12  ;;  %v2106_v0 = vsel %vm4945_vm5, %v2101_v49, %v5347_v7  ;;  %v2138_v5 = vor.u32 %v2137_v14, %v2134_v55  ;;  %v5434_v14 = vld [vmem:[#allocation2 + $0x4c] sm:$0xf] }
  0x68   : > { %4508 = vmatmul.mubr.msk.bf16.gmra.mxu0 %vm1322_vm6, %v4170_v56  ;;  %v2151_v6 = vshll.u32 %v5373_v51, 16  ;;  %v2148_v15 = vor.u32 %v2147_v9, %v5382_v33  ;;  %v2158_v34 = vrot.slane %v2156_v61, 4  ;;  %v2161_v10 = vrot.slane %v2159_v43, 5  ;;  %v2077_v9 = vld [vmem:[#allocation2 + $0x54] sm:$0xf] }
  0x69   : > { %4511 = vmatprep.mubr.msk.bf16.mxu0 %vm1322_vm6, %v4171_v60  ;;  %v2180_v12 = vshrl.u32 %v2071_v36, 16  ;;  %v5422_v19 = vrot.slane %v2165_v37, 5  ;;  %v2171_v41 = vrot.slane %v2169_v46, 4  ;;  %v2183_v22 = vshll.u32 %v2071_v36, 16  ;;  %v5464_v37 = vld [vmem:[#allocation2 + $0x50] sm:$0x1] }
  0x6a   : > { %v2189_v3 = vshll.u32 %v5395_v47, 16  ;;  %v4199_v32 = vcombine.low %v2096_v50, %v2106_v0  ;;  %v2125_v7 = vrot.slane %v2124_v40, 4  ;;  %v2193_v38 = vshrl.u32 %v5395_v47, 16 }
  0x6b   : > { %4486 = vmatmul.mubr.msk.bf16.gmra.mxu1 %vm1322_vm6, %v4143_v62  ;;  %v2182_v31 = vrot.slane %v2180_v12, 4  ;;  %v2139_v27 = vrot.slane %v2138_v5, 4  ;;  %v2153_v2 = vrot.slane %v2151_v6, 5  ;;  %v2185_v13 = vrot.slane %v2183_v22, 5  ;;  %v2080_v22 = vld [vmem:[#allocation2 + $0x60] sm:$0xf] }
  0x6c   : > { %4489 = vmatprep.mubr.msk.bf16.mxu1 %vm1322_vm6, %v4144_v57  ;;  %v5430_v49 = vrot.slane %v2189_v3, 5  ;;  %v2149_v54 = vrot.slane %v2148_v15, 4  ;;  %v2162_v55 = vor.u32 %v2161_v10, %v2158_v34  ;;  %v2175_v1 = vshll.u32 %v5420_v59, 16 }
  0x6d   : > { %v2195_v56 = vrot.slane %v2193_v38, 4  ;;  %v4145_v36 = vcombine.low %v5073_v39, %v5089_v45  ;;  %v4146_v8 = vcombine.low %v5183_v18, %v5186_v25  ;;  %v2120_v57 = vsel %vm4945_vm5, %v5399_v11, %v5358_v21  ;;  %v5449_v39 = vld [vmem:[#allocation2 + $0x58] sm:$0xf] }
  0x6e   : > { %v2172_v60 = vor.u32 %v2171_v41, %v5422_v19  ;;  %v2130_v61 = vsel %vm4945_vm5, %v2125_v7, %v5393_v48  ;;  %v2186_v44 = vor.u32 %v2185_v13, %v2182_v31  ;;  %v2199_v58 = vshll.u32 %v5424_v26, 16  ;;  %v5475_v7 = vld [vmem:[#allocation2 + $0x64] sm:$0xf]  ;;  %v5480_v31 = vld [vmem:[%s6145_s10 + $0x10] sm:$0x3] }
  0x6f   : > { %v2204_v62 = vshrl.u32 %v2074_v52, 16  ;;  %v2144_v45 = vsel %vm4945_vm5, %v2139_v27, %v5382_v33  ;;  %v2196_v18 = vor.u32 %v2195_v56, %v5430_v49  ;;  %v2207_v25 = vshll.u32 %v2074_v52, 16 }
  0x70   : > { %4512 = vmatmul.mubr.msk.bf16.gmra.mxu0 %vm1322_vm6, %v4172_v63  ;;  %v2213_v21 = vshll.u32 %v5434_v14, 16  ;;  %v2154_v48 = vsel %vm4945_vm5, %v2149_v54, %v2153_v2  ;;  %v2163_v43 = vrot.slane %v2162_v55, 4  ;;  %v2177_v11 = vrot.slane %v2175_v1, 5  ;;  %v5493_v1 = vld [vmem:[#allocation2 + $0x5c] sm:$0x1] }
  0x71   : > { %4535 = vmatprep.mubr.msk.bf16.mxu0 %vm1322_vm6, %v4199_v32  ;;  %v2217_v63 = vshrl.u32 %v5434_v14, 16  ;;  %v2173_v40 = vrot.slane %v2172_v60, 4  ;;  %v2228_v33 = vshrl.u32 %v2077_v9, 16  ;;  %v2231_v46 = vshll.u32 %v2077_v9, 16 }
  0x72   : > { %v2237_v50 = vshll.u32 %v5449_v39, 16  ;;  %v4200_v0 = vcombine.low %v2120_v57, %v2130_v61  ;;  %v2187_v5 = vrot.slane %v2186_v44, 4  ;;  %v2201_v6 = vrot.slane %v2199_v58, 5  ;;  %v1069_v44 = vld [vmem:[%s963_s21] sm:$0xf] }
  0x73   : > { %4490 = vmatmul.mubr.msk.bf16.gmra.mxu1 %vm1322_vm6, %v4145_v36  ;;  %v2206_v15 = vrot.slane %v2204_v62, 4  ;;  %v2197_v34 = vrot.slane %v2196_v18, 4  ;;  %v2209_v10 = vrot.slane %v2207_v25, 5  ;;  %v5470_v12 = vrot.slane %v2213_v21, 5  ;;  %v1071_v18 = vld [vmem:[%s963_s21 + $0x8] sm:$0x1] }
  0x74   : > { %4493 = vmatprep.mubr.msk.bf16.mxu1 %vm1322_vm6, %v4146_v8  ;;  %v2219_v41 = vrot.slane %v2217_v63, 4  ;;  %v2778_v3 = vsel %vm1347_vm0, %v5279_v24, 0  ;;  %v4201_v52 = vcombine.low %v2144_v45, %v2154_v48  ;;  %v2241_v32 = vshrl.u32 %v5449_v39, 16  ;;  %v1070_v45 = vld [vmem:[%s963_s21 + $0x4] sm:$0xf] }
  0x75   : > { %v4147_v38 = vcombine.low %v5210_v17, %v5218_v23  ;;  %v2230_v27 = vrot.slane %v2228_v33, 4  ;;  %v2233_v2 = vrot.slane %v2231_v46, 5  ;;  %v2239_v13 = vrot.slane %v2237_v50, 5  ;;  %v4687_v17 = vld [vmem:[#allocation2 + $0xc] sm:$0xff]   ;;  %1073 = vst.msk [vmem:[#allocation2 + $0x6c] sm:$0xf] %vm1008_vm1, %v1069_v44 }
  0x76   : > { %v2168_v24 = vsel %vm4945_vm5, %v2163_v43, %v5422_v19  ;;  %v2178_v54 = vsel %vm4945_vm5, %v2173_v40, %v2177_v11  ;;  %v2223_v55 = vshll.u32 %v5464_v37, 16  ;;  %v2243_v56 = vrot.slane %v2241_v32, 4  ;;  %1074 = vst.msk [vmem:[#allocation2 + $0x70] sm:$0xf] %vm1008_vm1, %v1070_v45  ;;  %v2443_v44 = vld [vmem:[#allocation2 + $0x24] sm:$0xe] }
  0x77   : > { %v2192_v23 = vsel %vm4945_vm5, %v2187_v5, %v5430_v49  ;;  %v2202_v36 = vsel %vm4945_vm5, %v2197_v34, %v2201_v6  ;;  %v2210_v8 = vor.u32 %v2209_v10, %v2206_v15  ;;  %v2220_v19 = vor.u32 %v2219_v41, %v5470_v12  ;;  %1075 = vst.msk [vmem:[#allocation2 + $0x74] sm:$0x1] %vm1011_vm2, %v1071_v18  ;;  %v5513_v6 = vld [vmem:[#allocation2 + $0x68] sm:$0x1]  ;;  %v4688_v15 = vld [vmem:[#allocation2 + $0x18] sm:$0xff]  }
  0x78   : > { %4536 = vmatmul.mubr.msk.bf16.vlgmr.msra.gmra.mxu0 %vm1322_vm6, %v4200_v0  ;;  %v2252_v57 = vshrl.u32 %v2080_v22, 16  ;;  %v2255_v60 = vshll.u32 %v2080_v22, 16  ;;  %v2261_v9 = vshll.u32 %v5475_v7, 16  ;;  %v2265_v61 = vshrl.u32 %v5475_v7, 16  ;;  %v4689_v10 = vld [vmem:[#allocation2 + $0x24] sm:$0xff]  }
  0x79   : > { %4570 = vmatpush3.bf16.msra.mxu0 %v2778_v3  ;;  %4539 = vmatprep.mubr.msk.bf16.mxu0 %vm1322_vm6, %v4201_v52  ;;  %v2234_v58 = vor.u32 %v2233_v2, %v2230_v27  ;;  %v2244_v62 = vor.u32 %v2243_v56, %v2239_v13  ;;  %v2247_v49 = vshll.u32 %v5493_v1, 16  ;;  %v4202_v25 = vcombine.low %v2168_v24, %v2178_v54  ;;  %v4257_v27 = vld [vmem:[%s6145_s10 + $0xe] sm:$0x3]  ;;  %v4691_v56 = vld [vmem:[#allocation2 + $0x3c] sm:$0xff]  }
  0x7a   : > { %4634 = vmatprep.subr.msk.bf16.mxu0 %vm1347_vm0, %v5480_v31  ;;  %v4203_v21 = vcombine.low %v2192_v23, %v2202_v36  ;;  %v2211_v48 = vrot.slane %v2210_v8, 4  ;;  %v2221_v43 = vrot.slane %v2220_v19, 4  ;;  %v2225_v11 = vrot.slane %v2223_v55, 5  ;;  %v2441_v36 = vld [vmem:[#allocation2 + $0xc] sm:$0xe] }
  0x7b   : > { %4494 = vmatmul.mubr.msk.bf16.gmra.mxu1 %vm1322_vm6, %v4147_v38  ;;  %v2254_v63 = vrot.slane %v2252_v57, 4  ;;  %v2257_v40 = vrot.slane %v2255_v60, 5  ;;  %v2263_v33 = vrot.slane %v2261_v9, 5  ;;  %v2267_v46 = vrot.slane %v2265_v61, 4  ;;  %v2442_v60 = vld [vmem:[#allocation2 + $0x18] sm:$0xe] }
  0x7c   : > { %4517 = vmatprep.mubr.msk.bf16.mxu1 %vm1322_vm6, %v4687_v17  ;;  %v2235_v50 = vrot.slane %v2234_v58, 4  ;;  %v2245_v0 = vrot.slane %v2244_v62, 4  ;;  %v2249_v5 = vrot.slane %v2247_v49, 5  ;;  %v2580_v34 = vsel %vm1347_vm0, %v5352_v4, 0  ;;  %v4695_v61 = vld [vmem:[#allocation2 + $0x18] sm:$0xff]   ;;  %v4692_v58 = vld [vmem:[#allocation2 + $0x48] sm:$0xff]  }
  0x7d   : > { %v2216_v41 = vsel %vm4945_vm5, %v2211_v48, %v5470_v12  ;;  %v2226_v22 = vsel %vm4945_vm5, %v2221_v43, %v2225_v11  ;;  %v2258_v3 = vor.u32 %v2257_v40, %v2254_v63  ;;  %v2268_v52 = vor.u32 %v2267_v46, %v2263_v33  ;;  %v4693_v48 = vld [vmem:[#allocation2 + $0x54] sm:$0xff]   ;;  %v2445_v63 = vld [vmem:[#allocation2 + $0x3c] sm:$0xe]  ;;  %v2446_v46 = vld [vmem:[#allocation2 + $0x48] sm:$0xe] }
  0x7e   : > { %v2271_v32 = vshll.u32 %v5513_v6, 16  ;;  %v2240_v38 = vsel %vm4945_vm5, %v2235_v50, %v2239_v13  ;;  %v2250_v4 = vsel %vm4945_vm5, %v2245_v0, %v2249_v5  ;;  %v4204_v12 = vcombine.low %v2216_v41, %v2226_v22  ;;  %v4690_v13 = vld [vmem:[#allocation2 + $0x30] sm:$0xff]   ;;  %v4696_v5 = vld [vmem:[#allocation2 + $0x24] sm:$0xff]  }
  0x7f   : > { %v4205_v2 = vcombine.low %v2240_v38, %v2250_v4  ;;  %v2259_v24 = vrot.slane %v2258_v3, 4  ;;  %v2269_v54 = vrot.slane %v2268_v52, 4  ;;  %v2475_v8 = vrot.slane %v5274_v30, 5  ;;  %v2893_v52 = vld [vmem:[#allocation2 + $0x18] sm:$0xf] }
  0x80   : > { %4540 = vmatmul.mubr.msk.bf16.gmra.mxu0 %vm1322_vm6, %v4202_v25  ;;  %v2273_v55 = vrot.slane %v2271_v32, 5  ;;  %v2482_v19 = vrot.slane %v5306_v29, 5  ;;  %v2489_v9 = vrot.slane %v5325_v16, 5  ;;  %v4215_v62 = vrot.slane %v2441_v36, 9  ;;  %v2444_v29 = vld [vmem:[#allocation2 + $0x30] sm:$0xe] }
  0x81   : > { %4543 = vmatprep.mubr.msk.bf16.mxu0 %vm1322_vm6, %v4203_v21  ;;  %v2264_v17 = vsel %vm4945_vm5, %v2259_v24, %v2263_v33  ;;  %v2478_v49 = vrot.slane %v5302_v53, 5  ;;  %v2496_v45 = vrot.slane %v5361_v42, 5  ;;  %v2477_v18 = vrot.slane %v2475_v8, 4 }
  0x82   : > { %v2274_v23 = vsel %vm4945_vm5, %v2269_v54, %v2273_v55  ;;  %v4216_v25 = vrot.slane %v2442_v60, 9  ;;  %v2484_v21 = vrot.slane %v2482_v19, 4  ;;  %v2485_v30 = vrot.slane %v5322_v35, 5  ;;  %v2894_v55 = vld [vmem:[#allocation2 + $0x1c] sm:$0xf] }
  0x83   : > { %4518 = vmatmul.mubr.msk.bf16.vlgmr.msra.gmra.mxu1 %vm1322_vm6, %v4688_v15  ;;  %v4206_v57 = vcombine.low %v2264_v17, %v2274_v23  ;;  %v4217_v43 = vrot.slane %v2443_v44, 9  ;;  %v2491_v11 = vrot.slane %v2489_v9, 4  ;;  %v2492_v16 = vrot.slane %v5373_v51, 5  ;;  %v2448_v17 = vld [vmem:[#allocation2 + $0x60] sm:$0xe] }
  0x84   : > { %4552 = vmatpush3.bf16.msra.mxu1 %v2580_v34  ;;  %4521 = vmatprep.mubr.msk.bf16.mxu1 %vm1322_vm6, %v4689_v10  ;;  %v2476_v53 = vsel %vm5039_vm9, %v4215_v62, %v2475_v8  ;;  %v4218_v42 = vrot.slane %v2444_v29, 9  ;;  %v2498_v40 = vrot.slane %v2496_v45, 4  ;;  %v2499_v33 = vrot.slane %v5420_v59, 5 }
  0x85   : > { %4633 = vmatprep.subr.msk.bf16.mxu1 %vm1347_vm0, %v4257_v27  ;;  %v2479_v35 = vsel %vm5039_vm9, %v2477_v18, %v2478_v49  ;;  %v5560_v50 = vsel %vm5039_vm9, %v4216_v25, %v2482_v19  ;;  %v5564_v51 = vsel %vm5039_vm9, %v2484_v21, %v2485_v30  ;;  %v2503_v0 = vrot.slane %v5395_v47, 5  ;;  %v4697_v47 = vld [vmem:[#allocation2 + $0x30] sm:$0xff]   ;;  %v4698_v25 = vld [vmem:[#allocation2 + $0x3c] sm:$0xff]  }
  0x86   : > { %v5569_v59 = vsel %vm1347_vm0, %v4257_v27, 0  ;;  %v5573_v15 = vsel %vm5039_vm9, %v4217_v43, %v2489_v9  ;;  %v5577_v34 = vsel %vm5039_vm9, %v2491_v11, %v2492_v16  ;;  %v2510_v10 = vrot.slane %v5434_v14, 5  ;;  %v2447_v14 = vld [vmem:[#allocation2 + $0x54] sm:$0xe] }
  0x87   : > { %v3414_v41 = vsel %vm1347_vm0, %v5480_v31, 0  ;;  %v4219_v22 = vrot.slane %v2445_v63, 9  ;;  %v4220_v3 = vrot.slane %v2446_v46, 9  ;;  %v4224_v32 = vcombine.low %v2476_v53, %v2479_v35 }
  0x88   : > { %4544 = vmatmul.mubr.msk.bf16.gmra.mxu0 %vm1322_vm6, %v4204_v12  ;;  %v4225_v38 = vcombine.low %v5560_v50, %v5564_v51  ;;  %v5586_v4 = vsel %vm5039_vm9, %v4218_v42, %v2496_v45  ;;  %v5590_v27 = vsel %vm5039_vm9, %v2498_v40, %v2499_v33  ;;  %v4694_v12 = vld [vmem:[#allocation2 + $0x60] sm:$0xff]   ;;  %v4226_v31 = vcombine.low %v5573_v15, %v5577_v34  ;;  %v2897_v33 = vld [vmem:[#allocation2 + $0x28] sm:$0xf] }
  0x89   : > { %4547 = vmatprep.mubr.msk.bf16.mxu0 %vm1322_vm6, %v4205_v2  ;;  %v2505_v2 = vrot.slane %v2503_v0, 4  ;;  %v2506_v24 = vrot.slane %v5424_v26, 5  ;;  %v2517_v54 = vrot.slane %v5449_v39, 5  ;;  %v2918_v23 = vshrl.u32 %v2893_v52, 16 }
  0x8a   : > { %v2921_v36 = vshll.u32 %v2893_v52, 16  ;;  %v4227_v8 = vcombine.low %v5586_v4, %v5590_v27  ;;  %v5603_v26 = vsel %vm5039_vm9, %v4219_v22, %v2503_v0  ;;  %v5607_v39 = vsel %vm5039_vm9, %v4220_v3, %v2510_v10  ;;  %v3276_v22 = vld [vmem:[#allocation2 + $0x24] sm:$0xe]  ;;  %v2899_v52 = vld [vmem:[#allocation2 + $0x30] sm:$0xf] }
  0x8b   : > { %4522 = vmatmul.mubr.msk.bf16.gmra.mxu1 %vm1322_vm6, %v4690_v13  ;;  %v2512_v13 = vrot.slane %v2510_v10, 4  ;;  %v4221_v19 = vrot.slane %v2447_v14, 9  ;;  %v2524_v60 = vrot.slane %v5475_v7, 5  ;;  %v3309_v9 = vrot.slane %v2894_v55, 5 }
  0x8c   : > { %4525 = vmatprep.mubr.msk.bf16.mxu1 %vm1322_vm6, %v4691_v56  ;;  %v2513_v56 = vrot.slane %v5464_v37, 5  ;;  %v3275_v37 = vld [vmem:[#allocation2 + $0x18] sm:$0xe]  ;;  %v2931_v44 = vshrl.u32 %v2894_v55, 16  ;;  %v5615_v62 = vsel %vm5039_vm9, %v2505_v2, %v2506_v24  ;;  %v2519_v49 = vrot.slane %v2517_v54, 4 }
  0x8d   : > { %v2520_v45 = vrot.slane %v5493_v1, 5  ;;  %v4222_v18 = vrot.slane %v2448_v17, 9  ;;  %v4274_v21 = vrot.slane %v3275_v37, 9  ;;  %v2920_v30 = vrot.slane %v2918_v23, 4  ;;  %v5651_v24 = vld [vmem:[#allocation2 + $0x34] sm:$0xf] }
  0x8e   : > { %v5621_v7 = vsel %vm5039_vm9, %v2512_v13, %v2513_v56  ;;  %v2923_v29 = vrot.slane %v2921_v36, 5  ;;  %v2527_v43 = vrot.slane %v5513_v6, 5  ;;  %v2526_v53 = vrot.slane %v2524_v60, 4  ;;  %v4700_v37 = vld [vmem:[#allocation2 + $0x54] sm:$0xff]  }
  0x8f   : > { %v3311_v1 = vrot.slane %v3309_v9, 4  ;;  %v2933_v40 = vrot.slane %v2931_v44, 4  ;;  %v4228_v46 = vcombine.low %v5603_v26, %v5615_v62  ;;  %v4229_v35 = vcombine.low %v5607_v39, %v5621_v7  ;;  %v2906_v26 = vld [vmem:[#allocation2 + $0x4c] sm:$0xf]  ;;  %v5731_v62 = vld [vmem:[#allocation2 + $0x50] sm:$0x1] }
  0x90   : > { %4548 = vmatmul.mubr.msk.bf16.gmra.mxu0 %vm1322_vm6, %v4206_v57  ;;  %v5609_v57 = vld [vmem:[#allocation2 + $0x20] sm:$0x1]  ;;  %v5633_v0 = vsel %vm5039_vm9, %v4221_v19, %v2517_v54  ;;  %v5637_v6 = vsel %vm5039_vm9, %v2519_v49, %v2520_v45  ;;  %v5644_v10 = vsel %vm5039_vm9, %v4222_v18, %v2524_v60  ;;  %v3316_v3 = vrot.slane %v2897_v33, 5 }
  0x91   : > { %4571 = vmatprep.mubr.msk.bf16.mxu0 %vm1322_vm6, %v4695_v61  ;;  %v2927_v61 = vshll.u32 %v2894_v55, 16  ;;  %v3312_v11 = vrot.slane %v5609_v57, 5  ;;  %v2955_v2 = vshrl.u32 %v2897_v33, 16  ;;  %v5655_v54 = vsel %vm5039_vm9, %v2526_v53, %v2527_v43 }
  0x92   : > { %v2937_v56 = vshll.u32 %v5609_v57, 16  ;;  %v4275_v17 = vrot.slane %v3276_v22, 9  ;;  %v2966_v36 = vshrl.u32 %v2899_v52, 16  ;;  %v2969_v19 = vshll.u32 %v2899_v52, 16 }
  0x93   : > { %4526 = vmatmul.mubr.msk.bf16.gmra.mxu1 %vm1322_vm6, %v4692_v58  ;;  %v2896_v58 = vld [vmem:[#allocation2 + $0x24] sm:$0xf]  ;;  %v5625_v42 = vrot.slane %v2927_v61, 5  ;;  %v5659_v55 = vsel %vm5039_vm9, %v3311_v1, %v3312_v11  ;;  %v3318_v57 = vrot.slane %v3316_v3, 4  ;;  %v2975_v50 = vshll.u32 %v5651_v24, 16 }
  0x94   : > { %4529 = vmatprep.mubr.msk.bf16.mxu1 %vm1322_vm6, %v4693_v48  ;;  %v4699_v48 = vld [vmem:[#allocation2 + $0x48] sm:$0xff]   ;;  %v2942_v16 = vshrl.u32 %v2896_v58, 16  ;;  %v2945_v63 = vshll.u32 %v2896_v58, 16  ;;  %v2979_v51 = vshrl.u32 %v5651_v24, 16  ;;  %v4231_v15 = vcombine.low %v5644_v10, %v5655_v54  ;;  %v3277_v58 = vld [vmem:[#allocation2 + $0x30] sm:$0xe] }
  0x95   : > { %v2934_v13 = vor.u32 %v2933_v40, %v5625_v42  ;;  %v3323_v49 = vrot.slane %v5651_v24, 5  ;;  %v5692_v18 = vsel %vm5039_vm9, %v4275_v17, %v3316_v3  ;;  %v5703_v43 = vrot.slane %v2975_v50, 5 }
  0x96   : > { %v2947_v14 = vrot.slane %v2945_v63, 5  ;;  %v2981_v11 = vrot.slane %v2979_v51, 4  ;;  %v4276_v40 = vrot.slane %v3277_v58, 9 }
  0x97   : > { %v5683_v34 = vrot.slane %v2934_v13, 4 }
  0x98   : > { %4572 = vmatmul.mubr.msk.bf16.vlgmr.msra.gmra.mxu0 %vm1322_vm6, %v4696_v5  ;;  %v5639_v5 = vld [vmem:[#allocation2 + $0x2c] sm:$0x1]  ;;  %v2982_v24 = vor.u32 %v2981_v11, %v5703_v43 }
  0x99   : > { %4606 = vmatpush3.bf16.msra.mxu0 %v3414_v41  ;;  %4575 = vmatprep.mubr.msk.bf16.mxu0 %vm1322_vm6, %v4697_v47  ;;  %v5648_v41 = vsel %vm5039_vm9, %v4274_v21, %v3309_v9  ;;  %v2924_v47 = vor.u32 %v2923_v29, %v2920_v30  ;;  %v3319_v23 = vrot.slane %v5639_v5, 5  ;;  %v4230_v9 = vcombine.low %v5633_v0, %v5637_v6 }
  0x9a   : > { %v4283_v45 = vcombine.low %v5648_v41, %v5659_v55  ;;  %v2968_v21 = vrot.slane %v2966_v36, 4  ;;  %v2971_v30 = vrot.slane %v2969_v19, 5  ;;  %v2961_v1 = vshll.u32 %v5639_v5, 16  ;;  %v3278_v5 = vld [vmem:[#allocation2 + $0x3c] sm:$0xe] }
  0x9b   : > { %4530 = vmatmul.mubr.msk.bf16.gmra.mxu1 %vm1322_vm6, %v4694_v12  ;;  %v2951_v12 = vshll.u32 %v2897_v33, 16  ;;  %v5673_v60 = vrot.slane %v2924_v47, 4  ;;  %v2903_v33 = vld [vmem:[#allocation2 + $0x40] sm:$0xf]  ;;  %v3325_v47 = vrot.slane %v3323_v49, 4  ;;  %v4277_v19 = vrot.slane %v3278_v5, 9 }
  0x9c   : > { %4553 = vmatprep.mubr.msk.bf16.mxu1 %vm1322_vm6, %v4224_v32  ;;  %v2944_v32 = vrot.slane %v2942_v16, 4  ;;  %v2902_v16 = vld [vmem:[#allocation2 + $0x3c] sm:$0xf]  ;;  %v2904_v55 = vld [vmem:[#allocation2 + $0x44] sm:$0x1]  ;;  %v2999_v4 = vshll.u32 %v2903_v33, 16 }
  0x9d   : > { %v5679_v44 = vrot.slane %v2951_v12, 5  ;;  %v2930_v29 = vsel %vm4945_vm5, %v5673_v60, %v5625_v42  ;;  %v2990_v12 = vshrl.u32 %v2902_v16, 16  ;;  %v2993_v13 = vshll.u32 %v2902_v16, 16  ;;  %v2908_v60 = vld [vmem:[#allocation2 + $0x54] sm:$0xf] }
  0x9e   : > { %v2948_v61 = vor.u32 %v2947_v14, %v2944_v32  ;;  %v2972_v32 = vor.u32 %v2971_v30, %v2968_v21  ;;  %v3330_v14 = vrot.slane %v2903_v33, 5  ;;  %v3003_v27 = vshrl.u32 %v2903_v33, 16 }
  0x9f   : > { %v2963_v17 = vrot.slane %v2961_v1, 5  ;;  %v3023_v21 = vshll.u32 %v2906_v26, 16  ;;  %v3027_v30 = vshrl.u32 %v2906_v26, 16  ;;  %v3009_v33 = vshll.u32 %v2904_v55, 16 }
  0xa0   : > { %4576 = vmatmul.mubr.msk.bf16.gmra.mxu0 %vm1322_vm6, %v4698_v25  ;;  %v2901_v25 = vld [vmem:[#allocation2 + $0x38] sm:$0x1]  ;;  %v5706_v63 = vrot.slane %v2948_v61, 4  ;;  %v2973_v50 = vrot.slane %v2972_v32, 4  ;;  %v3332_v51 = vrot.slane %v3330_v14, 4  ;;  %v2992_v61 = vrot.slane %v2990_v12, 4 }
  0xa1   : > { %4579 = vmatprep.mubr.msk.bf16.mxu0 %vm1322_vm6, %v4699_v48  ;;  %v5701_v48 = vsel %vm5039_vm9, %v3318_v57, %v3319_v23  ;;  %v3326_v22 = vrot.slane %v2901_v25, 5  ;;  %v2985_v3 = vshll.u32 %v2901_v25, 16  ;;  %v3324_v23 = vsel %vm5039_vm9, %v4276_v40, %v3323_v49  ;;  %v2905_v57 = vld [vmem:[#allocation2 + $0x48] sm:$0xf]  ;;  %v5777_v12 = vld [vmem:[#allocation2 + $0x5c] sm:$0x1] }
  0xa2   : > { %v4284_v52 = vcombine.low %v5692_v18, %v5701_v48  ;;  %v3005_v58 = vrot.slane %v3003_v27, 4  ;;  %v3014_v49 = vshrl.u32 %v2905_v57, 16  ;;  %v3017_v25 = vshll.u32 %v2905_v57, 16  ;;  %v3281_v18 = vld [vmem:[#allocation2 + $0x60] sm:$0xe] }
  0xa3   : > { %4554 = vmatmul.mubr.msk.bf16.vlgmr.msra.gmra.mxu1 %vm1322_vm6, %v4225_v38  ;;  %v4701_v38 = vld [vmem:[#allocation2 + $0x60] sm:$0xff]   ;;  %v2987_v36 = vrot.slane %v2985_v3, 5  ;;  %v2978_v39 = vsel %vm4945_vm5, %v2973_v50, %v5703_v43  ;;  %v5764_v32 = vrot.slane %v3023_v21, 5  ;;  %v3029_v5 = vrot.slane %v3027_v30, 4 }
  0xa4   : > { %4588 = vmatpush3.bf16.msra.mxu1 %v5569_v59  ;;  %4557 = vmatprep.mubr.msk.bf16.mxu1 %vm1322_vm6, %v4226_v31  ;;  %v2957_v59 = vrot.slane %v2955_v2, 4  ;;  %v5685_v31 = vrot.slane %v2937_v56, 5  ;;  %v4702_v2 = vld [vmem:[#allocation2 + $0x6c] sm:$0xff]   ;;  %v3019_v3 = vrot.slane %v3017_v25, 5  ;;  %v3033_v27 = vshll.u32 %v5731_v62, 16 }
  0xa5   : > { %v3347_v48 = vrot.slane %v5777_v12, 5 }
  0xa6   : > { %v2958_v53 = vor.u32 %v2957_v59, %v5679_v44  ;;  %v2940_v41 = vsel %vm4945_vm5, %v5683_v34, %v5685_v31  ;;  %v2983_v59 = vrot.slane %v2982_v24, 4  ;;  %v2995_v34 = vrot.slane %v2993_v13, 5 }
  0xa7   : > { %v5736_v31 = vrot.slane %v2999_v4, 5  ;;  %v4258_v0 = vcombine.low %v2930_v29, %v2940_v41  ;;  %v5783_v13 = vrot.slane %v3009_v33, 5  ;;  %v2912_v29 = vld [vmem:[#allocation2 + $0x64] sm:$0xf]  ;;  %v2915_v33 = vld [vmem:[#allocation2 + $0x70] sm:$0xf] }
  0xa8   : > { %4580 = vmatmul.mubr.msk.bf16.gmra.mxu0 %vm1322_vm6, %v4700_v37  ;;  %v2959_v56 = vrot.slane %v2958_v53, 4  ;;  %v3337_v37 = vrot.slane %v2906_v26, 5  ;;  %v3340_v53 = vrot.slane %v5731_v62, 5  ;;  %v2988_v7 = vsel %vm4945_vm5, %v2983_v59, %v2987_v36  ;;  %v5796_v36 = vld [vmem:[#allocation2 + $0x68] sm:$0x1] }
  0xa9   : > { %4583 = vmatprep.mubr.msk.bf16.mxu0 %vm1322_vm6, %v4701_v38  ;;  %v3333_v38 = vrot.slane %v2904_v55, 5  ;;  %v5779_v24 = vcombine.low %v2978_v39, %v2988_v7  ;;  %v3030_v26 = vor.u32 %v3029_v5, %v5764_v32  ;;  %v3354_v59 = vrot.slane %v5796_v36, 5 }
  0xaa   : > { %v2964_v11 = vsel %vm4945_vm5, %v2959_v56, %v2963_v17  ;;  %v2911_v56 = vld [vmem:[#allocation2 + $0x60] sm:$0xf]  ;;  %v3075_v25 = vshrl.u32 %v2912_v29, 16 }
  0xab   : > { %4558 = vmatmul.mubr.msk.bf16.gmra.mxu1 %vm1322_vm6, %v4227_v8  ;;  %v2954_v8 = vsel %vm4945_vm5, %v5706_v63, %v5679_v44  ;;  %v3279_v44 = vld [vmem:[#allocation2 + $0x48] sm:$0xe]  ;;  %v3339_v63 = vrot.slane %v3337_v37, 4  ;;  %v5752_v40 = vsel %vm5039_vm9, %v3332_v51, %v3333_v38  ;;  %v3062_v50 = vshrl.u32 %v2911_v56, 16 }
  0xac   : > { %4561 = vmatprep.mubr.msk.bf16.mxu1 %vm1322_vm6, %v4228_v46  ;;  %v3327_v46 = vsel %vm5039_vm9, %v3325_v47, %v3326_v22  ;;  %v4278_v16 = vrot.slane %v3279_v44, 9  ;;  %v3006_v47 = vor.u32 %v3005_v58, %v5736_v31  ;;  %v3016_v22 = vrot.slane %v3014_v49, 4 }
  0xad   : > { %v4285_v1 = vcombine.low %v3324_v23, %v3327_v46  ;;  %v5771_v6 = vcombine.low %v2954_v8, %v2964_v11  ;;  %v3341_v43 = vsel %vm5039_vm9, %v3339_v63, %v3340_v53  ;;  %v3351_v8 = vrot.slane %v2912_v29, 5 }
  0xae   : > { %v5791_v4 = vrot.slane %v3006_v47, 4  ;;  %v3020_v23 = vor.u32 %v3019_v3, %v3016_v22  ;;  %v3065_v51 = vshll.u32 %v2911_v56, 16  ;;  %v3035_v38 = vrot.slane %v3033_v27, 5  ;;  %v2914_v47 = vld [vmem:[#allocation2 + $0x6c] sm:$0xf] }
  0xaf   : > { %v3353_v44 = vrot.slane %v3351_v8, 4  ;;  %v3031_v58 = vrot.slane %v3030_v26, 4  ;;  %v3071_v49 = vshll.u32 %v2912_v29, 16  ;;  %v3099_v29 = vshrl.u32 %v2915_v33, 16 }
  0xb0   : > { %4584 = vmatmul.mubr.msk.bf16.gmra.mxu0 %vm1322_vm6, %v4702_v2  ;;  %v3280_v2 = vld [vmem:[#allocation2 + $0x54] sm:$0xe]  ;;  %v3067_v63 = vrot.slane %v3065_v51, 5 }
  0xb1   : > { %4607 = vmatprep.mubr.msk.bf16.mxu0 %vm1322_vm6, %v4283_v45  ;;  %v5748_v45 = vsel %vm5039_vm9, %v4277_v19, %v3330_v14  ;;  %v2909_v14 = vld [vmem:[#allocation2 + $0x58] sm:$0xf]  ;;  %v4279_v46 = vrot.slane %v3280_v2, 9  ;;  %v3041_v19 = vshll.u32 %v2908_v60, 16  ;;  %v3073_v7 = vrot.slane %v3071_v49, 5 }
  0xb2   : > { %v4286_v55 = vcombine.low %v5748_v45, %v5752_v40  ;;  %v3344_v42 = vrot.slane %v2909_v14, 5  ;;  %v3051_v57 = vshrl.u32 %v2909_v14, 16  ;;  %v3355_v40 = vsel %vm5039_vm9, %v3353_v44, %v3354_v59 }
  0xb3   : > { %4562 = vmatmul.mubr.msk.bf16.gmra.mxu1 %vm1322_vm6, %v4229_v35  ;;  %v2996_v35 = vor.u32 %v2995_v34, %v2992_v61  ;;  %v4280_v61 = vrot.slane %v3281_v18, 9  ;;  %v3021_v34 = vrot.slane %v3020_v23, 4  ;;  %v3036_v22 = vsel %vm4945_vm5, %v3031_v58, %v3035_v38 }
  0xb4   : > { %4565 = vmatprep.mubr.msk.bf16.mxu1 %vm1322_vm6, %v4230_v9  ;;  %v3338_v9 = vsel %vm5039_vm9, %v4278_v16, %v3337_v37  ;;  %v3047_v37 = vshll.u32 %v2909_v14, 16  ;;  %v3346_v62 = vrot.slane %v3344_v42, 4  ;;  %v3345_v10 = vsel %vm5039_vm9, %v4279_v46, %v3344_v42 }
  0xb5   : > { %v5789_v41 = vrot.slane %v2996_v35, 4  ;;  %v4287_v17 = vcombine.low %v3338_v9, %v3341_v43  ;;  %v3053_v11 = vrot.slane %v3051_v57, 4  ;;  %v3064_v16 = vrot.slane %v3062_v50, 4  ;;  %v2916_v9 = vld [vmem:[#allocation2 + $0x74] sm:$0x1] }
  0xb6   : > { %v5807_v21 = vrot.slane %v3047_v37, 5  ;;  %v3348_v30 = vsel %vm5039_vm9, %v3346_v62, %v3347_v48  ;;  %v3352_v45 = vsel %vm5039_vm9, %v4280_v61, %v3351_v8  ;;  %v3026_v39 = vsel %vm4945_vm5, %v3021_v34, %v5764_v32  ;;  %v3282_v43 = vld [vmem:[#allocation2 + $0x6c] sm:$0xe] }
  0xb7   : > { %v3002_v53 = vsel %vm4945_vm5, %v5789_v41, %v5736_v31  ;;  %v3077_v31 = vrot.slane %v3075_v25, 4  ;;  %v3358_v35 = vrot.slane %v2915_v33, 5  ;;  %v4288_v3 = vcombine.low %v3345_v10, %v3348_v30 }
  0xb8   : > { %4608 = vmatmul.mubr.msk.bf16.vlgmr.msra.gmra.mxu0 %vm1322_vm6, %v4284_v52  ;;  %v3038_v52 = vshrl.u32 %v2908_v60, 16  ;;  %v3054_v14 = vor.u32 %v3053_v11, %v5807_v21  ;;  %v4289_v2 = vcombine.low %v3352_v45, %v3355_v40  ;;  %v3068_v32 = vor.u32 %v3067_v63, %v3064_v16 }
  0xb9   : > { %4611 = vmatprep.mubr.msk.bf16.mxu0 %vm1322_vm6, %v4285_v1  ;;  %v3012_v1 = vsel %vm4945_vm5, %v5791_v4, %v5783_v13  ;;  %v3086_v13 = vshrl.u32 %v2914_v47, 16  ;;  %v3089_v42 = vshll.u32 %v2914_v47, 16  ;;  %v3095_v60 = vshll.u32 %v2915_v33, 16 }
  0xba   : > { %v3040_v54 = vrot.slane %v3038_v52, 4  ;;  %v3078_v41 = vor.u32 %v3077_v31, %v3073_v7  ;;  %v3360_v4 = vrot.slane %v3358_v35, 4  ;;  %v3361_v27 = vrot.slane %v2916_v9, 5 }
  0xbb   : > { %4566 = vmatmul.mubr.msk.bf16.gmra.mxu1 %vm1322_vm6, %v4231_v15  ;;  %v3043_v15 = vrot.slane %v3041_v19, 5  ;;  %v4261_v8 = vcombine.low %v3002_v53, %v3012_v1  ;;  %v4262_v56 = vcombine.low %v3026_v39, %v3036_v22  ;;  %v3088_v46 = vrot.slane %v3086_v13, 4 }
  0xbc   : > { %4589 = vmatprep.mubr.msk.bf16.mxu1 %vm1322_vm6, %v4258_v0  ;;  %v3057_v0 = vshll.u32 %v5777_v12, 16  ;;  %v4281_v12 = vrot.slane %v3282_v43, 9  ;;  %v3097_v18 = vrot.slane %v3095_v60, 5  ;;  %v3069_v48 = vrot.slane %v3068_v32, 4 }
  0xbd   : > { %v3044_v5 = vor.u32 %v3043_v15, %v3040_v54  ;;  %v3079_v52 = vrot.slane %v3078_v41, 4  ;;  %v3362_v37 = vsel %vm5039_vm9, %v3360_v4, %v3361_v27  ;;  %v3105_v61 = vshll.u32 %v2916_v9, 16 }
  0xbe   : > { %v3059_v23 = vrot.slane %v3057_v0, 5  ;;  %v3359_v19 = vsel %vm5039_vm9, %v4281_v12, %v3358_v35  ;;  %v3074_v44 = vsel %vm4945_vm5, %v3069_v48, %v3073_v7 }
  0xbf   : > { %v4290_v50 = vcombine.low %v3359_v19, %v3362_v37  ;;  %v3107_v25 = vrot.slane %v3105_v61, 5 }
  0xc0   : > { %4612 = vmatmul.mubr.msk.bf16.gmra.mxu0 %vm1322_vm6, %v4286_v55  ;;  %v3081_v55 = vshll.u32 %v5796_v36, 16  ;;  %v3091_v36 = vrot.slane %v3089_v42, 5 }
  0xc1   : > { %4615 = vmatprep.mubr.msk.bf16.mxu0 %vm1322_vm6, %v4287_v17  ;;  %v3055_v17 = vrot.slane %v3054_v14, 4 }
  0xc2   : > { %v3083_v26 = vrot.slane %v3081_v55, 5  ;;  %v3092_v51 = vor.u32 %v3091_v36, %v3088_v46 }
  0xc3   : > { %4590 = vmatmul.mubr.msk.bf16.vlgmr.msra.gmra.mxu1 %vm1322_vm6, %v5771_v6  ;;  %v3045_v6 = vrot.slane %v3044_v5, 4  ;;  %v3060_v57 = vsel %vm4945_vm5, %v3055_v17, %v3059_v23 }
  0xc4   : > { %4593 = vmatprep.mubr.msk.bf16.mxu1 %vm1322_vm6, %v5779_v24  ;;  %v3101_v24 = vrot.slane %v3099_v29, 4  ;;  %v3084_v20 = vsel %vm4945_vm5, %v3079_v52, %v3083_v26  ;;  %v3093_v58 = vrot.slane %v3092_v51, 4 }
  0xc5   : > { %v3050_v62 = vsel %vm4945_vm5, %v3045_v6, %v5807_v21  ;;  %v4264_v34 = vcombine.low %v3074_v44, %v3084_v20 }
  0xc6   : > { %v3102_v38 = vor.u32 %v3101_v24, %v3097_v18  ;;  %v4263_v59 = vcombine.low %v3050_v62, %v3060_v57  ;;  %v3098_v10 = vsel %vm4945_vm5, %v3093_v58, %v3097_v18 }
  0xc8   : > { %4616 = vmatmul.mubr.msk.bf16.gmra.mxu0 %vm1322_vm6, %v4288_v3  ;;  %v3103_v49 = vrot.slane %v3102_v38, 4 }
  0xc9   : > { %4619 = vmatprep.mubr.msk.bf16.mxu0 %vm1322_vm6, %v4289_v2 }
  0xca   : > { %v3108_v54 = vsel %vm4945_vm5, %v3103_v49, %v3107_v25 }
  0xcb   : > { %4594 = vmatmul.mubr.msk.bf16.gmra.mxu1 %vm1322_vm6, %v4261_v8  ;;  %v4265_v15 = vcombine.low %v3098_v10, %v3108_v54 }
  0xcc   : > { %4597 = vmatprep.mubr.msk.bf16.mxu1 %vm1322_vm6, %v4262_v56 }
  0xd0   : > { %4620 = vmatmul.mubr.msk.bf16.gmra.mxu0 %vm1322_vm6, %v4290_v50 }
  0xd3   : > { %4598 = vmatmul.mubr.msk.bf16.gmra.mxu1 %vm1322_vm6, %v4263_v59 }
  0xd4   : > { %4601 = vmatprep.mubr.msk.bf16.mxu1 %vm1322_vm6, %v4264_v34 }
  0xdb   : > { %4602 = vmatmul.mubr.msk.bf16.gmra.mxu1 %vm1322_vm6, %v4265_v15 }
  0xf7   : > { %v4465_v21 = vpop.f32.mrf.mxu0 }
  0xf9   : > { %v1385_v30 = vpop.f32.mrf.mxu0 }
  0xfb   : > { %v4466_v11 = vpop.f32.mrf.mxu0 }
  0xfd   : > { %v1388_v63 = vpop.f32.mrf.mxu0 }
 0x106   : > { %v4473_v16 = vpop.f32.mrf.mxu1 }
 0x108   : > { %v1417_v53 = vpop.f32.mrf.mxu1 }
 0x10a   : > { %v4474_v40 = vpop.f32.mrf.mxu1 }
 0x10c   : > { %v1420_v7 = vpop.f32.mrf.mxu1 }
 0x110   : > { %v4469_v1 = vpop.f32.mrf.mxu0 }
 0x112   : > { %v1401_v45 = vpop.f32.mrf.mxu0 }
 0x114   : > { %v4470_v33 = vpop.f32.mrf.mxu0 }
 0x116   : > { %v1404_v39 = vpop.f32.mrf.mxu0 }
 0x118   : > { %v4501_v31 = vpop.f32.mrf.mxu0 }
 0x11a   : > { %v1782_v35 = vpop.f32.mrf.mxu0 }
 0x11b   : > { %v4477_v47 = vpop.f32.mrf.mxu1 }
 0x11c   : > { %v4502_v28 = vpop.f32.mrf.mxu0 }
 0x11d   : > { %v1433_v22 = vpop.f32.mrf.mxu1 }
 0x11e   : > { %v1785_v3 = vpop.f32.mrf.mxu0 }
 0x11f   : > { %v4478_v5 = vpop.f32.mrf.mxu1 }
 0x120   : > { %v4505_v0 = vpop.f32.mrf.mxu0 }
 0x121   : > { %v1436_v9 = vpop.f32.mrf.mxu1 }
 0x122   : > { %v1798_v43 = vpop.f32.mrf.mxu0 }
 0x123   : > { %v4483_v14 = vpop.f32.mrf.mxu1 }
 0x124   : > { %v1558_v2 = vadd.f32 %v4483_v14, %v4465_v21  ;;  %v4506_v32 = vpop.f32.mrf.mxu0 }
 0x125   : > { %v1549_v55 = vpop.f32.mrf.mxu1 }
 0x126   : > { %v1550_v13 = vadd.f32 %v1549_v55, %v1385_v30  ;;  %v1801_v42 = vpop.f32.mrf.mxu0  ;;  %v5862_v60 = vadd.f32 %v4501_v31, %v1558_v2 }
 0x127   : > { %v4484_v29 = vpop.f32.mrf.mxu1 }
 0x128   : > { %v1561_v41 = vadd.f32 %v4484_v29, %v4466_v11  ;;  %v4509_v12 = vpop.f32.mrf.mxu0  ;;  %v5864_v4 = vadd.f32 %v1782_v35, %v1550_v13 }
 0x129   : > { %v1552_v27 = vpop.f32.mrf.mxu1 }
 0x12a   : > { %v1553_v8 = vadd.f32 %v1552_v27, %v1388_v63  ;;  %v1814_v56 = vpop.f32.mrf.mxu0  ;;  %v5866_v6 = vadd.f32 %v4502_v28, %v1561_v41 }
 0x12b   : > { %v4487_v17 = vpop.f32.mrf.mxu1 }
 0x12c   : > { %v1574_v23 = vadd.f32 %v4487_v17, %v4469_v1  ;;  %v4510_v26 = vpop.f32.mrf.mxu0  ;;  %v5868_v46 = vadd.f32 %v1785_v3, %v1553_v8 }
 0x12d   : > { %v1565_v36 = vpop.f32.mrf.mxu1 }
 0x12e   : > { %v1566_v18 = vadd.f32 %v1565_v36, %v1401_v45  ;;  %v1817_v24 = vpop.f32.mrf.mxu0  ;;  %v5870_v48 = vadd.f32 %v4505_v0, %v1574_v23 }
 0x12f   : > { %v4488_v52 = vpop.f32.mrf.mxu1 }
 0x130   : > { %v1577_v19 = vadd.f32 %v4488_v52, %v4470_v33  ;;  %v4513_v37 = vpop.f32.mrf.mxu0  ;;  %v5872_v62 = vadd.f32 %v1798_v43, %v1566_v18 }
 0x131   : > { %v1568_v57 = vpop.f32.mrf.mxu1 }
 0x132   : > { %v1569_v50 = vadd.f32 %v1568_v57, %v1404_v39  ;;  %v1830_v51 = vpop.f32.mrf.mxu0  ;;  %v5874_v38 = vadd.f32 %v4506_v32, %v1577_v19 }
 0x133   : > { %v4491_v61 = vpop.f32.mrf.mxu1 }
 0x134   : > { %v1590_v44 = vadd.f32 %v4491_v61, %v4473_v16  ;;  %v4514_v20 = vpop.f32.mrf.mxu0  ;;  %v5876_v59 = vadd.f32 %v1801_v42, %v1569_v50 }
 0x135   : > { %v1581_v34 = vpop.f32.mrf.mxu1 }
 0x136   : > { %v1582_v58 = vadd.f32 %v1581_v34, %v1417_v53  ;;  %v1833_v49 = vpop.f32.mrf.mxu0  ;;  %v5878_v25 = vadd.f32 %v4509_v12, %v1590_v44 }
 0x137   : > { %v4492_v10 = vpop.f32.mrf.mxu1 }
 0x138   : > { %v1593_v54 = vadd.f32 %v4492_v10, %v4474_v40  ;;  %v5880_v15 = vpop.f32.mrf.mxu0  ;;  %v5882_v21 = vadd.f32 %v1814_v56, %v1582_v58 }
 0x139   : > { %v1584_v30 = vpop.f32.mrf.mxu1 }
 0x13a   : > { %v1585_v11 = vadd.f32 %v1584_v30, %v1420_v7  ;;  %v5884_v63 = vpop.f32.mrf.mxu0  ;;  %v5886_v1 = vadd.f32 %v4510_v26, %v1593_v54 }
 0x13b   : > { %v4495_v16 = vpop.f32.mrf.mxu1 }
 0x13c   : > { %v1606_v45 = vadd.f32 %v4495_v16, %v4477_v47  ;;  %v5888_v33 = vpop.f32.mrf.mxu0  ;;  %v5890_v53 = vadd.f32 %v1817_v24, %v1585_v11 }
 0x13d   : > { %v1597_v39 = vpop.f32.mrf.mxu1 }
 0x13e   : > { %v1598_v31 = vadd.f32 %v1597_v39, %v1433_v22  ;;  %v5892_v35 = vpop.f32.mrf.mxu0  ;;  %v5894_v40 = vadd.f32 %v4513_v37, %v1606_v45 }
 0x13f   : > { %v4496_v28 = vpop.f32.mrf.mxu1 }
 0x140   : > { %v1609_v3 = vadd.f32 %v4496_v28, %v4478_v5  ;;  %v5896_v0 = vpop.f32.mrf.mxu0  ;;  %v5898_v7 = vadd.f32 %v1830_v51, %v1598_v31 }
 0x141   : > { %v1600_v43 = vpop.f32.mrf.mxu1 }
 0x142   : > { %v1601_v14 = vadd.f32 %v1600_v43, %v1436_v9  ;;  %v5900_v2 = vpop.f32.mrf.mxu0  ;;  %v5902_v47 = vadd.f32 %v4514_v20, %v1609_v3 }
 0x143   : > { %v4519_v32 = vpop.f32.mrf.mxu1 }
 0x144   : > { %6175 = vst [vmem:[#allocation8_spill] sm:$0xff] %v5902_v47  ;;  %v5904_v55 = vpop.f32.mrf.mxu0  ;;  %v5906_v22 = vadd.f32 %v1833_v49, %v1601_v14 }
 0x145   : > { %v1980_v13 = vpop.f32.mrf.mxu1 }
 0x146   : > { %6176 = vst [vmem:[#allocation9_spill] sm:$0xff] %v5906_v22  ;;  %v5908_v42 = vpop.f32.mrf.mxu0 }
 0x147   : > { %v4520_v29 = vpop.f32.mrf.mxu1 }
 0x148   : > { %v5910_v5 = vpop.f32.mrf.mxu0 }
 0x149   : > { %v1983_v41 = vpop.f32.mrf.mxu1 }
 0x14a   : > { %v5912_v12 = vpop.f32.mrf.mxu0 }
 0x14b   : > { %v5914_v27 = vpop.f32.mrf.mxu1 }
 0x14c   : > { %v5916_v9 = vpop.f32.mrf.mxu0 }
 0x14d   : > { %v5918_v8 = vpop.f32.mrf.mxu1 }
 0x14e   : > { %v5920_v56 = vpop.f32.mrf.mxu0 }
 0x14f   : > { %6177 = vst [vmem:[#allocation10_spill] sm:$0xff] %v5920_v56  ;;  %v5922_v17 = vpop.f32.mrf.mxu1 }
 0x150   : > { %v5924_v23 = vpop.f32.mrf.mxu0 }
 0x151   : > { %6178 = vst [vmem:[#allocation11_spill] sm:$0xff] %v5924_v23  ;;  %v5926_v26 = vpop.f32.mrf.mxu1 }
 0x152   : > { %v5928_v36 = vpop.f32.mrf.mxu0 }
 0x153   : > { %6179 = vst [vmem:[#allocation12_spill] sm:$0xff] %v5928_v36  ;;  %v5930_v18 = vpop.f32.mrf.mxu1 }
 0x154   : > { %v5932_v24 = vpop.f32.mrf.mxu0 }
 0x155   : > { %6180 = vst [vmem:[#allocation13_spill] sm:$0xff] %v5932_v24  ;;  %v5934_v52 = vpop.f32.mrf.mxu1 }
 0x156   : > { %v5936_v19 = vpop.f32.mrf.mxu0 }
 0x157   : > { %6181 = vst [vmem:[#allocation14_spill] sm:$0xff] %v5936_v19  ;;  %v5938_v37 = vpop.f32.mrf.mxu1 }
 0x158   : > { %v5940_v57 = vpop.f32.mrf.mxu0 }
 0x159   : > { %v5942_v50 = vpop.f32.mrf.mxu1 }
 0x15a   : > { %v5944_v51 = vpop.f32.mrf.mxu0 }
 0x15b   : > { %v5946_v61 = vpop.f32.mrf.mxu1 }
 0x15c   : > { %v5948_v44 = vpop.f32.mrf.mxu0 }
 0x15d   : > { %v5950_v20 = vpop.f32.mrf.mxu1 }
 0x15e   : > { %v5952_v34 = vpop.f32.mrf.mxu0 }
 0x15f   : > { %v5954_v58 = vpop.f32.mrf.mxu1 }
 0x160   : > { %6182 = vst [vmem:[#allocation15_spill] sm:$0xff] %v5954_v58  ;;  %v5956_v49 = vpop.f32.mrf.mxu0  ;;  %v2043_v58 = vadd.f32 %v1980_v13, %v5864_v4 }
 0x161   : > { %v5958_v10 = vpop.f32.mrf.mxu1 }
 0x162   : > { %6183 = vst [vmem:[#allocation16_spill] sm:$0xff] %v5958_v10  ;;  %v5960_v54 = vpop.f32.mrf.mxu0 }
 0x163   : > { %6184 = vst [vmem:[#allocation17_spill] sm:$0xff] %v5960_v54  ;;  %v4555_v30 = vpop.f32.mrf.mxu1 }
 0x164   : > { %v5962_v11 = vpop.f32.mrf.mxu0 }
 0x165   : > { %6185 = vst [vmem:[#allocation18_spill] sm:$0xff] %v5962_v11  ;;  %v2616_v16 = vpop.f32.mrf.mxu1 }
 0x166   : > { %v5964_v45 = vpop.f32.mrf.mxu0 }
 0x167   : > { %6186 = vst [vmem:[#allocation19_spill] sm:$0xff] %v5964_v45  ;;  %v4556_v39 = vpop.f32.mrf.mxu1 }
 0x168   : > { %v5966_v31 = vpop.f32.mrf.mxu0 }
 0x169   : > { %6187 = vst [vmem:[#allocation20_spill] sm:$0xff] %v5966_v31  ;;  %v2619_v28 = vpop.f32.mrf.mxu1 }
 0x16a   : > { %v5968_v3 = vpop.f32.mrf.mxu0 }
 0x16b   : > { %6188 = vst [vmem:[#allocation21_spill] sm:$0xff] %v5968_v3  ;;  %v4559_v43 = vpop.f32.mrf.mxu1 }
 0x16c   : > { %v5970_v14 = vpop.f32.mrf.mxu0 }
 0x16d   : > { %6189 = vst [vmem:[#allocation22_spill] sm:$0xff] %v5970_v14  ;;  %v5972_v19 = vpop.f32.mrf.mxu1 }
 0x16e   : > { %v5974_v24 = vpop.f32.mrf.mxu0 }
 0x16f   : > { %6190 = vst [vmem:[#allocation23_spill] sm:$0xff] %v5974_v24  ;;  %v5976_v36 = vpop.f32.mrf.mxu1 }
 0x170   : > { %v5978_v10 = vpop.f32.mrf.mxu0 }
 0x171   : > { %6191 = vst [vmem:[#allocation24_spill] sm:$0xff] %v5978_v10  ;;  %v5980_v22 = vpop.f32.mrf.mxu1  ;;  %v2045_v10 = vadd.f32 %v4519_v32, %v5862_v60 }
 0x172   : > { %v5982_v23 = vpop.f32.mrf.mxu0 }
 0x173   : > { %6192 = vst [vmem:[#allocation25_spill] sm:$0xff] %v5982_v23  ;;  %v5984_v31 = vpop.f32.mrf.mxu1 }
 0x174   : > { %6193 = vst [vmem:[#allocation26_spill] sm:$0xff] %v5984_v31  ;;  %v5986_v45 = vpop.f32.mrf.mxu0 }
 0x175   : > { %6194 = vst [vmem:[#allocation27_spill] sm:$0xff] %v5986_v45  ;;  %v5988_v3 = vpop.f32.mrf.mxu1  ;;  %v2046_v45 = vadd.f32 %v4520_v29, %v5866_v6  ;;  %v2049_v6 = vadd.f32 %v5914_v27, %v5870_v48 }
 0x176   : > { %6195 = vst [vmem:[#allocation28_spill] sm:$0xff] %v5988_v3  ;;  %v5990_v14 = vpop.f32.mrf.mxu0 }
 0x177   : > { %6196 = vst [vmem:[#allocation29_spill] sm:$0xff] %v5990_v14  ;;  %v5992_v11 = vpop.f32.mrf.mxu1  ;;  %v2044_v14 = vadd.f32 %v1983_v41, %v5868_v46  ;;  %v2047_v41 = vadd.f32 %v5918_v8, %v5872_v62  ;;  %v2051_v62 = vadd.f32 %v5934_v52, %v5882_v21  ;;  %v2431_v8 = vadd.f32 %v5896_v0, %v2049_v6 }
 0x178   : > { %6197 = vst [vmem:[#allocation30_spill] sm:$0xff] %v5992_v11  ;;  %v4609_v24 = vpop.f32.mrf.mxu0  ;;  %v2427_v11 = vadd.f32 %v5880_v15, %v2045_v10  ;;  %v2048_v10 = vadd.f32 %v5926_v26, %v5876_v59  ;;  %v2052_v0 = vadd.f32 %v5942_v50, %v5890_v53 }
 0x179   : > { %v5994_v54 = vpop.f32.mrf.mxu1  ;;  %v2426_v15 = vadd.f32 %v5892_v35, %v2044_v14 }
 0x17a   : > { %6198 = vst [vmem:[#allocation31_spill] sm:$0xff] %v5994_v54  ;;  %v3450_v47 = vpop.f32.mrf.mxu0  ;;  %v2425_v54 = vadd.f32 %v5884_v63, %v2043_v58  ;;  %v2681_v4 = vadd.f32 %v4555_v30, %v2427_v11  ;;  %v2685_v30 = vadd.f32 %v4559_v43, %v2431_v8  ;;  %v2430_v52 = vadd.f32 %v5908_v42, %v2048_v10 }
 0x17b   : > { %v5999_v23 = vpop.f32.mrf.mxu1  ;;  %v2680_v48 = vadd.f32 %v2619_v28, %v2426_v15  ;;  %v2057_v42 = vadd.f32 %v5946_v61, %v5894_v40  ;;  %v6201_v61 = vld [vmem:[#allocation8_spill] sm:$0xff] }
 0x17c   : > { %6199 = vst [vmem:[#allocation32_spill] sm:$0xff] %v5999_v23  ;;  %v4610_v31 = vpop.f32.mrf.mxu0  ;;  %v2679_v13 = vadd.f32 %v2616_v16, %v2425_v54  ;;  %v2428_v23 = vadd.f32 %v5888_v33, %v2046_v45  ;;  %v2050_v33 = vadd.f32 %v5922_v17, %v5874_v38  ;;  %v2879_v27 = vadd.f32 %v5940_v57, %v2681_v4  ;;  %v6203_v4 = vld [vmem:[#allocation17_spill] sm:$0xff] }
 0x17d   : > { %v6002_v3 = vpop.f32.mrf.mxu1  ;;  %v2053_v54 = vadd.f32 %v5930_v18, %v5878_v25  ;;  %v2429_v25 = vadd.f32 %v5900_v2, %v2047_v41  ;;  %v6206_v10 = vld [vmem:[#allocation28_spill] sm:$0xff] }
 0x17e   : > { %v3453_v60 = vpop.f32.mrf.mxu0  ;;  %v2682_v46 = vadd.f32 %v4556_v39, %v2428_v23  ;;  %v2877_v23 = vadd.f32 %v5944_v51, %v2679_v13  ;;  %v2054_v51 = vadd.f32 %v5938_v37, %v5886_v1  ;;  %v2432_v21 = vadd.f32 %v5904_v55, %v2050_v33 }
 0x17f   : > { %v6008_v32 = vpop.f32.mrf.mxu1  ;;  %v2683_v45 = vadd.f32 %v5972_v19, %v2429_v25  ;;  %v2435_v2 = vadd.f32 %v5910_v5, %v2053_v54  ;;  %v2433_v55 = vadd.f32 %v5912_v12, %v2051_v62  ;;  %v2883_v5 = vadd.f32 %v5956_v49, %v2685_v30 }
 0x180   : > { %v6011_v56 = vpop.f32.mrf.mxu0  ;;  %v2880_v26 = vadd.f32 %v5948_v44, %v2682_v46  ;;  %v2878_v44 = vadd.f32 %v5952_v34, %v2680_v48  ;;  %v2686_v1 = vadd.f32 %v5976_v36, %v2432_v21  ;;  %v2684_v34 = vadd.f32 %v5980_v22, %v2430_v52  ;;  %v6204_v46 = vld [vmem:[#allocation18_spill] sm:$0xff] }
 0x181   : > { %v6015_v29 = vpop.f32.mrf.mxu1  ;;  %v2436_v43 = vadd.f32 %v5916_v9, %v2054_v51  ;;  %v6202_v9 = vld [vmem:[#allocation15_spill] sm:$0xff]  ;;  %v2881_v13 = vadd.f32 %v6203_v4, %v2683_v45  ;;  %v2687_v48 = vadd.f32 %v6206_v10, %v2433_v55 }
 0x182   : > { %v6019_v63 = vpop.f32.mrf.mxu0  ;;  %v2884_v49 = vadd.f32 %v6204_v46, %v2686_v1  ;;  %v6209_v45 = vld [vmem:[#allocation31_spill] sm:$0xff] }
 0x183   : > { %v4591_v58 = vpop.f32.mrf.mxu1  ;;  %v6219_v10 = vld [vmem:[#allocation23_spill] sm:$0xff] }
 0x184   : > { %v6029_v35 = vpop.f32.mrf.mxu0  ;;  %v3261_v59 = vadd.f32 %v4591_v58, %v2879_v27 }
 0x185   : > { %v3196_v38 = vpop.f32.mrf.mxu1 }
 0x186   : > { %v3259_v17 = vadd.f32 %v3196_v38, %v2877_v23  ;;  %v6039_v57 = vpop.f32.mrf.mxu0  ;;  %v3515_v39 = vadd.f32 %v4609_v24, %v3261_v59  ;;  %v6200_v24 = vld [vmem:[#allocation10_spill] sm:$0xff]  ;;  %v6207_v23 = vld [vmem:[#allocation19_spill] sm:$0xff] }
 0x187   : > { %v4592_v18 = vpop.f32.mrf.mxu1  ;;  %v2434_v40 = vadd.f32 %v6200_v24, %v2052_v0  ;;  %v2882_v54 = vadd.f32 %v6207_v23, %v2684_v34  ;;  %v6213_v24 = vld [vmem:[#allocation9_spill] sm:$0xff] }
 0x188   : > { %v3262_v11 = vadd.f32 %v4592_v18, %v2880_v26  ;;  %v6050_v16 = vpop.f32.mrf.mxu0  ;;  %v3513_v28 = vadd.f32 %v3450_v47, %v3259_v17  ;;  %v2055_v47 = vadd.f32 %v5950_v20, %v5898_v7  ;;  %v6205_v7 = vld [vmem:[#allocation26_spill] sm:$0xff]  ;;  %v3633_v8 = vmul.f32 %v3515_v39, %v3515_v39 }
 0x189   : > { %v3199_v37 = vpop.f32.mrf.mxu1  ;;  %v2689_v20 = vadd.f32 %v6205_v7, %v2435_v2  ;;  %v6208_v26 = vld [vmem:[#allocation30_spill] sm:$0xff]  ;;  %v2688_v1 = vadd.f32 %v6209_v45, %v2434_v40  ;;  %v6210_v2 = vld [vmem:[#allocation11_spill] sm:$0xff] }
 0x18a   : > { %v3516_v53 = vadd.f32 %v4610_v31, %v3262_v11  ;;  %v3260_v50 = vadd.f32 %v3199_v37, %v2878_v44  ;;  %v6066_v36 = vpop.f32.mrf.mxu0  ;;  %v2058_v31 = vadd.f32 %v6202_v9, %v6201_v61  ;;  %v3631_v15 = vmul.f32 %v3513_v28, %v3513_v28  ;;  %v6211_v37 = vld [vmem:[#allocation20_spill] sm:$0xff]  ;;  %v6216_v61 = vld [vmem:[#allocation13_spill] sm:$0xff] }
 0x18b   : > { %v4595_v12 = vpop.f32.mrf.mxu1  ;;  %v2690_v51 = vadd.f32 %v6208_v26, %v2436_v43  ;;  %v2439_v55 = vadd.f32 %v6210_v2, %v2057_v42 }
 0x18c   : > { %v4341_v19 = vpack.c.bf16 %v3516_v53, %v3515_v39  ;;  %v3514_v22 = vadd.f32 %v3453_v60, %v3260_v50  ;;  %v3265_v14 = vadd.f32 %v4595_v12, %v2883_v5  ;;  %v4618_v62 = vpop.f32.mrf.mxu0  ;;  %v3634_v30 = vmul.f32 %v3516_v53, %v3516_v53  ;;  %v6212_v50 = vld [vmem:[#allocation21_spill] sm:$0xff] }
 0x18d   : > { %v3212_v6 = vpop.f32.mrf.mxu1  ;;  %v2885_v34 = vadd.f32 %v6212_v50, %v2687_v48  ;;  %v2440_v40 = vadd.f32 %v6216_v61, %v2058_v31  ;;  %v2886_v48 = vadd.f32 %v6219_v10, %v2688_v1 }
 0x18e   : > { %4373 = vst [vmem:[%s6063_s14 + $0x8] sm:$0xff] %v4341_v19   ;;  %v4336_v41 = vpack.c.bf16 %v3514_v22, %v3513_v28  ;;  %v3609_v33 = vadd.f32 %v3514_v22, %v3513_v28  ;;  %v3632_v58 = vmul.f32 %v3514_v22, %v3514_v22  ;;  %v3263_v60 = vadd.f32 %v3212_v6, %v2881_v13  ;;  %v3485_v43 = vpop.f32.mrf.mxu0  ;;  %v6217_v6 = vld [vmem:[#allocation22_spill] sm:$0xff] }
 0x18f   : > { %v4596_v27 = vpop.f32.mrf.mxu1  ;;  %v3519_v25 = vadd.f32 %v6011_v56, %v3265_v14  ;;  %v2888_v46 = vadd.f32 %v6217_v6, %v2690_v51  ;;  %v2694_v31 = vadd.f32 %v6008_v32, %v2440_v40 }
 0x190   : > { %4337 = vst [vmem:[%s6063_s14] sm:$0xff] %v4336_v41   ;;  %v3610_v38 = vadd.f32 %v3609_v33, %v3515_v39  ;;  %v3647_v59 = vadd.f32 %v3632_v58, %v3631_v15  ;;  %v3266_v17 = vadd.f32 %v4596_v27, %v2884_v49  ;;  %v3517_v21 = vadd.f32 %v6019_v63, %v3263_v60  ;;  %v6218_v49 = vld [vmem:[#allocation32_spill] sm:$0xff] }
 0x191   : > { %v3215_v18 = vpop.f32.mrf.mxu1  ;;  %v2887_v39 = vadd.f32 %v6211_v37, %v2689_v20  ;;  %v2693_v15 = vadd.f32 %v6218_v49, %v2439_v55  ;;  %v4621_v20 = vpop.f32.mrf.mxu0  ;;  %v3637_v60 = vmul.f32 %v3519_v25, %v3519_v25  ;;  %v6223_v37 = vld [vmem:[#allocation27_spill] sm:$0xff] }
 0x192   : > { %v3648_v0 = vadd.f32 %v3647_v59, %v3633_v8  ;;  %v3611_v52 = vadd.f32 %v3610_v38, %v3516_v53  ;;  %v3520_v11 = vadd.f32 %v6029_v35, %v3266_v17  ;;  %v3264_v44 = vadd.f32 %v3215_v18, %v2882_v54  ;;  %v6214_v53 = vld [vmem:[#allocation16_spill] sm:$0xff]  ;;  %v6220_v38 = vld [vmem:[#allocation14_spill] sm:$0xff] }
 0x193   : > { %v4599_v28 = vpop.f32.mrf.mxu1  ;;  %v3635_v5 = vmul.f32 %v3517_v21, %v3517_v21  ;;  %v2056_v19 = vadd.f32 %v6214_v53, %v6213_v24  ;;  %v6215_v35 = vld [vmem:[#allocation12_spill] sm:$0xff] }
 0x194   : > { %v3612_v56 = vadd.f32 %v3611_v52, %v3517_v21  ;;  %v3649_v63 = vadd.f32 %v3648_v0, %v3634_v30  ;;  %v4351_v12 = vpack.c.bf16 %v3520_v11, %v3519_v25  ;;  %v2437_v22 = vadd.f32 %v6215_v35, %v2055_v47  ;;  %v3498_v52 = vpop.f32.mrf.mxu0 }
 0x195   : > { %v3518_v9 = vadd.f32 %v6039_v57, %v3264_v44  ;;  %v3228_v42 = vpop.f32.mrf.mxu1  ;;  %v3269_v4 = vadd.f32 %v4599_v28, %v2887_v39  ;;  %v2438_v59 = vadd.f32 %v6220_v38, %v2056_v19  ;;  %v2892_v39 = vadd.f32 %v6223_v37, %v2694_v31 }
 0x196   : > { %v3650_v14 = vadd.f32 %v3649_v63, %v3635_v5  ;;  %4375 = vst [vmem:[%s6063_s14 + $0x18] sm:$0xff] %v4351_v12   ;;  %v3267_v13 = vadd.f32 %v3228_v42, %v2885_v34  ;;  %v2691_v47 = vadd.f32 %v6002_v3, %v2437_v22  ;;  %v3638_v3 = vmul.f32 %v3520_v11, %v3520_v11  ;;  %v4622_v63 = vpop.f32.mrf.mxu0  ;;  %v6224_v12 = vld [vmem:[#allocation29_spill] sm:$0xff] }
 0x197   : > { %v4346_v41 = vpack.c.bf16 %v3518_v9, %v3517_v21  ;;  %v3613_v33 = vadd.f32 %v3612_v56, %v3518_v9  ;;  %v3636_v58 = vmul.f32 %v3518_v9, %v3518_v9  ;;  %v4600_v7 = vpop.f32.mrf.mxu1  ;;  %v3523_v17 = vadd.f32 %v6050_v16, %v3269_v4  ;;  %v6221_v21 = vld [vmem:[#allocation24_spill] sm:$0xff] }
 0x198   : > { %v3270_v57 = vadd.f32 %v4600_v7, %v2888_v46  ;;  %v3521_v54 = vadd.f32 %v6066_v36, %v3267_v13  ;;  %v2891_v18 = vadd.f32 %v6221_v21, %v2693_v15  ;;  %v6222_v36 = vld [vmem:[#allocation25_spill] sm:$0xff]  ;;  %v3501_v6 = vpop.f32.mrf.mxu0 }
 0x199   : > { %4374 = vst [vmem:[%s6063_s14 + $0x10] sm:$0xff] %v4346_v41   ;;  %v3614_v27 = vadd.f32 %v3613_v33, %v3519_v25  ;;  %v3651_v23 = vadd.f32 %v3650_v14, %v3636_v58  ;;  %v3231_v8 = vpop.f32.mrf.mxu1  ;;  %v2692_v25 = vadd.f32 %v6015_v29, %v2438_v59  ;;  %v2889_v1 = vadd.f32 %v6222_v36, %v2691_v47 }
 0x19a   : > { %v3524_v26 = vadd.f32 %v4618_v62, %v3270_v57  ;;  %v3268_v51 = vadd.f32 %v3231_v8, %v2886_v48  ;;  %v3639_v55 = vmul.f32 %v3521_v54, %v3521_v54  ;;  %v3641_v53 = vmul.f32 %v3523_v17, %v3523_v17 }
 0x19b   : > { %v3652_v30 = vadd.f32 %v3651_v23, %v3637_v60  ;;  %v3615_v32 = vadd.f32 %v3614_v27, %v3520_v11  ;;  %v4603_v0 = vpop.f32.mrf.mxu1  ;;  %v2890_v24 = vadd.f32 %v6224_v12, %v2692_v25 }
 0x19c   : > { %v4361_v44 = vpack.c.bf16 %v3524_v26, %v3523_v17  ;;  %v3522_v45 = vadd.f32 %v3485_v43, %v3268_v51  ;;  %v3273_v50 = vadd.f32 %v4603_v0, %v2891_v18  ;;  %v3642_v14 = vmul.f32 %v3524_v26, %v3524_v26 }
 0x19d   : > { %v3616_v2 = vadd.f32 %v3615_v32, %v3521_v54  ;;  %v3653_v16 = vadd.f32 %v3652_v30, %v3638_v3  ;;  %v3244_v62 = vpop.f32.mrf.mxu1 }
 0x19e   : > { %4377 = vst [vmem:[%s6063_s14 + $0x28] sm:$0xff] %v4361_v44   ;;  %v4356_v28 = vpack.c.bf16 %v3522_v45, %v3521_v54  ;;  %v3640_v11 = vmul.f32 %v3522_v45, %v3522_v45  ;;  %v3271_v34 = vadd.f32 %v3244_v62, %v2889_v1  ;;  %v3527_v40 = vadd.f32 %v4621_v20, %v3273_v50 }
 0x19f   : > { %v3654_v56 = vadd.f32 %v3653_v16, %v3639_v55  ;;  %v3617_v5 = vadd.f32 %v3616_v2, %v3522_v45  ;;  %v4604_v29 = vpop.f32.mrf.mxu1 }
 0x1a0   : > { %4376 = vst [vmem:[%s6063_s14 + $0x20] sm:$0xff] %v4356_v28   ;;  %v3274_v43 = vadd.f32 %v4604_v29, %v2892_v39  ;;  %v3525_v22 = vadd.f32 %v3498_v52, %v3271_v34  ;;  %v3645_v20 = vmul.f32 %v3527_v40, %v3527_v40 }
 0x1a1   : > { %v3618_v19 = vadd.f32 %v3617_v5, %v3523_v17  ;;  %v3655_v35 = vadd.f32 %v3654_v56, %v3640_v11  ;;  %v3247_v61 = vpop.f32.mrf.mxu1 }
 0x1a2   : > { %v3528_v9 = vadd.f32 %v4622_v63, %v3274_v43  ;;  %v3272_v42 = vadd.f32 %v3247_v61, %v2890_v24  ;;  %v3643_v41 = vmul.f32 %v3525_v22, %v3525_v22 }
 0x1a3   : > { %v3656_v4 = vadd.f32 %v3655_v35, %v3641_v53  ;;  %v3619_v13 = vadd.f32 %v3618_v19, %v3524_v26 }
 0x1a4   : > { %v4371_v46 = vpack.c.bf16 %v3528_v9, %v3527_v40  ;;  %v3526_v49 = vadd.f32 %v3501_v6, %v3272_v42  ;;  %v3646_v48 = vmul.f32 %v3528_v9, %v3528_v9 }
 0x1a5   : > { %v3620_v15 = vadd.f32 %v3619_v13, %v3525_v22  ;;  %v3657_v33 = vadd.f32 %v3656_v4, %v3642_v14 }
 0x1a6   : > { %4379 = vst [vmem:[%s6063_s14 + $0x38] sm:$0xff] %v4371_v46   ;;  %v4366_v58 = vpack.c.bf16 %v3526_v49, %v3525_v22  ;;  %v3644_v7 = vmul.f32 %v3526_v49, %v3526_v49 }
 0x1a7   : > { %v3658_v47 = vadd.f32 %v3657_v33, %v3643_v41  ;;  %v3621_v31 = vadd.f32 %v3620_v15, %v3526_v49 }
 0x1a8   : > { %4378 = vst [vmem:[%s6063_s14 + $0x30] sm:$0xff] %v4366_v58  }
 0x1a9   : > { %v3622_v57 = vadd.f32 %v3621_v31, %v3527_v40  ;;  %v3659_v10 = vadd.f32 %v3658_v47, %v3644_v7 }
 0x1ab   : > { %v3623_v60 = vadd.f32 %v3622_v57, %v3528_v9  ;;  %v3660_v27 = vadd.f32 %v3659_v10, %v3645_v20 }
 0x1ad   : > { %v3624_v23 = vrot.slane %v3623_v60, 4  ;;  %v3661_v54 = vadd.f32 %v3660_v27, %v3646_v48 }
 0x1af   : > { %v3625_v8 = vadd.f32 %v3624_v23, %v3623_v60  ;;  %v3662_v38 = vrot.slane %v3661_v54, 4 }
 0x1b1   : > { %v3626_v59 = vrot.slane %v3625_v8, 2  ;;  %v3663_v17 = vadd.f32 %v3662_v38, %v3661_v54 }
 0x1b3   : > { %v3627_v26 = vadd.f32 %v3626_v59, %v3625_v8  ;;  %v3664_v51 = vrot.slane %v3663_v17, 2 }
 0x1b5   : > { %v3628_v3 = vrot.slane %v3627_v26, 1  ;;  %v3665_v30 = vadd.f32 %v3664_v51, %v3663_v17 }
 0x1b7   : > { %v3629_v32 = vadd.f32 %v3628_v3, %v3627_v26  ;;  %v3666_v21 = vrot.slane %v3665_v30, 1 }
 0x1b9   : > { %3630 = vst [vmem:[%s991_s19] sm:$0x1] %v3629_v32  ;;  %v3667_v18 = vadd.f32 %v3666_v21, %v3665_v30 }
 0x1bb   : > { %3668 = vst [vmem:[%s1001_s27] sm:$0x1] %v3667_v18 }
 0x1bc PF: > { %s6225_s21 = sld [smem:[#allocation5_spill]] }
 0x1bd   : > { %s6226_s25 = sld [smem:[#allocation3_spill]] }
 0x1be   : > { %s6227_s26 = sld [smem:[#allocation4_spill]] }
 0x1bf   : > { %s6228_s27 = sld [smem:[#allocation6_spill]] }
 0x1c0   : > { %s6229_s28 = sld [smem:[#allocation7_spill]] }
 0x1c2   : > { %s24_s29 = sadd.s32 1, %s6225_s21  }
 0x1c3   : > { %p21_p4 = scmp.ge.s32.totalorder %s24_s29, 6  }
 0x1c5   :  { %23 = sbr.rel (!%p21_p4) target bundleno = 3 (0x3), region = 165 }

</bundles_post_ra>
